<compile_context>
chip_gen: v5e
topology: v5e:2x2
jax: 0.10.0
libtpu: 0.0.40
codegen_flags: <defaults>
</compile_context>

<pallas_src>
import numpy as np
import jax
import jax.numpy as jnp
from jax.experimental import pallas as pl
from jax.experimental.pallas import tpu as pltpu


def _round_up(x: int, m: int) -> int:
    return ((x + m - 1) // m) * m


# --------------------------------- kernel -----------------------------------

def _make_mlp_kernel(num_layers: int, sigmoid_output: bool):
    """Kernel computing the full Linear/ReLU(/sigmoid) stack on one row tile."""

    def kernel(*refs):
        # refs = (x_ref, w0, b0, w1, b1, ..., o_ref)
        x_ref = refs[0]
        o_ref = refs[-1]
        param_refs = refs[1:-1]

        h = x_ref[...]                          # bf16 [tm, in_dim] (pre-cast)
        for i in range(num_layers):
            w = param_refs[2 * i][...]          # bf16 [in_i, out_i]
            b = param_refs[2 * i + 1][...]      # f32  [1, out_i]
            # bf16 x bf16 -> f32 on the MXU (peak path on v5e/v6e/v7x).
            acc = jnp.dot(h, w, preferred_element_type=jnp.float32)
            acc = acc + b                       # broadcast over rows (f32)
            if i < num_layers - 1:
                acc = jnp.maximum(acc, 0.0)     # ReLU on hidden layers (f32)
                h = acc.astype(jnp.bfloat16)    # back to bf16 for next MXU pass
            else:
                h = acc                         # final layer stays f32
        if sigmoid_output:
            h = jax.nn.sigmoid(h)               # EUP slot, stays in-kernel
        o_ref[...] = h.astype(o_ref.dtype)

    return kernel


# -------------------------------- wrapper ------------------------------------

# Below this many token rows, XLA's fused dot chain beats the pallas_call
# fixed cost (launch + DMA setup) outright on every generation.
_FAST_PATH_MAX_ROWS = 256


def time_enc_pallas(x, weights, biases, sigmoid_output=False, tm=4096):
    """Run the TimeEnc MLP.

    x:       [..., input_dim] float32
    weights: list of [in, out] float32
    biases:  list of [out] float32
    """
    num_layers = len(weights)
    orig_shape = x.shape
    input_dim = orig_shape[-1]
    out_dim = weights[-1].shape[1]

    x2 = x.reshape(-1, input_dim).astype(jnp.float32)
    n = x2.shape[0]

    # ---- small-N bypass: pure f32 jnp chain (exactly the module math) -------
    if n <= _FAST_PATH_MAX_ROWS:
        h = x2
        for i, (w, b) in enumerate(zip(weights, biases)):
            h = h @ w + b
            if i < num_layers - 1:
                h = jnp.maximum(h, 0.0)
        if sigmoid_output:
            h = jax.nn.sigmoid(h)
        return h.reshape(orig_shape[:-1] + (out_dim,))

    # ---- pad hidden (inter-layer) widths to multiples of 128 ----------------
    # Zero rows/cols are inert through bias-add/ReLU, so semantics are exact.
    dims = [input_dim] + [w.shape[1] for w in weights]
    pdims = list(dims)
    for j in range(1, num_layers):              # only intermediate widths
        pdims[j] = max(128, _round_up(dims[j], 128))

    ws, bs = [], []
    for i, (w, b) in enumerate(zip(weights, biases)):
        pin, pout = pdims[i], pdims[i + 1]
        w = jnp.pad(w, ((0, pin - dims[i]), (0, pout - dims[i + 1])))
        b = jnp.pad(b, (0, pout - dims[i + 1]))
        # Weights bf16 for the MXU (halves weight DMA too); biases stay f32
        # as [1, out] so they broadcast as 2-D tiles inside the kernel.
        ws.append(w.astype(jnp.bfloat16))
        bs.append(b.reshape(1, -1).astype(jnp.float32))

    # ---- token-dimension tiling ----------------------------------------------
    # bf16 input stream (half the HBM->VMEM bytes of f32).
    x2 = x2.astype(jnp.bfloat16)
    # Keep >= 2 grid steps so v7x megacore can split the parallel token axis;
    # tm is a multiple of 128 (satisfies bf16 (16,128) / f32 (8,128) packing).
    half = pl.cdiv(n, 2)
    tm_eff = min(tm, max(128, _round_up(half, 128)))
    n_pad = _round_up(n, tm_eff)
    if n_pad != n:
        x2 = jnp.pad(x2, ((0, n_pad - n), (0, 0)))
    grid = (n_pad // tm_eff,)

    args = [x2]
    param_specs = []
    for w, b in zip(ws, bs):
        args.extend([w, b])
        # Constant index_map -> parameters stay VMEM-resident across the grid.
        param_specs.append(pl.BlockSpec(w.shape, lambda i: (0, 0)))
        param_specs.append(pl.BlockSpec(b.shape, lambda i: (0, 0)))

    in_specs = [pl.BlockSpec((tm_eff, input_dim), lambda i: (i, 0))] + param_specs
    # Output block's last dim equals the full array dim (out_dim), so the HBM
    # write stream is exactly N*out_dim*4 bytes -- no 128-lane padding and no
    # post-kernel column slice.
    out_spec = pl.BlockSpec((tm_eff, out_dim), lambda i: (i, 0))

    # Advisory cost estimate (real, unpadded math).
    flops = 2 * n * sum(dims[i] * dims[i + 1] for i in range(num_layers))
    transcendentals = n * out_dim if sigmoid_output else 0
    bytes_accessed = (
        n_pad * input_dim * 2                                    # x (bf16)
        + sum(int(w.size) * 2 + int(b.size) * 4 for w, b in zip(ws, bs))
        + n_pad * out_dim * 4                                    # out (f32)
    )

    kernel = _make_mlp_kernel(num_layers, sigmoid_output)

    out_padded = pl.pallas_call(
        kernel,
        out_shape=jax.ShapeDtypeStruct((n_pad, out_dim), jnp.float32),
        grid=grid,
        in_specs=in_specs,
        out_specs=out_spec,
        compiler_params=pltpu.CompilerParams(
            # Token axis is embarrassingly parallel -> shard across TCs on v7x.
            dimension_semantics=("parallel",),
            # ~12-16 MiB used at tm=4096; well under v7x's 64 MiB physical VMEM.
            vmem_limit_bytes=32 * 1024 * 1024,
        ),
        cost_estimate=pl.CostEstimate(
            flops=flops,
            transcendentals=transcendentals,
            bytes_accessed=bytes_accessed,
        ),
    )(*args)

    out = out_padded[:n]
    return out.reshape(orig_shape[:-1] + (out_dim,))


# ----------------------- deterministic parameter init -----------------------

def xavier_uniform(key, fan_in, fan_out):
    limit = float(np.sqrt(6.0 / (fan_in + fan_out)))
    return jax.random.uniform(
        key, (fan_in, fan_out), minval=-limit, maxval=limit, dtype=jnp.float32
    )


def init_time_enc_params(key, input_dim, hidden_dim, output_dim, num_layers):
    dims_in = [input_dim] + [hidden_dim] * (num_layers - 1)
    dims_out = [hidden_dim] * (num_layers - 1) + [output_dim]
    weights, biases = [], []
    for n_in, n_out in zip(dims_in, dims_out):
        key, sub = jax.random.split(key)
        weights.append(xavier_uniform(sub, n_in, n_out))
        biases.append(jnp.zeros((n_out,), dtype=jnp.float32))
    return weights, biases


# --------------------------------- reference ---------------------------------

def time_enc_reference(x, weights, biases, sigmoid_output=False):
    h = x
    L = len(weights)
    for i, (w, b) in enumerate(zip(weights, biases)):
        h = h @ w + b
        if i < L - 1:
            h = jnp.maximum(h, 0.0)
    if sigmoid_output:
        h = jax.nn.sigmoid(h)
    return h


if __name__ == "__main__":
    key = jax.random.PRNGKey(0)

    # Module config (small, consistent with TimeEnc's MLP forward).
    input_dim, hidden_dim, output_dim, num_layers = 32, 32, 8, 3
    sigmoid_output = True

    k_x1, k_x2, k_p = jax.random.split(key, 3)
    weights, biases = init_time_enc_params(
        k_p, input_dim, hidden_dim, output_dim, num_layers
    )

    # ---- Pallas-kernel path: [batch=2, seq=1024, input_dim] -> N=2048 tokens,
    # grid=(2,) so both v7x TensorCores get work.
    x_big = jax.random.normal(k_x1, (2, 1024, input_dim), dtype=jnp.float32)
    out_big = jax.block_until_ready(
        time_enc_pallas(x_big, weights, biases, sigmoid_output)
    )
    ref_big = time_enc_reference(x_big, weights, biases, sigmoid_output)
    # Kernel uses bf16 MXU inputs (activations + weights) with f32 accumulation
    # across 3 layers -> loosened tolerance vs the pure-f32 reference.
    np.testing.assert_allclose(np.asarray(out_big), np.asarray(ref_big),
                               rtol=3e-2, atol=3e-2)

    # ---- Small-N fast path (bypasses pallas_call): [batch=2, seq=8, input_dim]
    x_small = jax.random.normal(k_x2, (2, 8, input_dim), dtype=jnp.float32)
    out_small = jax.block_until_ready(
        time_enc_pallas(x_small, weights, biases, sigmoid_output)
    )
    ref_small = time_enc_reference(x_small, weights, biases, sigmoid_output)
    np.testing.assert_allclose(np.asarray(out_small), np.asarray(ref_small),
                               rtol=1e-5, atol=1e-5)

    print("KERNEL_OK")
</pallas_src>

<mosaic_0001>
module attributes {stable_mosaic.version = 11 : i64} {
  func.func @kernel(%arg0: i32, %arg1: memref<1024x32xbf16, #tpu.memory_space<vmem>>, %arg2: memref<32x128xbf16, #tpu.memory_space<vmem>>, %arg3: memref<1x128xf32, #tpu.memory_space<vmem>>, %arg4: memref<128x128xbf16, #tpu.memory_space<vmem>>, %arg5: memref<1x128xf32, #tpu.memory_space<vmem>>, %arg6: memref<128x8xbf16, #tpu.memory_space<vmem>>, %arg7: memref<1x8xf32, #tpu.memory_space<vmem>>, %arg8: memref<1024x8xf32, #tpu.memory_space<vmem>>) attributes {dimension_semantics = [#tpu.dimension_semantics<parallel>], iteration_bounds = array<i64: 2>, scalar_prefetch = 0 : i64, scratch_operands = 0 : i64, tpu.core_type = #tpu.core_type<tc>, window_params = [{transform_indices = @transform_0, window_bounds = array<i64: 1024, 32>}, {pipeline_mode = #tpu.pipeline_mode<synchronous>, transform_indices = @transform_1, window_bounds = array<i64: 32, 128>}, {pipeline_mode = #tpu.pipeline_mode<synchronous>, transform_indices = @transform_2, window_bounds = array<i64: 1, 128>}, {pipeline_mode = #tpu.pipeline_mode<synchronous>, transform_indices = @transform_3, window_bounds = array<i64: 128, 128>}, {pipeline_mode = #tpu.pipeline_mode<synchronous>, transform_indices = @transform_4, window_bounds = array<i64: 1, 128>}, {pipeline_mode = #tpu.pipeline_mode<synchronous>, transform_indices = @transform_5, window_bounds = array<i64: 128, 8>}, {pipeline_mode = #tpu.pipeline_mode<synchronous>, transform_indices = @transform_6, window_bounds = array<i64: 1, 8>}, {transform_indices = @transform_7, window_bounds = array<i64: 1024, 8>}]} {
    %c0 = arith.constant 0 : index
    %c0_0 = arith.constant 0 : index
    %0 = vector.load %arg1[%c0, %c0_0] : memref<1024x32xbf16, #tpu.memory_space<vmem>>, vector<1024x32xbf16>
    %c0_1 = arith.constant 0 : index
    %c0_2 = arith.constant 0 : index
    %1 = vector.load %arg2[%c0_1, %c0_2] : memref<32x128xbf16, #tpu.memory_space<vmem>>, vector<32x128xbf16>
    %c0_3 = arith.constant 0 : index
    %c0_4 = arith.constant 0 : index
    %2 = vector.load %arg3[%c0_3, %c0_4] : memref<1x128xf32, #tpu.memory_space<vmem>>, vector<1x128xf32>
    %cst = arith.constant dense<0.000000e+00> : vector<1024x128xf32>
    %3 = tpu.matmul %0, %1, %cst {dimension_numbers = #tpu.dot_dimension_numbers<[1], [0], [0], [1], [0, 0, 1, 1], [], []>} : vector<1024x32xbf16>, vector<32x128xbf16>, vector<1024x128xf32> -> vector<1024x128xf32>
    %4 = vector.broadcast %2 : vector<1x128xf32> to vector<1024x128xf32>
    %5 = arith.addf %3, %4 : vector<1024x128xf32>
    %cst_5 = arith.constant 0.000000e+00 : f32
    %6 = vector.broadcast %cst_5 : f32 to vector<1024x128xf32>
    %7 = arith.maximumf %5, %6 : vector<1024x128xf32>
    %8 = arith.truncf %7 : vector<1024x128xf32> to vector<1024x128xbf16>
    %c0_6 = arith.constant 0 : index
    %c0_7 = arith.constant 0 : index
    %9 = vector.load %arg4[%c0_6, %c0_7] : memref<128x128xbf16, #tpu.memory_space<vmem>>, vector<128x128xbf16>
    %c0_8 = arith.constant 0 : index
    %c0_9 = arith.constant 0 : index
    %10 = vector.load %arg5[%c0_8, %c0_9] : memref<1x128xf32, #tpu.memory_space<vmem>>, vector<1x128xf32>
    %cst_10 = arith.constant dense<0.000000e+00> : vector<1024x128xf32>
    %11 = tpu.matmul %8, %9, %cst_10 {dimension_numbers = #tpu.dot_dimension_numbers<[1], [0], [0], [1], [0, 0, 1, 1], [], []>} : vector<1024x128xbf16>, vector<128x128xbf16>, vector<1024x128xf32> -> vector<1024x128xf32>
    %12 = vector.broadcast %10 : vector<1x128xf32> to vector<1024x128xf32>
    %13 = arith.addf %11, %12 : vector<1024x128xf32>
    %cst_11 = arith.constant 0.000000e+00 : f32
    %14 = vector.broadcast %cst_11 : f32 to vector<1024x128xf32>
    %15 = arith.maximumf %13, %14 : vector<1024x128xf32>
    %16 = arith.truncf %15 : vector<1024x128xf32> to vector<1024x128xbf16>
    %c0_12 = arith.constant 0 : index
    %c0_13 = arith.constant 0 : index
    %17 = vector.load %arg6[%c0_12, %c0_13] : memref<128x8xbf16, #tpu.memory_space<vmem>>, vector<128x8xbf16>
    %c0_14 = arith.constant 0 : index
    %c0_15 = arith.constant 0 : index
    %18 = vector.load %arg7[%c0_14, %c0_15] : memref<1x8xf32, #tpu.memory_space<vmem>>, vector<1x8xf32>
    %cst_16 = arith.constant dense<0.000000e+00> : vector<1024x8xf32>
    %19 = tpu.matmul %16, %17, %cst_16 {dimension_numbers = #tpu.dot_dimension_numbers<[1], [0], [0], [1], [0, 0, 1, 1], [], []>} : vector<1024x128xbf16>, vector<128x8xbf16>, vector<1024x8xf32> -> vector<1024x8xf32>
    %20 = vector.broadcast %18 : vector<1x8xf32> to vector<1024x8xf32>
    %21 = arith.addf %19, %20 : vector<1024x8xf32>
    %22 = arith.negf %21 : vector<1024x8xf32>
    %23 = math.exp %22 : vector<1024x8xf32>
    %cst_17 = arith.constant 1.000000e+00 : f32
    %24 = vector.broadcast %cst_17 : f32 to vector<1024x8xf32>
    %25 = arith.addf %24, %23 : vector<1024x8xf32>
    %26 = arith.divf %24, %25 : vector<1024x8xf32>
    %c0_18 = arith.constant 0 : index
    %c0_19 = arith.constant 0 : index
    %27 = vector.load %arg8[%c0_18, %c0_19] : memref<1024x8xf32, #tpu.memory_space<vmem>>, vector<1024x8xf32>
    tpu.vector_store %arg8[%c0_18, %c0_19], %26 {strides = array<i32>} : memref<1024x8xf32, #tpu.memory_space<vmem>>, vector<1024x8xf32>,
    return
  }
  func.func @transform_0(%arg0: i32) -> (i32, i32) {
    %c0_i32 = arith.constant 0 : i32
    %c0_i32_0 = arith.constant 0 : i32
    return %arg0, %c0_i32 : i32, i32
  }
  func.func @transform_1(%arg0: i32) -> (i32, i32) {
    %c0_i32 = arith.constant 0 : i32
    %c0_i32_0 = arith.constant 0 : i32
    %c0_i32_1 = arith.constant 0 : i32
    return %c0_i32, %c0_i32_0 : i32, i32
  }
  func.func @transform_2(%arg0: i32) -> (i32, i32) {
    %c0_i32 = arith.constant 0 : i32
    %c0_i32_0 = arith.constant 0 : i32
    %c0_i32_1 = arith.constant 0 : i32
    return %c0_i32, %c0_i32_0 : i32, i32
  }
  func.func @transform_3(%arg0: i32) -> (i32, i32) {
    %c0_i32 = arith.constant 0 : i32
    %c0_i32_0 = arith.constant 0 : i32
    %c0_i32_1 = arith.constant 0 : i32
    return %c0_i32, %c0_i32_0 : i32, i32
  }
  func.func @transform_4(%arg0: i32) -> (i32, i32) {
    %c0_i32 = arith.constant 0 : i32
    %c0_i32_0 = arith.constant 0 : i32
    %c0_i32_1 = arith.constant 0 : i32
    return %c0_i32, %c0_i32_0 : i32, i32
  }
  func.func @transform_5(%arg0: i32) -> (i32, i32) {
    %c0_i32 = arith.constant 0 : i32
    %c0_i32_0 = arith.constant 0 : i32
    %c0_i32_1 = arith.constant 0 : i32
    return %c0_i32, %c0_i32_0 : i32, i32
  }
  func.func @transform_6(%arg0: i32) -> (i32, i32) {
    %c0_i32 = arith.constant 0 : i32
    %c0_i32_0 = arith.constant 0 : i32
    %c0_i32_1 = arith.constant 0 : i32
    return %c0_i32, %c0_i32_0 : i32, i32
  }
  func.func @transform_7(%arg0: i32) -> (i32, i32) {
    %c0_i32 = arith.constant 0 : i32
    %c0_i32_0 = arith.constant 0 : i32
    return %arg0, %c0_i32 : i32, i32
  }
}

</mosaic_0001>

<bundles_post_ra>
// kernel: tpu_custom_call.1
= control target key start
LH: loop header
LB: loop body
LE: loop exit
PB: predicated region body
PF: predicated region fallthrough
CT: control target
= control target key end

     0   :  { %s6295_s24 = smov 0   ;;  %s7830_s0 = inlined_call_operand.vmem [shape: bf16[2048,32], index: 0, kind: input, shape index: {}]   ;;  %s7831_s1 = inlined_call_operand.vmem [shape: bf16[32,128], index: 1, kind: input, shape index: {}]   ;;  %s7832_s2 = inlined_call_operand.vmem [shape: f32[1,128], index: 2, kind: input, shape index: {}]   ;;  %s7833_s3 = inlined_call_operand.vmem [shape: bf16[128,128], index: 3, kind: input, shape index: {}]   ;;  %s7834_s4 = inlined_call_operand.vmem [shape: f32[1,128], index: 4, kind: input, shape index: {}]   ;;  %s7835_s5 = inlined_call_operand.vmem [shape: bf16[128,8], index: 5, kind: input, shape index: {}]   ;;  %s7836_s6 = inlined_call_operand.vmem [shape: f32[1,8], index: 6, kind: input, shape index: {}]   ;;  %s7837_s7 = inlined_call_operand.vmem [shape: f32[2048,8], index: 7, kind: output, shape index: {}]  }
   0x1 LB: > { %s5068_s25 = sadd.s32 4294967295, %s6253_s24   ;;  %p5072_p0 = scmp.ge.s32.totalorder %s6253_s24, 1  ;;  %s6253_s24 = sphi %s6295_s24, %s17_s24  }
   0x2   : > { %p238_p1 = scmp.lt.s32.totalorder %s6253_s24, 3 }
   0x4   : > { %p239_p2 = pnand %p5072_p0, %p238_p1 }
   0x5   : > { %s5073_s28 = sshll.u32 (!%p239_p2), %s5068_s25, 7 }
   0x6   : > { %242 = sbr.rel (%p239_p2) target bundleno = 1594 (0x63a), region = 48  ;;  %p271_p3 = scmp.lt.s32.totalorder (!%p239_p2), %s5073_s28, 255 }
   0xb   : > { %v5664_v0 = vld [vmem:[%s7831_s1 + $0x8] sm:$0xff]  ;;  %v5663_v1 = vld [vmem:[%s7831_s1] sm:$0xff]  ;;  %s7839_s28 = smov (!%p271_p3, %s5073_s28), 255  ;;  %vm751_vm0 = vcmask 261120   ;;  %v5672_v7 = vld [vmem:[%s7833_s3 + $0x38] sm:$0xff]  ;;  %vm4883_vm4 = vcmask 64512  }
   0xc   : > { %950 = vmatpush.bf16.msra.mxu0 %v5664_v0  ;;  %5681 = vmatpush.bf16.msra.mxu3 %v5664_v0  ;;  %s5074_s8 = sshll.u32 %s7839_s28, 2  ;;  %v5671_v9 = vld [vmem:[%s7833_s3 + $0x30] sm:$0xff]  ;;  %v5670_v10 = vld [vmem:[%s7833_s3 + $0x28] sm:$0xff]  ;;  %v5669_v11 = vld [vmem:[%s7833_s3 + $0x20] sm:$0xff]  ;;  %s5076_s9 = sshll.u32 %s7839_s28, 3 }
   0xd   : > { %s6315_s11 = scalar_lea.vmem %s7830_s0, %s5074_s8  ;;  %1533 = vmatpush.bf16.msra.mxu1 %v5672_v7  ;;  %v5668_v12 = vld [vmem:[%s7833_s3 + $0x18] sm:$0xff]  ;;  %v5667_v14 = vld [vmem:[%s7833_s3 + $0x10] sm:$0xff]  ;;  %v5666_v15 = vld [vmem:[%s7833_s3 + $0x8] sm:$0xff]  ;;  %s6508_s13 = scalar_lea.vmem %s7837_s7, %s5076_s9 }
   0xe   : > { %v5599_v2 = vld [vmem:[%s6315_s11] sm:$0xff]  ;;  %v5600_v3 = vld [vmem:[%s6315_s11 + $0x8] sm:$0xff]  ;;  %v5601_v4 = vld [vmem:[%s6315_s11 + $0x10] sm:$0xff] }
   0xf   : > { %v5602_v5 = vld [vmem:[%s6315_s11 + $0x18] sm:$0xff]  ;;  %v5603_v6 = vld [vmem:[%s6315_s11 + $0x20] sm:$0xff]  ;;  %v5604_v8 = vld [vmem:[%s6315_s11 + $0x28] sm:$0xff] }
  0x10   : > { %951 = vmatpush.bf16.msra.mxu0 %v5663_v1  ;;  %5682 = vmatpush.bf16.msra.mxu3 %v5663_v1  ;;  %v5605_v13 = vld [vmem:[%s6315_s11 + $0x30] sm:$0xff]  ;;  %v5665_v16 = vld [vmem:[%s7833_s3] sm:$0xff]  ;;  %v5606_v17 = vld [vmem:[%s6315_s11 + $0x38] sm:$0xff] }
  0x11   : > { %1534 = vmatpush.bf16.msra.mxu1 %v5671_v9  ;;  %v5607_v18 = vld [vmem:[%s6315_s11 + $0x40] sm:$0xff]  ;;  %v5608_v27 = vld [vmem:[%s6315_s11 + $0x48] sm:$0xff]  ;;  %v5609_v35 = vld [vmem:[%s6315_s11 + $0x50] sm:$0xff] }
  0x12   : > { %v6361_v20 = vld [vmem:[%s7832_s2] ss:$0 sm:$0xff]  ;;  %v5610_v43 = vld [vmem:[%s6315_s11 + $0x58] sm:$0xff]  ;;  %v5612_v59 = vld [vmem:[%s6315_s11 + $0x68] sm:$0xff] }
  0x13   : > { %5341 = vmatmul.msk.bf16.vlgmr.msra.gmra.mxu0 %vm751_vm0, %v5599_v2  ;;  %v5611_v51 = vld [vmem:[%s6315_s11 + $0x60] sm:$0xff]  ;;  %v5680_v0 = vld [vmem:[%s7835_s5 + $0x38] sm:$0xff] }
  0x14   : > { %5683 = vmatpush.bf16.msrb.mxu3 %v5672_v7  ;;  %2122 = vmatpush.bf16.msra.mxu2 %v5680_v0  ;;  %v5678_v7 = vld [vmem:[%s7835_s5 + $0x28] sm:$0xff] }
  0x15   : > { %1535 = vmatpush.bf16.msra.mxu1 %v5670_v10 }
  0x18   : > { %5684 = vmatpush.bf16.msrb.mxu3 %v5671_v9 }
  0x19   : > { %1536 = vmatpush.bf16.msra.mxu1 %v5669_v11 }
  0x1c   : > { %5685 = vmatpush.bf16.msrb.mxu3 %v5670_v10 }
  0x1d   : > { %1537 = vmatpush.bf16.msra.mxu1 %v5668_v12 }
  0x20   : > { %5686 = vmatpush.bf16.msrb.mxu3 %v5669_v11 }
  0x21   : > { %1538 = vmatpush.bf16.msra.mxu1 %v5667_v14 }
  0x23   : > { %5342 = vmatmul.msk.bf16.gmra.mxu0 %vm751_vm0, %v5600_v3 }
  0x24   : > { %5687 = vmatpush.bf16.msrb.mxu3 %v5668_v12  ;;  %v5676_v12 = vld [vmem:[%s7835_s5 + $0x18] sm:$0xff] }
  0x25   : > { %1539 = vmatpush.bf16.msra.mxu1 %v5666_v15 }
  0x28   : > { %5688 = vmatpush.bf16.msrb.mxu3 %v5667_v14 }
  0x29   : > { %1540 = vmatpush.bf16.msra.mxu1 %v5665_v16 }
  0x2c   : > { %5689 = vmatpush.bf16.msrb.mxu3 %v5666_v15 }
  0x30   : > { %5690 = vmatpush.bf16.msrb.mxu3 %v5665_v16  ;;  %v5675_v16 = vld [vmem:[%s7835_s5 + $0x10] sm:$0xff] }
  0x33   : > { %5343 = vmatmul.msk.bf16.gmra.mxu0 %vm751_vm0, %v5601_v4  ;;  %v5679_v4 = vld [vmem:[%s7835_s5 + $0x30] sm:$0xff] }
  0x34   : > { %2123 = vmatpush.bf16.msra.mxu2 %v5679_v4  ;;  %v5618_v4 = vld [vmem:[%s6315_s11 + $0x98] sm:$0xff] }
  0x38   : > { %2124 = vmatpush.bf16.msra.mxu2 %v5678_v7 }
  0x43   : > { %5344 = vmatmul.msk.bf16.gmra.mxu0 %vm751_vm0, %v5602_v5  ;;  %v5613_v5 = vld [vmem:[%s6315_s11 + $0x70] sm:$0xff] }
  0x53   : > { %5345 = vmatmul.msk.bf16.gmra.mxu0 %vm751_vm0, %v5603_v6 }
  0x63   : > { %5346 = vmatmul.msk.bf16.gmra.mxu0 %vm751_vm0, %v5604_v8  ;;  %v5677_v8 = vld [vmem:[%s7835_s5 + $0x20] sm:$0xff] }
  0x64   : > { %2125 = vmatpush.bf16.msra.mxu2 %v5677_v8 }
  0x68   : > { %2126 = vmatpush.bf16.msra.mxu2 %v5676_v12 }
  0x6c   : > { %2127 = vmatpush.bf16.msra.mxu2 %v5675_v16 }
  0x73   : > { %5347 = vmatmul.msk.bf16.gmra.mxu0 %vm751_vm0, %v5605_v13 }
  0x83   : > { %5348 = vmatmul.msk.bf16.gmra.mxu0 %vm751_vm0, %v5606_v17  ;;  %v5614_v17 = vld [vmem:[%s6315_s11 + $0x78] sm:$0xff] }
  0x90   : > { %v953_v19 = vpop.f32.mrf.mxu0 }
  0x91   : > { %v954_v21 = vadd.f32 %v6361_v20, %v953_v19  ;;  %v5674_v19 = vld [vmem:[%s7835_s5 + $0x8] sm:$0xff] }
  0x92   : > { %2128 = vmatpush.bf16.msra.mxu2 %v5674_v19  ;;  %v5619_v19 = vld [vmem:[%s6315_s11 + $0xa0] sm:$0xff] }
  0x93   : > { %5349 = vmatmul.msk.bf16.gmra.mxu0 %vm751_vm0, %v5607_v18  ;;  %v1273_v24 = vmax.f32 %v954_v21, 0.0  ;;  %v5673_v21 = vld [vmem:[%s7835_s5] sm:$0xff] }
  0x96   : > { %2129 = vmatpush.bf16.msra.mxu2 %v5673_v21 }
  0x98   : > { %v955_v22 = vpop.f32.mrf.mxu0 }
  0x99   : > { %v956_v23 = vadd.f32 %v6361_v20, %v955_v22 }
  0x9b   : > { %v1274_v25 = vmax.f32 %v956_v23, 0.0 }
  0x9d   : > { %v1401_v26 = vpack.c.bf16 %v1274_v25, %v1273_v24 }
  0x9f   : > { %1541 = vmatmul.bf16.vlgmr.msra.gmra.mxu1 %v1401_v26 }
  0xa0   : > { %v958_v28 = vpop.f32.mrf.mxu0 }
  0xa1   : > { %v959_v29 = vadd.f32 %v6361_v20, %v958_v28  ;;  %v5615_v28 = vld [vmem:[%s6315_s11 + $0x80] sm:$0xff] }
  0xa3   : > { %5350 = vmatmul.msk.bf16.gmra.mxu0 %vm751_vm0, %v5608_v27  ;;  %v1275_v32 = vmax.f32 %v959_v29, 0.0 }
  0xa8   : > { %v960_v30 = vpop.f32.mrf.mxu0 }
  0xa9   : > { %v961_v31 = vadd.f32 %v6361_v20, %v960_v30 }
  0xab   : > { %v1276_v33 = vmax.f32 %v961_v31, 0.0 }
  0xad   : > { %v1402_v34 = vpack.c.bf16 %v1276_v33, %v1275_v32 }
  0xaf   : > { %1546 = vmatmul.bf16.gmra.mxu1 %v1402_v34 }
  0xb0   : > { %v963_v36 = vpop.f32.mrf.mxu0 }
  0xb1   : > { %v964_v37 = vadd.f32 %v6361_v20, %v963_v36 }
  0xb3   : > { %5351 = vmatmul.msk.bf16.gmra.mxu0 %vm751_vm0, %v5609_v35  ;;  %v1277_v40 = vmax.f32 %v964_v37, 0.0  ;;  %v6425_v37 = vld [vmem:[%s7834_s4] ss:$0 sm:$0xff] }
  0xb8   : > { %v965_v38 = vpop.f32.mrf.mxu0 }
  0xb9   : > { %v966_v39 = vadd.f32 %v6361_v20, %v965_v38  ;;  %v5616_v38 = vld [vmem:[%s6315_s11 + $0x88] sm:$0xff] }
  0xbb   : > { %v1278_v41 = vmax.f32 %v966_v39, 0.0 }
  0xbd   : > { %v1403_v42 = vpack.c.bf16 %v1278_v41, %v1277_v40 }
  0xbf   : > { %1551 = vmatmul.bf16.gmra.mxu1 %v1403_v42 }
  0xc0   : > { %v968_v44 = vpop.f32.mrf.mxu0 }
  0xc1   : > { %v969_v45 = vadd.f32 %v6361_v20, %v968_v44 }
  0xc3   : > { %5352 = vmatmul.msk.bf16.gmra.mxu0 %vm751_vm0, %v5610_v43  ;;  %v1279_v48 = vmax.f32 %v969_v45, 0.0 }
  0xc8   : > { %v970_v46 = vpop.f32.mrf.mxu0 }
  0xc9   : > { %v971_v47 = vadd.f32 %v6361_v20, %v970_v46 }
  0xcb   : > { %v1280_v49 = vmax.f32 %v971_v47, 0.0 }
  0xcd   : > { %v1404_v50 = vpack.c.bf16 %v1280_v49, %v1279_v48 }
  0xcf   : > { %1556 = vmatmul.bf16.gmra.mxu1 %v1404_v50 }
  0xd0   : > { %v973_v52 = vpop.f32.mrf.mxu0 }
  0xd1   : > { %v974_v53 = vadd.f32 %v6361_v20, %v973_v52 }
  0xd3   : > { %5353 = vmatmul.msk.bf16.gmra.mxu0 %vm751_vm0, %v5611_v51  ;;  %v1281_v56 = vmax.f32 %v974_v53, 0.0  ;;  %v5617_v53 = vld [vmem:[%s6315_s11 + $0x90] sm:$0xff] }
  0xd8   : > { %v975_v54 = vpop.f32.mrf.mxu0 }
  0xd9   : > { %v976_v55 = vadd.f32 %v6361_v20, %v975_v54 }
  0xdb   : > { %v1282_v57 = vmax.f32 %v976_v55, 0.0 }
  0xdd   : > { %v1405_v58 = vpack.c.bf16 %v1282_v57, %v1281_v56 }
  0xdf   : > { %1561 = vmatmul.bf16.gmra.mxu1 %v1405_v58 }
  0xe0   : > { %v978_v60 = vpop.f32.mrf.mxu0 }
  0xe1   : > { %v979_v61 = vadd.f32 %v6361_v20, %v978_v60 }
  0xe3   : > { %5354 = vmatmul.msk.bf16.gmra.mxu0 %vm751_vm0, %v5612_v59  ;;  %v1283_v1 = vmax.f32 %v979_v61, 0.0 }
  0xe8   : > { %v980_v62 = vpop.f32.mrf.mxu0 }
  0xe9   : > { %v981_v63 = vadd.f32 %v6361_v20, %v980_v62 }
  0xeb   : > { %v1284_v2 = vmax.f32 %v981_v63, 0.0 }
  0xed   : > { %v1406_v3 = vpack.c.bf16 %v1284_v2, %v1283_v1 }
  0xef   : > { %1566 = vmatmul.bf16.gmra.mxu1 %v1406_v3 }
  0xf0   : > { %v983_v6 = vpop.f32.mrf.mxu0 }
  0xf1   : > { %v984_v9 = vadd.f32 %v6361_v20, %v983_v6 }
  0xf3   : > { %5355 = vmatmul.msk.bf16.gmra.mxu0 %vm751_vm0, %v5613_v5  ;;  %v1285_v13 = vmax.f32 %v984_v9, 0.0 }
  0xf8   : > { %v985_v10 = vpop.f32.mrf.mxu0 }
  0xf9   : > { %v986_v11 = vadd.f32 %v6361_v20, %v985_v10 }
  0xfb   : > { %v1286_v14 = vmax.f32 %v986_v11, 0.0 }
  0xfd   : > { %v1407_v15 = vpack.c.bf16 %v1286_v14, %v1285_v13 }
  0xff   : > { %1571 = vmatmul.bf16.gmra.mxu1 %v1407_v15 }
 0x100   : > { %v988_v18 = vpop.f32.mrf.mxu0 }
 0x101   : > { %v989_v22 = vadd.f32 %v6361_v20, %v988_v18 }
 0x103   : > { %5356 = vmatmul.msk.bf16.gmra.mxu0 %vm751_vm0, %v5614_v17  ;;  %v1287_v25 = vmax.f32 %v989_v22, 0.0 }
 0x108   : > { %v990_v23 = vpop.f32.mrf.mxu0 }
 0x109   : > { %v991_v24 = vadd.f32 %v6361_v20, %v990_v23 }
 0x10b   : > { %v1288_v26 = vmax.f32 %v991_v24, 0.0 }
 0x10d   : > { %v1408_v27 = vpack.c.bf16 %v1288_v26, %v1287_v25 }
 0x10f   : > { %1576 = vmatmul.bf16.gmra.mxu1 %v1408_v27 }
 0x110   : > { %v993_v29 = vpop.f32.mrf.mxu0 }
 0x111   : > { %v994_v30 = vadd.f32 %v6361_v20, %v993_v29 }
 0x113   : > { %5357 = vmatmul.msk.bf16.gmra.mxu0 %vm751_vm0, %v5615_v28  ;;  %v1289_v33 = vmax.f32 %v994_v30, 0.0 }
 0x118   : > { %v995_v31 = vpop.f32.mrf.mxu0 }
 0x119   : > { %v996_v32 = vadd.f32 %v6361_v20, %v995_v31 }
 0x11b   : > { %v1290_v34 = vmax.f32 %v996_v32, 0.0 }
 0x11c   : > { %v1542_v35 = vpop.f32.mrf.mxu1 }
 0x11d   : > { %v1409_v36 = vpack.c.bf16 %v1290_v34, %v1289_v33  ;;  %v1543_v40 = vadd.f32 %v6425_v37, %v1542_v35  ;;  %v5620_v35 = vld [vmem:[%s6315_s11 + $0xa8] sm:$0xff] }
 0x11f   : > { %1581 = vmatmul.bf16.gmra.mxu1 %v1409_v36  ;;  %v1862_v43 = vmax.f32 %v1543_v40, 0.0 }
 0x120   : > { %v998_v39 = vpop.f32.mrf.mxu0 }
 0x121   : > { %v999_v44 = vadd.f32 %v6361_v20, %v998_v39 }
 0x123   : > { %5358 = vmatmul.msk.bf16.gmra.mxu0 %vm751_vm0, %v5616_v38  ;;  %v1291_v49 = vmax.f32 %v999_v44, 0.0 }
 0x124   : > { %v1544_v41 = vpop.f32.mrf.mxu1 }
 0x125   : > { %v1545_v42 = vadd.f32 %v6425_v37, %v1544_v41 }
 0x127   : > { %v1863_v45 = vmax.f32 %v1545_v42, 0.0 }
 0x128   : > { %v1000_v46 = vpop.f32.mrf.mxu0 }
 0x129   : > { %v1001_v47 = vadd.f32 %v6361_v20, %v1000_v46  ;;  %v1990_v48 = vpack.c.bf16 %v1863_v45, %v1862_v43 }
 0x12b   : > { %v1292_v50 = vmax.f32 %v1001_v47, 0.0  ;;  %2130 = vmatmul.bf16.vlgmr.msra.gmra.mxu2 %v1990_v48 }
 0x12c   : > { %v1547_v51 = vpop.f32.mrf.mxu1 }
 0x12d   : > { %v1410_v52 = vpack.c.bf16 %v1292_v50, %v1291_v49  ;;  %v1548_v55 = vadd.f32 %v6425_v37, %v1547_v51  ;;  %v5621_v51 = vld [vmem:[%s6315_s11 + $0xb0] sm:$0xff] }
 0x12f   : > { %1586 = vmatmul.bf16.gmra.mxu1 %v1410_v52  ;;  %v1864_v58 = vmax.f32 %v1548_v55, 0.0 }
 0x130   : > { %v1003_v54 = vpop.f32.mrf.mxu0 }
 0x131   : > { %v1004_v59 = vadd.f32 %v6361_v20, %v1003_v54 }
 0x133   : > { %5359 = vmatmul.msk.bf16.gmra.mxu0 %vm751_vm0, %v5617_v53  ;;  %v1293_v0 = vmax.f32 %v1004_v59, 0.0 }
 0x134   : > { %v1549_v56 = vpop.f32.mrf.mxu1 }
 0x135   : > { %v1550_v57 = vadd.f32 %v6425_v37, %v1549_v56 }
 0x137   : > { %v1865_v60 = vmax.f32 %v1550_v57, 0.0 }
 0x138   : > { %v1005_v61 = vpop.f32.mrf.mxu0 }
 0x139   : > { %v1006_v62 = vadd.f32 %v6361_v20, %v1005_v61  ;;  %v1991_v63 = vpack.c.bf16 %v1865_v60, %v1864_v58 }
 0x13b   : > { %v1294_v1 = vmax.f32 %v1006_v62, 0.0  ;;  %2135 = vmatmul.bf16.gmra.mxu2 %v1991_v63 }
 0x13c   : > { %v1552_v2 = vpop.f32.mrf.mxu1 }
 0x13d   : > { %v1411_v3 = vpack.c.bf16 %v1294_v1, %v1293_v0  ;;  %v1553_v6 = vadd.f32 %v6425_v37, %v1552_v2  ;;  %v5622_v2 = vld [vmem:[%s6315_s11 + $0xb8] sm:$0xff] }
 0x13f   : > { %1591 = vmatmul.bf16.gmra.mxu1 %v1411_v3  ;;  %v1866_v9 = vmax.f32 %v1553_v6, 0.0 }
 0x140   : > { %v1008_v5 = vpop.f32.mrf.mxu0 }
 0x141   : > { %v1009_v10 = vadd.f32 %v6361_v20, %v1008_v5 }
 0x143   : > { %5360 = vmatmul.msk.bf16.gmra.mxu0 %vm751_vm0, %v5618_v4  ;;  %v1295_v15 = vmax.f32 %v1009_v10, 0.0 }
 0x144   : > { %v1554_v7 = vpop.f32.mrf.mxu1 }
 0x145   : > { %v1555_v8 = vadd.f32 %v6425_v37, %v1554_v7 }
 0x147   : > { %v1867_v11 = vmax.f32 %v1555_v8, 0.0 }
 0x148   : > { %v1010_v12 = vpop.f32.mrf.mxu0 }
 0x149   : > { %v1011_v13 = vadd.f32 %v6361_v20, %v1010_v12  ;;  %v1992_v14 = vpack.c.bf16 %v1867_v11, %v1866_v9 }
 0x14b   : > { %v1296_v16 = vmax.f32 %v1011_v13, 0.0  ;;  %2140 = vmatmul.bf16.gmra.mxu2 %v1992_v14 }
 0x14c   : > { %v1557_v17 = vpop.f32.mrf.mxu1 }
 0x14d   : > { %v1412_v18 = vpack.c.bf16 %v1296_v16, %v1295_v15  ;;  %v1558_v22 = vadd.f32 %v6425_v37, %v1557_v17  ;;  %v5623_v17 = vld [vmem:[%s6315_s11 + $0xc0] sm:$0xff] }
 0x14f   : > { %1596 = vmatmul.bf16.gmra.mxu1 %v1412_v18  ;;  %v1868_v25 = vmax.f32 %v1558_v22, 0.0 }
 0x150   : > { %v1013_v21 = vpop.f32.mrf.mxu0 }
 0x151   : > { %v1014_v26 = vadd.f32 %v6361_v20, %v1013_v21 }
 0x153   : > { %5361 = vmatmul.msk.bf16.gmra.mxu0 %vm751_vm0, %v5619_v19  ;;  %v1297_v31 = vmax.f32 %v1014_v26, 0.0 }
 0x154   : > { %v1559_v23 = vpop.f32.mrf.mxu1 }
 0x155   : > { %v1560_v24 = vadd.f32 %v6425_v37, %v1559_v23 }
 0x157   : > { %v1869_v27 = vmax.f32 %v1560_v24, 0.0 }
 0x158   : > { %v1015_v28 = vpop.f32.mrf.mxu0 }
 0x159   : > { %v1016_v29 = vadd.f32 %v6361_v20, %v1015_v28  ;;  %v1993_v30 = vpack.c.bf16 %v1869_v27, %v1868_v25 }
 0x15b   : > { %v1298_v32 = vmax.f32 %v1016_v29, 0.0  ;;  %2145 = vmatmul.bf16.gmra.mxu2 %v1993_v30 }
 0x15c   : > { %v1562_v33 = vpop.f32.mrf.mxu1 }
 0x15d   : > { %v1413_v34 = vpack.c.bf16 %v1298_v32, %v1297_v31  ;;  %v1563_v38 = vadd.f32 %v6425_v37, %v1562_v33  ;;  %v5624_v33 = vld [vmem:[%s6315_s11 + $0xc8] sm:$0xff] }
 0x15f   : > { %1601 = vmatmul.bf16.gmra.mxu1 %v1413_v34  ;;  %v1870_v41 = vmax.f32 %v1563_v38, 0.0 }
 0x160   : > { %v1018_v36 = vpop.f32.mrf.mxu0 }
 0x161   : > { %v1019_v42 = vadd.f32 %v6361_v20, %v1018_v36 }
 0x163   : > { %5362 = vmatmul.msk.bf16.gmra.mxu0 %vm751_vm0, %v5620_v35  ;;  %v1299_v47 = vmax.f32 %v1019_v42, 0.0 }
 0x164   : > { %v1564_v39 = vpop.f32.mrf.mxu1 }
 0x165   : > { %v1565_v40 = vadd.f32 %v6425_v37, %v1564_v39 }
 0x167   : > { %v1871_v43 = vmax.f32 %v1565_v40, 0.0 }
 0x168   : > { %v1020_v44 = vpop.f32.mrf.mxu0 }
 0x169   : > { %v1021_v45 = vadd.f32 %v6361_v20, %v1020_v44  ;;  %v1994_v46 = vpack.c.bf16 %v1871_v43, %v1870_v41 }
 0x16b   : > { %v1300_v48 = vmax.f32 %v1021_v45, 0.0  ;;  %2150 = vmatmul.bf16.gmra.mxu2 %v1994_v46 }
 0x16c   : > { %v1567_v49 = vpop.f32.mrf.mxu1 }
 0x16d   : > { %v1414_v50 = vpack.c.bf16 %v1300_v48, %v1299_v47  ;;  %v1568_v53 = vadd.f32 %v6425_v37, %v1567_v49  ;;  %v6484_v47 = vld [vmem:[%s7836_s6] ss:$0 sm:$0xff] }
 0x16f   : > { %1606 = vmatmul.bf16.gmra.mxu1 %v1414_v50  ;;  %v1872_v56 = vmax.f32 %v1568_v53, 0.0 }
 0x170   : > { %v1023_v52 = vpop.f32.mrf.mxu0 }
 0x171   : > { %v1024_v57 = vadd.f32 %v6361_v20, %v1023_v52  ;;  %v5625_v52 = vld [vmem:[%s6315_s11 + $0xd0] sm:$0xff] }
 0x173   : > { %5363 = vmatmul.msk.bf16.gmra.mxu0 %vm751_vm0, %v5621_v51  ;;  %v1301_v62 = vmax.f32 %v1024_v57, 0.0 }
 0x174   : > { %v1569_v54 = vpop.f32.mrf.mxu1 }
 0x175   : > { %v1570_v55 = vadd.f32 %v6425_v37, %v1569_v54 }
 0x177   : > { %v1873_v58 = vmax.f32 %v1570_v55, 0.0 }
 0x178   : > { %v1025_v59 = vpop.f32.mrf.mxu0 }
 0x179   : > { %v1026_v60 = vadd.f32 %v6361_v20, %v1025_v59  ;;  %v1995_v61 = vpack.c.bf16 %v1873_v58, %v1872_v56 }
 0x17b   : > { %v1302_v63 = vmax.f32 %v1026_v60, 0.0  ;;  %2155 = vmatmul.bf16.gmra.mxu2 %v1995_v61 }
 0x17c   : > { %v1572_v0 = vpop.f32.mrf.mxu1 }
 0x17d   : > { %v1415_v1 = vpack.c.bf16 %v1302_v63, %v1301_v62  ;;  %v1573_v4 = vadd.f32 %v6425_v37, %v1572_v0 }
 0x17f   : > { %1611 = vmatmul.bf16.gmra.mxu1 %v1415_v1  ;;  %v1874_v7 = vmax.f32 %v1573_v4, 0.0 }
 0x180   : > { %v1028_v3 = vpop.f32.mrf.mxu0 }
 0x181   : > { %v1029_v8 = vadd.f32 %v6361_v20, %v1028_v3 }
 0x183   : > { %5364 = vmatmul.msk.bf16.gmra.mxu0 %vm751_vm0, %v5622_v2  ;;  %v1303_v13 = vmax.f32 %v1029_v8, 0.0 }
 0x184   : > { %v1574_v5 = vpop.f32.mrf.mxu1 }
 0x185   : > { %v1575_v6 = vadd.f32 %v6425_v37, %v1574_v5 }
 0x187   : > { %v1875_v9 = vmax.f32 %v1575_v6, 0.0 }
 0x188   : > { %v1030_v10 = vpop.f32.mrf.mxu0 }
 0x189   : > { %v1031_v11 = vadd.f32 %v6361_v20, %v1030_v10  ;;  %v1996_v12 = vpack.c.bf16 %v1875_v9, %v1874_v7 }
 0x18b   : > { %v1304_v14 = vmax.f32 %v1031_v11, 0.0  ;;  %2160 = vmatmul.bf16.gmra.mxu2 %v1996_v12  ;;  %v5626_v11 = vld [vmem:[%s6315_s11 + $0xd8] sm:$0xff] }
 0x18c   : > { %v1577_v15 = vpop.f32.mrf.mxu1 }
 0x18d   : > { %v1416_v16 = vpack.c.bf16 %v1304_v14, %v1303_v13  ;;  %v1578_v19 = vadd.f32 %v6425_v37, %v1577_v15 }
 0x18f   : > { %1616 = vmatmul.bf16.gmra.mxu1 %v1416_v16  ;;  %v1876_v23 = vmax.f32 %v1578_v19, 0.0 }
 0x190   : > { %v1033_v18 = vpop.f32.mrf.mxu0 }
 0x191   : > { %v1034_v24 = vadd.f32 %v6361_v20, %v1033_v18 }
 0x193   : > { %5365 = vmatmul.msk.bf16.gmra.mxu0 %vm751_vm0, %v5623_v17  ;;  %v1305_v29 = vmax.f32 %v1034_v24, 0.0 }
 0x194   : > { %v1579_v21 = vpop.f32.mrf.mxu1 }
 0x195   : > { %v1580_v22 = vadd.f32 %v6425_v37, %v1579_v21 }
 0x197   : > { %v1877_v25 = vmax.f32 %v1580_v22, 0.0 }
 0x198   : > { %v1035_v26 = vpop.f32.mrf.mxu0 }
 0x199   : > { %v1036_v27 = vadd.f32 %v6361_v20, %v1035_v26  ;;  %v1997_v28 = vpack.c.bf16 %v1877_v25, %v1876_v23 }
 0x19b   : > { %v1306_v30 = vmax.f32 %v1036_v27, 0.0  ;;  %2165 = vmatmul.bf16.gmra.mxu2 %v1997_v28 }
 0x19c   : > { %v1582_v31 = vpop.f32.mrf.mxu1 }
 0x19d   : > { %v1417_v32 = vpack.c.bf16 %v1306_v30, %v1305_v29  ;;  %v1583_v35 = vadd.f32 %v6425_v37, %v1582_v31 }
 0x19f   : > { %1621 = vmatmul.bf16.gmra.mxu1 %v1417_v32  ;;  %v1878_v39 = vmax.f32 %v1583_v35, 0.0 }
 0x1a0   : > { %v1038_v34 = vpop.f32.mrf.mxu0 }
 0x1a1   : > { %v1039_v40 = vadd.f32 %v6361_v20, %v1038_v34 }
 0x1a3   : > { %5366 = vmatmul.msk.bf16.gmra.mxu0 %vm751_vm0, %v5624_v33  ;;  %v1307_v45 = vmax.f32 %v1039_v40, 0.0 }
 0x1a4   : > { %v1584_v36 = vpop.f32.mrf.mxu1 }
 0x1a5   : > { %v1585_v38 = vadd.f32 %v6425_v37, %v1584_v36 }
 0x1a7   : > { %v1879_v41 = vmax.f32 %v1585_v38, 0.0 }
 0x1a8   : > { %v1040_v42 = vpop.f32.mrf.mxu0 }
 0x1a9   : > { %v1041_v43 = vadd.f32 %v6361_v20, %v1040_v42  ;;  %v1998_v44 = vpack.c.bf16 %v1879_v41, %v1878_v39 }
 0x1ab   : > { %v1308_v46 = vmax.f32 %v1041_v43, 0.0  ;;  %2170 = vmatmul.bf16.gmra.mxu2 %v1998_v44 }
 0x1ac   : > { %v1587_v48 = vpop.f32.mrf.mxu1 }
 0x1ad   : > { %v1418_v49 = vpack.c.bf16 %v1308_v46, %v1307_v45  ;;  %v1588_v55 = vadd.f32 %v6425_v37, %v1587_v48 }
 0x1ae   : > { %v2131_v50 = vpop.f32.mrf.mxu2 }
 0x1af   : > { %v2132_v51 = vadd.f32 %v6484_v47, %v2131_v50  ;;  %1626 = vmatmul.bf16.gmra.mxu1 %v1418_v49  ;;  %v1880_v59 = vmax.f32 %v1588_v55, 0.0 }
 0x1b0   : > { %v1043_v53 = vpop.f32.mrf.mxu0 }
 0x1b1   : > { %v5469_v54 = vmul.f32 -1.442695, %v2132_v51  ;;  %v1044_v60 = vadd.f32 %v6361_v20, %v1043_v53 }
 0x1b3   : > { %5710 = vpow2.f32 %v5469_v54  ;;  %5367 = vmatmul.msk.bf16.gmra.mxu0 %vm751_vm0, %v5625_v52  ;;  %v1309_v5 = vmax.f32 %v1044_v60, 0.0  ;;  %v5627_v54 = vld [vmem:[%s6315_s11 + $0xe0] sm:$0xff] }
 0x1b4   : > { %v1589_v56 = vpop.f32.mrf.mxu1 }
 0x1b5   : > { %v1590_v57 = vadd.f32 %v6425_v37, %v1589_v56 }
 0x1b6   : > { %v2133_v58 = vpop.f32.mrf.mxu2 }
 0x1b7   : > { %v1881_v61 = vmax.f32 %v1590_v57, 0.0  ;;  %v2134_v62 = vadd.f32 %v6484_v47, %v2133_v58 }
 0x1b8   : > { %v1045_v63 = vpop.f32.mrf.mxu0 }
 0x1b9   : > { %v5711_v0 = vpop.eup %5710  ;;  %v5470_v1 = vmul.f32 -1.442695, %v2134_v62  ;;  %v1046_v2 = vadd.f32 %v6361_v20, %v1045_v63  ;;  %v1999_v3 = vpack.c.bf16 %v1881_v61, %v1880_v59 }
 0x1ba   : > { %v2835_v4 = vadd.f32 1.0, %v5711_v0 }
 0x1bb   : > { %5712 = vpow2.f32 %v5470_v1  ;;  %v1310_v6 = vmax.f32 %v1046_v2, 0.0  ;;  %2175 = vmatmul.bf16.gmra.mxu2 %v1999_v3 }
 0x1bc   : > { %5714 = vrcp.f32 %v2835_v4  ;;  %v1592_v7 = vpop.f32.mrf.mxu1  ;;  %v2972_v23 = vand.u32 2147483647, %v2835_v4  ;;  %v2974_v24 = vand.u32 2147483648, %v2835_v4  ;;  %vm2968_vm2 = vweird.f32 %v2835_v4 }
 0x1bd   : > { %v1419_v8 = vpack.c.bf16 %v1310_v6, %v1309_v5  ;;  %v1593_v17 = vadd.f32 %v6425_v37, %v1592_v7 }
 0x1be   : > { %v2136_v9 = vpop.f32.mrf.mxu2  ;;  %v2975_v38 = vor.u32 1.1754944e-38, %v2974_v24  ;;  %vm2973_vm5 = vcmp.eq.f32.partialorder %v2972_v23, 8.507059e+37 }
 0x1bf   : > { %v2137_v10 = vadd.f32 %v6484_v47, %v2136_v9  ;;  %1631 = vmatmul.bf16.gmra.mxu1 %v1419_v8  ;;  %v1882_v25 = vmax.f32 %v1593_v17, 0.0 }
 0x1c0   : > { %v1048_v12 = vpop.f32.mrf.mxu0 }
 0x1c1   : > { %v5713_v13 = vpop.eup %5712  ;;  %v5471_v14 = vmul.f32 -1.442695, %v2137_v10  ;;  %v1049_v40 = vadd.f32 %v6361_v20, %v1048_v12 }
 0x1c2   : > { %v5715_v15 = vpop.eup %5714  ;;  %v6496_v16 = vadd.f32 1.0, %v5713_v13 }
 0x1c3   : > { %v2964_v18 = vmul.f32 %v5715_v15, %v2835_v4  ;;  %5716 = vpow2.f32 %v5471_v14  ;;  %5368 = vmatmul.msk.bf16.gmra.mxu0 %vm751_vm0, %v5626_v11  ;;  %vm2969_vm1 = vweird.f32 %v5715_v15  ;;  %v1311_v49 = vmax.f32 %v1049_v40, 0.0 }
 0x1c4   : > { %5718 = vrcp.f32 %v6496_v16  ;;  %v1594_v19 = vpop.f32.mrf.mxu1  ;;  %vm2970_vm3 = vmor %vm2968_vm2, %vm2969_vm1  ;;  %v2989_v48 = vand.u32 2147483648, %v6496_v16  ;;  %v2987_v52 = vand.u32 2147483647, %v6496_v16  ;;  %vm2983_vm7 = vweird.f32 %v6496_v16 }
 0x1c5   : > { %v2965_v21 = vsub.f32 1.0, %v2964_v18  ;;  %v1595_v22 = vadd.f32 %v6425_v37, %v1594_v19 }
 0x1c6   : > { %v2138_v26 = vpop.f32.mrf.mxu2  ;;  %v2990_v61 = vor.u32 1.1754944e-38, %v2989_v48  ;;  %vm2988_vm9 = vcmp.eq.f32.partialorder %v2987_v52, 8.507059e+37 }
 0x1c7   : > { %v2966_v27 = vmul.f32 %v5715_v15, %v2965_v21  ;;  %v1883_v28 = vmax.f32 %v1595_v22, 0.0  ;;  %v2139_v29 = vadd.f32 %v6484_v47, %v2138_v26 }
 0x1c8   : > { %v1050_v30 = vpop.f32.mrf.mxu0 }
 0x1c9   : > { %v5717_v31 = vpop.eup %5716  ;;  %v2967_v32 = vadd.f32 %v5715_v15, %v2966_v27  ;;  %v5472_v33 = vmul.f32 -1.442695, %v2139_v29  ;;  %v1051_v34 = vadd.f32 %v6361_v20, %v1050_v30  ;;  %v2000_v35 = vpack.c.bf16 %v1883_v28, %v1882_v25 }
 0x1ca   : > { %v5719_v36 = vpop.eup %5718  ;;  %v6510_v39 = vadd.f32 1.0, %v5717_v31 }
 0x1cb   : > { %v2971_v41 = vsel %vm2970_vm3, %v5715_v15, %v2967_v32  ;;  %v2979_v42 = vmul.f32 %v5719_v36, %v6496_v16  ;;  %5720 = vpow2.f32 %v5472_v33  ;;  %2180 = vmatmul.bf16.gmra.mxu2 %v2000_v35  ;;  %v1312_v46 = vmax.f32 %v1051_v34, 0.0 }
 0x1cc   : > { %v2976_v43 = vsel %vm2973_vm5, %v2975_v38, %v2971_v41  ;;  %5722 = vrcp.f32 %v6510_v39  ;;  %v1597_v44 = vpop.f32.mrf.mxu1  ;;  %vm2984_vm6 = vweird.f32 %v5719_v36  ;;  %v3002_v6 = vand.u32 2147483647, %v6510_v39 }
 0x1cd   : > { %4884 = vst.msk [vmem:[%s6508_s13] sm:$0xff] %vm4883_vm4, %v2976_v43  ;;  %v2980_v45 = vsub.f32 1.0, %v2979_v42  ;;  %v1420_v55 = vpack.c.bf16 %v1312_v46, %v1311_v49  ;;  %vm2985_vm8 = vmor %vm2983_vm7, %vm2984_vm6  ;;  %v1598_v63 = vadd.f32 %v6425_v37, %v1597_v44  ;;  %v3004_v7 = vand.u32 2147483648, %v6510_v39 }
 0x1ce   : > { %v2141_v50 = vpop.f32.mrf.mxu2  ;;  %vm2998_vm11 = vweird.f32 %v6510_v39  ;;  %vm3003_vm13 = vcmp.eq.f32.partialorder %v3002_v6, 8.507059e+37 }
 0x1cf   : > { %v2981_v51 = vmul.f32 %v5719_v36, %v2980_v45  ;;  %v2142_v53 = vadd.f32 %v6484_v47, %v2141_v50  ;;  %1636 = vmatmul.bf16.gmra.mxu1 %v1420_v55  ;;  %v1884_v8 = vmax.f32 %v1598_v63, 0.0  ;;  %v3005_v21 = vor.u32 1.1754944e-38, %v3004_v7 }
 0x1d0   : > { %v1053_v56 = vpop.f32.mrf.mxu0 }
 0x1d1   : > { %v5721_v57 = vpop.eup %5720  ;;  %v2982_v58 = vadd.f32 %v5719_v36, %v2981_v51  ;;  %v5473_v59 = vmul.f32 -1.442695, %v2142_v53  ;;  %v1054_v23 = vadd.f32 %v6361_v20, %v1053_v56 }
 0x1d2   : > { %v5723_v60 = vpop.eup %5722  ;;  %v6522_v62 = vadd.f32 1.0, %v5721_v57 }
 0x1d3   : > { %v2986_v0 = vsel %vm2985_vm8, %v5719_v36, %v2982_v58  ;;  %v2994_v1 = vmul.f32 %v5723_v60, %v6510_v39  ;;  %5724 = vpow2.f32 %v5473_v59  ;;  %5369 = vmatmul.msk.bf16.gmra.mxu0 %vm751_vm0, %v5627_v54  ;;  %vm2999_vm10 = vweird.f32 %v5723_v60  ;;  %v5628_v36 = vld [vmem:[%s6315_s11 + $0xe8] sm:$0xff] }
 0x1d4   : > { %v2991_v2 = vsel %vm2988_vm9, %v2990_v61, %v2986_v0  ;;  %5726 = vrcp.f32 %v6522_v62  ;;  %v1599_v3 = vpop.f32.mrf.mxu1  ;;  %vm3000_vm12 = vmor %vm2998_vm11, %vm2999_vm10  ;;  %v3019_v30 = vand.u32 2147483648, %v6522_v62  ;;  %v1313_v31 = vmax.f32 %v1054_v23, 0.0 }
 0x1d5   : > { %4885 = vst.msk [vmem:[%s6508_s13 + $0x8] sm:$0xff] %vm4883_vm4, %v2991_v2  ;;  %v2995_v4 = vsub.f32 1.0, %v2994_v1  ;;  %v1600_v5 = vadd.f32 %v6425_v37, %v1599_v3  ;;  %v3017_v34 = vand.u32 2147483647, %v6522_v62  ;;  %vm3013_vm15 = vweird.f32 %v6522_v62 }
 0x1d6   : > { %v2143_v9 = vpop.f32.mrf.mxu2  ;;  %v3020_v44 = vor.u32 1.1754944e-38, %v3019_v30 }
 0x1d7   : > { %v2996_v10 = vmul.f32 %v5723_v60, %v2995_v4  ;;  %v1885_v11 = vmax.f32 %v1600_v5, 0.0  ;;  %v2144_v12 = vadd.f32 %v6484_v47, %v2143_v9  ;;  %vm3018_vm2 = vcmp.eq.f32.partialorder %v3017_v34, 8.507059e+37 }
 0x1d8   : > { %v1055_v13 = vpop.f32.mrf.mxu0 }
 0x1d9   : > { %v5725_v14 = vpop.eup %5724  ;;  %v2997_v15 = vadd.f32 %v5723_v60, %v2996_v10  ;;  %v5474_v16 = vmul.f32 -1.442695, %v2144_v12  ;;  %v1056_v17 = vadd.f32 %v6361_v20, %v1055_v13  ;;  %v2001_v18 = vpack.c.bf16 %v1885_v11, %v1884_v8 }
 0x1da   : > { %v5727_v19 = vpop.eup %5726  ;;  %v6536_v22 = vadd.f32 1.0, %v5725_v14 }
 0x1db   : > { %v3001_v24 = vsel %vm3000_vm12, %v5723_v60, %v2997_v15  ;;  %v3009_v25 = vmul.f32 %v5727_v19, %v6522_v62  ;;  %5728 = vpow2.f32 %v5474_v16  ;;  %2185 = vmatmul.bf16.gmra.mxu2 %v2001_v18  ;;  %v1314_v29 = vmax.f32 %v1056_v17, 0.0  ;;  %v5629_v18 = vld [vmem:[%s6315_s11 + $0xf0] sm:$0xff] }
 0x1dc   : > { %v3006_v26 = vsel %vm3003_vm13, %v3005_v21, %v3001_v24  ;;  %5730 = vrcp.f32 %v6536_v22  ;;  %v1602_v27 = vpop.f32.mrf.mxu1  ;;  %vm3014_vm14 = vweird.f32 %v5727_v19  ;;  %v3032_v54 = vand.u32 2147483647, %v6536_v22 }
 0x1dd   : > { %4886 = vst.msk [vmem:[%s6508_s13 + $0x10] sm:$0xff] %vm4883_vm4, %v3006_v26  ;;  %v3010_v28 = vsub.f32 1.0, %v3009_v25  ;;  %v1421_v38 = vpack.c.bf16 %v1314_v29, %v1313_v31  ;;  %vm3015_vm1 = vmor %vm3013_vm15, %vm3014_vm14  ;;  %v1603_v46 = vadd.f32 %v6425_v37, %v1602_v27  ;;  %v3034_v55 = vand.u32 2147483648, %v6536_v22 }
 0x1de   : > { %v2146_v32 = vpop.f32.mrf.mxu2  ;;  %vm3028_vm5 = vweird.f32 %v6536_v22  ;;  %vm3033_vm7 = vcmp.eq.f32.partialorder %v3032_v54, 8.507059e+37 }
 0x1df   : > { %v3011_v33 = vmul.f32 %v5727_v19, %v3010_v28  ;;  %v2147_v35 = vadd.f32 %v6484_v47, %v2146_v32  ;;  %1641 = vmatmul.bf16.gmra.mxu1 %v1421_v38  ;;  %v1886_v56 = vmax.f32 %v1603_v46, 0.0  ;;  %v3035_v4 = vor.u32 1.1754944e-38, %v3034_v55 }
 0x1e0   : > { %v1058_v39 = vpop.f32.mrf.mxu0 }
 0x1e1   : > { %v5729_v40 = vpop.eup %5728  ;;  %v3012_v41 = vadd.f32 %v5727_v19, %v3011_v33  ;;  %v5475_v42 = vmul.f32 -1.442695, %v2147_v35  ;;  %v1059_v6 = vadd.f32 %v6361_v20, %v1058_v39 }
 0x1e2   : > { %v5731_v43 = vpop.eup %5730  ;;  %v6548_v45 = vadd.f32 1.0, %v5729_v40 }
 0x1e3   : > { %v3016_v48 = vsel %vm3015_vm1, %v5727_v19, %v3012_v41  ;;  %v3024_v49 = vmul.f32 %v5731_v43, %v6536_v22  ;;  %5732 = vpow2.f32 %v5475_v42  ;;  %5370 = vmatmul.msk.bf16.gmra.mxu0 %vm751_vm0, %v5628_v36  ;;  %vm3029_vm3 = vweird.f32 %v5731_v43 }
 0x1e4   : > { %v3021_v50 = vsel %vm3018_vm2, %v3020_v44, %v3016_v48  ;;  %5734 = vrcp.f32 %v6548_v45  ;;  %v1604_v51 = vpop.f32.mrf.mxu1  ;;  %vm3030_vm6 = vmor %vm3028_vm5, %vm3029_vm3  ;;  %v3049_v13 = vand.u32 2147483648, %v6548_v45  ;;  %v1315_v14 = vmax.f32 %v1059_v6, 0.0  ;;  %v6590_v48 = vld [vmem:[%s7832_s2] ss:$0 sm:$0xff] }
 0x1e5   : > { %4887 = vst.msk [vmem:[%s6508_s13 + $0x18] sm:$0xff] %vm4883_vm4, %v3021_v50  ;;  %v3025_v52 = vsub.f32 1.0, %v3024_v49  ;;  %v1605_v53 = vadd.f32 %v6425_v37, %v1604_v51  ;;  %v3047_v16 = vand.u32 2147483647, %v6548_v45  ;;  %vm3043_vm9 = vweird.f32 %v6548_v45 }
 0x1e6   : > { %v2148_v57 = vpop.f32.mrf.mxu2  ;;  %v3050_v26 = vor.u32 1.1754944e-38, %v3049_v13 }
 0x1e7   : > { %v3026_v58 = vmul.f32 %v5731_v43, %v3025_v52  ;;  %v1887_v59 = vmax.f32 %v1605_v53, 0.0  ;;  %v2149_v60 = vadd.f32 %v6484_v47, %v2148_v57  ;;  %vm3048_vm11 = vcmp.eq.f32.partialorder %v3047_v16, 8.507059e+37 }
 0x1e8   : > { %v1060_v61 = vpop.f32.mrf.mxu0 }
 0x1e9   : > { %v5733_v62 = vpop.eup %5732  ;;  %v3027_v63 = vadd.f32 %v5731_v43, %v3026_v58  ;;  %v5476_v0 = vmul.f32 -1.442695, %v2149_v60  ;;  %v1061_v1 = vadd.f32 %v6361_v20, %v1060_v61  ;;  %v2002_v2 = vpack.c.bf16 %v1887_v59, %v1886_v56 }
 0x1ea   : > { %v5735_v3 = vpop.eup %5734  ;;  %v6562_v5 = vadd.f32 1.0, %v5733_v62 }
 0x1eb   : > { %v3031_v7 = vsel %vm3030_vm6, %v5731_v43, %v3027_v63  ;;  %v3039_v8 = vmul.f32 %v5735_v3, %v6548_v45  ;;  %5736 = vpow2.f32 %v5476_v0  ;;  %2190 = vmatmul.bf16.gmra.mxu2 %v2002_v2  ;;  %v1316_v12 = vmax.f32 %v1061_v1, 0.0 }
 0x1ec   : > { %v3036_v9 = vsel %vm3033_vm7, %v3035_v4, %v3031_v7  ;;  %5738 = vrcp.f32 %v6562_v5  ;;  %v1607_v10 = vpop.f32.mrf.mxu1  ;;  %vm3044_vm8 = vweird.f32 %v5735_v3  ;;  %v3062_v35 = vand.u32 2147483647, %v6562_v5 }
 0x1ed   : > { %4888 = vst.msk [vmem:[%s6508_s13 + $0x20] sm:$0xff] %vm4883_vm4, %v3036_v9  ;;  %v3040_v11 = vsub.f32 1.0, %v3039_v8  ;;  %v1422_v19 = vpack.c.bf16 %v1316_v12, %v1315_v14  ;;  %vm3045_vm10 = vmor %vm3043_vm9, %vm3044_vm8  ;;  %v1608_v28 = vadd.f32 %v6425_v37, %v1607_v10  ;;  %v3064_v36 = vand.u32 2147483648, %v6562_v5 }
 0x1ee   : > { %v2151_v15 = vpop.f32.mrf.mxu2  ;;  %vm3058_vm13 = vweird.f32 %v6562_v5  ;;  %vm3063_vm15 = vcmp.eq.f32.partialorder %v3062_v35, 8.507059e+37 }
 0x1ef   : > { %v3041_v20 = vmul.f32 %v5735_v3, %v3040_v11  ;;  %v2152_v17 = vadd.f32 %v6484_v47, %v2151_v15  ;;  %1646 = vmatmul.bf16.gmra.mxu1 %v1422_v19  ;;  %v1888_v38 = vmax.f32 %v1608_v28, 0.0  ;;  %v3065_v52 = vor.u32 1.1754944e-38, %v3064_v36 }
 0x1f0   : > { %v1063_v21 = vpop.f32.mrf.mxu0 }
 0x1f1   : > { %v5737_v22 = vpop.eup %5736  ;;  %v3042_v23 = vadd.f32 %v5735_v3, %v3041_v20  ;;  %v5477_v24 = vmul.f32 -1.442695, %v2152_v17  ;;  %v1064_v54 = vadd.f32 %v6590_v48, %v1063_v21 }
 0x1f2   : > { %v5739_v25 = vpop.eup %5738  ;;  %v6574_v27 = vadd.f32 1.0, %v5737_v22 }
 0x1f3   : > { %v3046_v29 = vsel %vm3045_vm10, %v5735_v3, %v3042_v23  ;;  %v3054_v30 = vmul.f32 %v5739_v25, %v6562_v5  ;;  %5740 = vpow2.f32 %v5477_v24  ;;  %5371 = vmatmul.msk.bf16.gmra.mxu0 %vm751_vm0, %v5629_v18  ;;  %vm3059_vm12 = vweird.f32 %v5739_v25  ;;  %v5630_v3 = vld [vmem:[%s6315_s11 + $0xf8] sm:$0xff] }
 0x1f4   : > { %v3051_v31 = vsel %vm3048_vm11, %v3050_v26, %v3046_v29  ;;  %5742 = vrcp.f32 %v6574_v27  ;;  %v1609_v32 = vpop.f32.mrf.mxu1  ;;  %vm3060_vm14 = vmor %vm3058_vm13, %vm3059_vm12  ;;  %v3079_v61 = vand.u32 2147483648, %v6574_v27  ;;  %v1317_v62 = vmax.f32 %v1064_v54, 0.0 }
 0x1f5   : > { %4889 = vst.msk [vmem:[%s6508_s13 + $0x28] sm:$0xff] %vm4883_vm4, %v3051_v31  ;;  %v3055_v33 = vsub.f32 1.0, %v3054_v30  ;;  %v1610_v34 = vadd.f32 %v6425_v37, %v1609_v32  ;;  %v3077_v1 = vand.u32 2147483647, %v6574_v27  ;;  %vm3073_vm2 = vweird.f32 %v6574_v27 }
 0x1f6   : > { %v2153_v39 = vpop.f32.mrf.mxu2  ;;  %v3080_v10 = vor.u32 1.1754944e-38, %v3079_v61 }
 0x1f7   : > { %v3056_v40 = vmul.f32 %v5739_v25, %v3055_v33  ;;  %v1889_v41 = vmax.f32 %v1610_v34, 0.0  ;;  %v2154_v42 = vadd.f32 %v6484_v47, %v2153_v39  ;;  %vm3078_vm5 = vcmp.eq.f32.partialorder %v3077_v1, 8.507059e+37 }
 0x1f8   : > { %v1065_v43 = vpop.f32.mrf.mxu0 }
 0x1f9   : > { %v5741_v44 = vpop.eup %5740  ;;  %v3057_v45 = vadd.f32 %v5739_v25, %v3056_v40  ;;  %v5478_v46 = vmul.f32 -1.442695, %v2154_v42  ;;  %v1066_v49 = vadd.f32 %v6590_v48, %v1065_v43  ;;  %v2003_v50 = vpack.c.bf16 %v1889_v41, %v1888_v38 }
 0x1fa   : > { %v5743_v51 = vpop.eup %5742  ;;  %v6593_v53 = vadd.f32 1.0, %v5741_v44 }
 0x1fb   : > { %v3061_v55 = vsel %vm3060_vm14, %v5739_v25, %v3057_v45  ;;  %v3069_v56 = vmul.f32 %v5743_v51, %v6574_v27  ;;  %5744 = vpow2.f32 %v5478_v46  ;;  %2195 = vmatmul.bf16.gmra.mxu2 %v2003_v50  ;;  %v1318_v60 = vmax.f32 %v1066_v49, 0.0 }
 0x1fc   : > { %v3066_v57 = vsel %vm3063_vm15, %v3065_v52, %v3061_v55  ;;  %5746 = vrcp.f32 %v6593_v53  ;;  %v1612_v58 = vpop.f32.mrf.mxu1  ;;  %vm3074_vm1 = vweird.f32 %v5743_v51  ;;  %v3092_v18 = vand.u32 2147483647, %v6593_v53 }
 0x1fd   : > { %4890 = vst.msk [vmem:[%s6508_s13 + $0x30] sm:$0xff] %vm4883_vm4, %v3066_v57  ;;  %v3070_v59 = vsub.f32 1.0, %v3069_v56  ;;  %v1423_v4 = vpack.c.bf16 %v1318_v60, %v1317_v62  ;;  %vm3075_vm3 = vmor %vm3073_vm2, %vm3074_vm1  ;;  %v1613_v12 = vadd.f32 %v6425_v37, %v1612_v58  ;;  %v3094_v19 = vand.u32 2147483648, %v6593_v53 }
 0x1fe   : > { %v2156_v63 = vpop.f32.mrf.mxu2  ;;  %vm3088_vm7 = vweird.f32 %v6593_v53  ;;  %vm3093_vm9 = vcmp.eq.f32.partialorder %v3092_v18, 8.507059e+37 }
 0x1ff   : > { %v3071_v0 = vmul.f32 %v5743_v51, %v3070_v59  ;;  %v2157_v2 = vadd.f32 %v6484_v47, %v2156_v63  ;;  %1651 = vmatmul.bf16.gmra.mxu1 %v1423_v4  ;;  %v1890_v21 = vmax.f32 %v1613_v12, 0.0  ;;  %v3095_v33 = vor.u32 1.1754944e-38, %v3094_v19 }
 0x200   : > { %v1068_v5 = vpop.f32.mrf.mxu0 }
 0x201   : > { %v5745_v6 = vpop.eup %5744  ;;  %v3072_v7 = vadd.f32 %v5743_v51, %v3071_v0  ;;  %v5479_v8 = vmul.f32 -1.442695, %v2157_v2  ;;  %v1069_v35 = vadd.f32 %v6590_v48, %v1068_v5  ;;  %v6642_v2 = vld [vmem:[%s7834_s4] ss:$0 sm:$0xff] }
 0x202   : > { %v5747_v9 = vpop.eup %5746  ;;  %v6605_v11 = vadd.f32 1.0, %v5745_v6 }
 0x203   : > { %v3076_v13 = vsel %vm3075_vm3, %v5743_v51, %v3072_v7  ;;  %v3084_v14 = vmul.f32 %v5747_v9, %v6593_v53  ;;  %5748 = vpow2.f32 %v5479_v8  ;;  %5372 = vmatmul.msk.bf16.gmra.mxu0 %vm751_vm0, %v5630_v3  ;;  %vm3089_vm6 = vweird.f32 %v5747_v9  ;;  %v5631_v51 = vld [vmem:[%s6315_s11 + $0x100] sm:$0xff] }
 0x204   : > { %v3081_v15 = vsel %vm3078_vm5, %v3080_v10, %v3076_v13  ;;  %5750 = vrcp.f32 %v6605_v11  ;;  %v1614_v20 = vpop.f32.mrf.mxu1  ;;  %vm3090_vm8 = vmor %vm3088_vm7, %vm3089_vm6  ;;  %v3109_v43 = vand.u32 2147483648, %v6605_v11  ;;  %v1319_v44 = vmax.f32 %v1069_v35, 0.0 }
 0x205   : > { %4891 = vst.msk [vmem:[%s6508_s13 + $0x38] sm:$0xff] %vm4883_vm4, %v3081_v15  ;;  %v3085_v16 = vsub.f32 1.0, %v3084_v14  ;;  %v1615_v17 = vadd.f32 %v6425_v37, %v1614_v20  ;;  %v3107_v49 = vand.u32 2147483647, %v6605_v11  ;;  %vm3103_vm11 = vweird.f32 %v6605_v11 }
 0x206   : > { %v2158_v22 = vpop.f32.mrf.mxu2  ;;  %v3110_v58 = vor.u32 1.1754944e-38, %v3109_v43 }
 0x207   : > { %v3086_v23 = vmul.f32 %v5747_v9, %v3085_v16  ;;  %v1891_v24 = vmax.f32 %v1615_v17, 0.0  ;;  %v2159_v25 = vadd.f32 %v6484_v47, %v2158_v22  ;;  %vm3108_vm13 = vcmp.eq.f32.partialorder %v3107_v49, 8.507059e+37 }
 0x208   : > { %v1070_v26 = vpop.f32.mrf.mxu0 }
 0x209   : > { %v5749_v27 = vpop.eup %5748  ;;  %v3087_v28 = vadd.f32 %v5747_v9, %v3086_v23  ;;  %v5480_v29 = vmul.f32 -1.442695, %v2159_v25  ;;  %v1071_v30 = vadd.f32 %v6590_v48, %v1070_v26  ;;  %v2004_v31 = vpack.c.bf16 %v1891_v24, %v1890_v21 }
 0x20a   : > { %v5751_v32 = vpop.eup %5750  ;;  %v6619_v34 = vadd.f32 1.0, %v5749_v27 }
 0x20b   : > { %v3091_v36 = vsel %vm3090_vm8, %v5747_v9, %v3087_v28  ;;  %v3099_v38 = vmul.f32 %v5751_v32, %v6605_v11  ;;  %5752 = vpow2.f32 %v5480_v29  ;;  %2200 = vmatmul.bf16.gmra.mxu2 %v2004_v31  ;;  %v1320_v42 = vmax.f32 %v1071_v30, 0.0 }
 0x20c   : > { %v3096_v39 = vsel %vm3093_vm9, %v3095_v33, %v3091_v36  ;;  %5754 = vrcp.f32 %v6619_v34  ;;  %v1617_v40 = vpop.f32.mrf.mxu1  ;;  %vm3104_vm10 = vweird.f32 %v5751_v32  ;;  %v3122_v3 = vand.u32 2147483647, %v6619_v34 }
 0x20d   : > { %4892 = vst.msk [vmem:[%s6508_s13 + $0x40] sm:$0xff] %vm4883_vm4, %v3096_v39  ;;  %v3100_v41 = vsub.f32 1.0, %v3099_v38  ;;  %v1424_v52 = vpack.c.bf16 %v1320_v42, %v1319_v44  ;;  %vm3105_vm12 = vmor %vm3103_vm11, %vm3104_vm10  ;;  %v1618_v60 = vadd.f32 %v6425_v37, %v1617_v40  ;;  %v3124_v4 = vand.u32 2147483648, %v6619_v34 }
 0x20e   : > { %v2161_v45 = vpop.f32.mrf.mxu2  ;;  %vm3118_vm15 = vweird.f32 %v6619_v34  ;;  %vm3123_vm2 = vcmp.eq.f32.partialorder %v3122_v3, 8.507059e+37 }
 0x20f   : > { %v3101_v46 = vmul.f32 %v5751_v32, %v3100_v41  ;;  %v2162_v50 = vadd.f32 %v6484_v47, %v2161_v45  ;;  %1656 = vmatmul.bf16.gmra.mxu1 %v1424_v52  ;;  %v1892_v5 = vmax.f32 %v1618_v60, 0.0  ;;  %v3125_v16 = vor.u32 1.1754944e-38, %v3124_v4 }
 0x210   : > { %v1073_v53 = vpop.f32.mrf.mxu0 }
 0x211   : > { %v5753_v54 = vpop.eup %5752  ;;  %v3102_v55 = vadd.f32 %v5751_v32, %v3101_v46  ;;  %v5481_v56 = vmul.f32 -1.442695, %v2162_v50  ;;  %v1074_v18 = vadd.f32 %v6590_v48, %v1073_v53 }
 0x212   : > { %v5755_v57 = vpop.eup %5754  ;;  %v6631_v59 = vadd.f32 1.0, %v5753_v54 }
 0x213   : > { %v3106_v61 = vsel %vm3105_vm12, %v5751_v32, %v3102_v55  ;;  %v3114_v62 = vmul.f32 %v5755_v57, %v6619_v34  ;;  %5756 = vpow2.f32 %v5481_v56  ;;  %5373 = vmatmul.msk.bf16.gmra.mxu0 %vm751_vm0, %v5631_v51  ;;  %vm3119_vm14 = vweird.f32 %v5755_v57  ;;  %v5632_v32 = vld [vmem:[%s6315_s11 + $0x108] sm:$0xff] }
 0x214   : > { %v3111_v63 = vsel %vm3108_vm13, %v3110_v58, %v3106_v61  ;;  %5758 = vrcp.f32 %v6631_v59  ;;  %v1619_v0 = vpop.f32.mrf.mxu1  ;;  %vm3120_vm1 = vmor %vm3118_vm15, %vm3119_vm14  ;;  %v3139_v26 = vand.u32 2147483648, %v6631_v59  ;;  %v1321_v27 = vmax.f32 %v1074_v18, 0.0 }
 0x215   : > { %4893 = vst.msk [vmem:[%s6508_s13 + $0x48] sm:$0xff] %vm4883_vm4, %v3111_v63  ;;  %v3115_v1 = vsub.f32 1.0, %v3114_v62  ;;  %v1620_v37 = vadd.f32 %v6642_v2, %v1619_v0  ;;  %v3137_v30 = vand.u32 2147483647, %v6631_v59  ;;  %vm3133_vm5 = vweird.f32 %v6631_v59 }
 0x216   : > { %v2163_v6 = vpop.f32.mrf.mxu2  ;;  %v3140_v40 = vor.u32 1.1754944e-38, %v3139_v26 }
 0x217   : > { %v3116_v7 = vmul.f32 %v5755_v57, %v3115_v1  ;;  %v1893_v8 = vmax.f32 %v1620_v37, 0.0  ;;  %v2164_v9 = vadd.f32 %v6484_v47, %v2163_v6  ;;  %vm3138_vm7 = vcmp.eq.f32.partialorder %v3137_v30, 8.507059e+37 }
 0x218   : > { %v1075_v10 = vpop.f32.mrf.mxu0 }
 0x219   : > { %v5757_v11 = vpop.eup %5756  ;;  %v3117_v12 = vadd.f32 %v5755_v57, %v3116_v7  ;;  %v5482_v13 = vmul.f32 -1.442695, %v2164_v9  ;;  %v1076_v14 = vadd.f32 %v6590_v48, %v1075_v10  ;;  %v2005_v15 = vpack.c.bf16 %v1893_v8, %v1892_v5 }
 0x21a   : > { %v5759_v20 = vpop.eup %5758  ;;  %v6650_v17 = vadd.f32 1.0, %v5757_v11 }
 0x21b   : > { %v3121_v19 = vsel %vm3120_vm1, %v5755_v57, %v3117_v12  ;;  %v3129_v21 = vmul.f32 %v5759_v20, %v6631_v59  ;;  %5760 = vpow2.f32 %v5482_v13  ;;  %2205 = vmatmul.bf16.gmra.mxu2 %v2005_v15  ;;  %v1322_v25 = vmax.f32 %v1076_v14, 0.0 }
 0x21c   : > { %v3126_v22 = vsel %vm3123_vm2, %v3125_v16, %v3121_v19  ;;  %5762 = vrcp.f32 %v6650_v17  ;;  %v1622_v23 = vpop.f32.mrf.mxu1  ;;  %vm3134_vm3 = vweird.f32 %v5759_v20  ;;  %v3152_v51 = vand.u32 2147483647, %v6650_v17 }
 0x21d   : > { %4894 = vst.msk [vmem:[%s6508_s13 + $0x50] sm:$0xff] %vm4883_vm4, %v3126_v22  ;;  %v3130_v24 = vsub.f32 1.0, %v3129_v21  ;;  %v1425_v33 = vpack.c.bf16 %v1322_v25, %v1321_v27  ;;  %vm3135_vm6 = vmor %vm3133_vm5, %vm3134_vm3  ;;  %v1623_v42 = vadd.f32 %v6642_v2, %v1622_v23  ;;  %v3154_v52 = vand.u32 2147483648, %v6650_v17 }
 0x21e   : > { %v2166_v28 = vpop.f32.mrf.mxu2  ;;  %vm3148_vm9 = vweird.f32 %v6650_v17  ;;  %vm3153_vm11 = vcmp.eq.f32.partialorder %v3152_v51, 8.507059e+37 }
 0x21f   : > { %v3131_v29 = vmul.f32 %v5759_v20, %v3130_v24  ;;  %v2167_v31 = vadd.f32 %v6484_v47, %v2166_v28  ;;  %1661 = vmatmul.bf16.gmra.mxu1 %v1425_v33  ;;  %v1894_v53 = vmax.f32 %v1623_v42, 0.0  ;;  %v3155_v1 = vor.u32 1.1754944e-38, %v3154_v52 }
 0x220   : > { %v1078_v34 = vpop.f32.mrf.mxu0 }
 0x221   : > { %v5761_v35 = vpop.eup %5760  ;;  %v3132_v36 = vadd.f32 %v5759_v20, %v3131_v29  ;;  %v5483_v38 = vmul.f32 -1.442695, %v2167_v31  ;;  %v1079_v3 = vadd.f32 %v6590_v48, %v1078_v34 }
 0x222   : > { %v5763_v39 = vpop.eup %5762  ;;  %v6662_v41 = vadd.f32 1.0, %v5761_v35 }
 0x223   : > { %v3136_v43 = vsel %vm3135_vm6, %v5759_v20, %v3132_v36  ;;  %v3144_v44 = vmul.f32 %v5763_v39, %v6650_v17  ;;  %5764 = vpow2.f32 %v5483_v38  ;;  %5374 = vmatmul.msk.bf16.gmra.mxu0 %vm751_vm0, %v5632_v32  ;;  %vm3149_vm8 = vweird.f32 %v5763_v39  ;;  %v5633_v20 = vld [vmem:[%s6315_s11 + $0x110] sm:$0xff] }
 0x224   : > { %v3141_v45 = vsel %vm3138_vm7, %v3140_v40, %v3136_v43  ;;  %5766 = vrcp.f32 %v6662_v41  ;;  %v1624_v46 = vpop.f32.mrf.mxu1  ;;  %vm3150_vm10 = vmor %vm3148_vm9, %vm3149_vm8  ;;  %v3169_v10 = vand.u32 2147483648, %v6662_v41  ;;  %v1323_v11 = vmax.f32 %v1079_v3, 0.0 }
 0x225   : > { %4895 = vst.msk [vmem:[%s6508_s13 + $0x58] sm:$0xff] %vm4883_vm4, %v3141_v45  ;;  %v3145_v49 = vsub.f32 1.0, %v3144_v44  ;;  %v1625_v50 = vadd.f32 %v6642_v2, %v1624_v46  ;;  %v3167_v14 = vand.u32 2147483647, %v6662_v41  ;;  %vm3163_vm13 = vweird.f32 %v6662_v41 }
 0x226   : > { %v2168_v54 = vpop.f32.mrf.mxu2  ;;  %v3170_v23 = vor.u32 1.1754944e-38, %v3169_v10 }
 0x227   : > { %v3146_v55 = vmul.f32 %v5763_v39, %v3145_v49  ;;  %v1895_v56 = vmax.f32 %v1625_v50, 0.0  ;;  %v2169_v57 = vadd.f32 %v6484_v47, %v2168_v54  ;;  %vm3168_vm15 = vcmp.eq.f32.partialorder %v3167_v14, 8.507059e+37 }
 0x228   : > { %v1080_v58 = vpop.f32.mrf.mxu0 }
 0x229   : > { %v5765_v59 = vpop.eup %5764  ;;  %v3147_v60 = vadd.f32 %v5763_v39, %v3146_v55  ;;  %v5484_v61 = vmul.f32 -1.442695, %v2169_v57  ;;  %v1081_v62 = vadd.f32 %v6590_v48, %v1080_v58  ;;  %v2006_v63 = vpack.c.bf16 %v1895_v56, %v1894_v53 }
 0x22a   : > { %v5767_v0 = vpop.eup %5766  ;;  %v6676_v37 = vadd.f32 1.0, %v5765_v59 }
 0x22b   : > { %v3151_v4 = vsel %vm3150_vm10, %v5763_v39, %v3147_v60  ;;  %v3159_v5 = vmul.f32 %v5767_v0, %v6662_v41  ;;  %5768 = vpow2.f32 %v5484_v61  ;;  %2210 = vmatmul.bf16.gmra.mxu2 %v2006_v63  ;;  %v1324_v9 = vmax.f32 %v1081_v62, 0.0  ;;  %v6714_v62 = vld [vmem:[%s7836_s6] ss:$0 sm:$0xff] }
 0x22c   : > { %v3156_v6 = vsel %vm3153_vm11, %v3155_v1, %v3151_v4  ;;  %5770 = vrcp.f32 %v6676_v37  ;;  %v1627_v7 = vpop.f32.mrf.mxu1  ;;  %vm3164_vm12 = vweird.f32 %v5767_v0  ;;  %v3182_v32 = vand.u32 2147483647, %v6676_v37 }
 0x22d   : > { %4896 = vst.msk [vmem:[%s6508_s13 + $0x60] sm:$0xff] %vm4883_vm4, %v3156_v6  ;;  %v3160_v8 = vsub.f32 1.0, %v3159_v5  ;;  %v1426_v16 = vpack.c.bf16 %v1324_v9, %v1323_v11  ;;  %vm3165_vm14 = vmor %vm3163_vm13, %vm3164_vm12  ;;  %v1628_v25 = vadd.f32 %v6642_v2, %v1627_v7  ;;  %v3184_v33 = vand.u32 2147483648, %v6676_v37 }
 0x22e   : > { %v2171_v12 = vpop.f32.mrf.mxu2  ;;  %vm3178_vm2 = vweird.f32 %v6676_v37  ;;  %vm3183_vm5 = vcmp.eq.f32.partialorder %v3182_v32, 8.507059e+37 }
 0x22f   : > { %v3161_v13 = vmul.f32 %v5767_v0, %v3160_v8  ;;  %v2172_v15 = vadd.f32 %v6484_v47, %v2171_v12  ;;  %1666 = vmatmul.bf16.gmra.mxu1 %v1426_v16  ;;  %v1896_v34 = vmax.f32 %v1628_v25, 0.0  ;;  %v3185_v49 = vor.u32 1.1754944e-38, %v3184_v33 }
 0x230   : > { %v1083_v17 = vpop.f32.mrf.mxu0 }
 0x231   : > { %v5769_v18 = vpop.eup %5768  ;;  %v3162_v19 = vadd.f32 %v5767_v0, %v3161_v13  ;;  %v5485_v21 = vmul.f32 -1.442695, %v2172_v15  ;;  %v1084_v51 = vadd.f32 %v6590_v48, %v1083_v17 }
 0x232   : > { %v5771_v22 = vpop.eup %5770  ;;  %v6688_v24 = vadd.f32 1.0, %v5769_v18 }
 0x233   : > { %v3166_v26 = vsel %vm3165_vm14, %v5767_v0, %v3162_v19  ;;  %v3174_v27 = vmul.f32 %v5771_v22, %v6676_v37  ;;  %5772 = vpow2.f32 %v5485_v21  ;;  %5375 = vmatmul.msk.bf16.gmra.mxu0 %vm751_vm0, %v5633_v20  ;;  %vm3179_vm1 = vweird.f32 %v5771_v22  ;;  %v5634_v0 = vld [vmem:[%s6315_s11 + $0x118] sm:$0xff] }
 0x234   : > { %v3171_v28 = vsel %vm3168_vm15, %v3170_v23, %v3166_v26  ;;  %5774 = vrcp.f32 %v6688_v24  ;;  %v1629_v29 = vpop.f32.mrf.mxu1  ;;  %vm3180_vm3 = vmor %vm3178_vm2, %vm3179_vm1  ;;  %v3199_v57 = vand.u32 2147483648, %v6688_v24  ;;  %v1325_v58 = vmax.f32 %v1084_v51, 0.0 }
 0x235   : > { %4897 = vst.msk [vmem:[%s6508_s13 + $0x68] sm:$0xff] %vm4883_vm4, %v3171_v28  ;;  %v3175_v30 = vsub.f32 1.0, %v3174_v27  ;;  %v1630_v31 = vadd.f32 %v6642_v2, %v1629_v29  ;;  %v3197_v61 = vand.u32 2147483647, %v6688_v24  ;;  %vm3193_vm7 = vweird.f32 %v6688_v24 }
 0x236   : > { %v2173_v35 = vpop.f32.mrf.mxu2  ;;  %v3200_v7 = vor.u32 1.1754944e-38, %v3199_v57 }
 0x237   : > { %v3176_v36 = vmul.f32 %v5771_v22, %v3175_v30  ;;  %v1897_v38 = vmax.f32 %v1630_v31, 0.0  ;;  %v2174_v39 = vadd.f32 %v6484_v47, %v2173_v35  ;;  %vm3198_vm9 = vcmp.eq.f32.partialorder %v3197_v61, 8.507059e+37 }
 0x238   : > { %v1085_v40 = vpop.f32.mrf.mxu0 }
 0x239   : > { %v5773_v41 = vpop.eup %5772  ;;  %v3177_v42 = vadd.f32 %v5771_v22, %v3176_v36  ;;  %v5486_v43 = vmul.f32 -1.442695, %v2174_v39  ;;  %v1086_v44 = vadd.f32 %v6590_v48, %v1085_v40  ;;  %v2007_v45 = vpack.c.bf16 %v1897_v38, %v1896_v34 }
 0x23a   : > { %v5775_v46 = vpop.eup %5774  ;;  %v6702_v50 = vadd.f32 1.0, %v5773_v41 }
 0x23b   : > { %v3181_v52 = vsel %vm3180_vm3, %v5771_v22, %v3177_v42  ;;  %v3189_v47 = vmul.f32 %v5775_v46, %v6688_v24  ;;  %5776 = vpow2.f32 %v5486_v43  ;;  %2215 = vmatmul.bf16.gmra.mxu2 %v2007_v45  ;;  %v1326_v56 = vmax.f32 %v1086_v44, 0.0 }
 0x23c   : > { %v3186_v53 = vsel %vm3183_vm5, %v3185_v49, %v3181_v52  ;;  %5778 = vrcp.f32 %v6702_v50  ;;  %v1632_v54 = vpop.f32.mrf.mxu1  ;;  %vm3194_vm6 = vweird.f32 %v5775_v46  ;;  %v3212_v20 = vand.u32 2147483647, %v6702_v50  ;;  %v5635_v49 = vld [vmem:[%s6315_s11 + $0x120] sm:$0xff] }
 0x23d   : > { %4898 = vst.msk [vmem:[%s6508_s13 + $0x70] sm:$0xff] %vm4883_vm4, %v3186_v53  ;;  %v3190_v55 = vsub.f32 1.0, %v3189_v47  ;;  %v1427_v1 = vpack.c.bf16 %v1326_v56, %v1325_v58  ;;  %vm3195_vm8 = vmor %vm3193_vm7, %vm3194_vm6  ;;  %v1633_v9 = vadd.f32 %v6642_v2, %v1632_v54  ;;  %v3214_v16 = vand.u32 2147483648, %v6702_v50 }
 0x23e   : > { %v2176_v59 = vpop.f32.mrf.mxu2  ;;  %vm3208_vm11 = vweird.f32 %v6702_v50  ;;  %vm3213_vm13 = vcmp.eq.f32.partialorder %v3212_v20, 8.507059e+37 }
 0x23f   : > { %v3191_v60 = vmul.f32 %v5775_v46, %v3190_v55  ;;  %v2177_v63 = vadd.f32 %v6714_v62, %v2176_v59  ;;  %1671 = vmatmul.bf16.gmra.mxu1 %v1427_v1  ;;  %v1898_v17 = vmax.f32 %v1633_v9, 0.0  ;;  %v3215_v31 = vor.u32 1.1754944e-38, %v3214_v16 }
 0x240   : > { %v1088_v37 = vpop.f32.mrf.mxu0 }
 0x241   : > { %v5777_v3 = vpop.eup %5776  ;;  %v3192_v4 = vadd.f32 %v5775_v46, %v3191_v60  ;;  %v5487_v5 = vmul.f32 -1.442695, %v2177_v63  ;;  %v1089_v23 = vadd.f32 %v6590_v48, %v1088_v37 }
 0x242   : > { %v5779_v6 = vpop.eup %5778  ;;  %v6719_v8 = vadd.f32 1.0, %v5777_v3 }
 0x243   : > { %v3196_v10 = vsel %vm3195_vm8, %v5775_v46, %v3192_v4  ;;  %v3204_v11 = vmul.f32 %v5779_v6, %v6702_v50  ;;  %5780 = vpow2.f32 %v5487_v5  ;;  %5376 = vmatmul.msk.bf16.gmra.mxu0 %vm751_vm0, %v5634_v0  ;;  %vm3209_vm10 = vweird.f32 %v5779_v6 }
 0x244   : > { %v3201_v12 = vsel %vm3198_vm9, %v3200_v7, %v3196_v10  ;;  %5782 = vrcp.f32 %v6719_v8  ;;  %v1634_v13 = vpop.f32.mrf.mxu1  ;;  %vm3210_vm12 = vmor %vm3208_vm11, %vm3209_vm10  ;;  %v1327_v38 = vmax.f32 %v1089_v23, 0.0  ;;  %v3227_v40 = vand.u32 2147483647, %v6719_v8 }
 0x245   : > { %4899 = vst.msk [vmem:[%s6508_s13 + $0x78] sm:$0xff] %vm4883_vm4, %v3201_v12  ;;  %v3205_v14 = vsub.f32 1.0, %v3204_v11  ;;  %v1635_v15 = vadd.f32 %v6642_v2, %v1634_v13  ;;  %v3229_v41 = vand.u32 2147483648, %v6719_v8  ;;  %vm3223_vm15 = vweird.f32 %v6719_v8 }
 0x246   : > { %v2178_v18 = vpop.f32.mrf.mxu2  ;;  %vm3228_vm2 = vcmp.eq.f32.partialorder %v3227_v40, 8.507059e+37 }
 0x247   : > { %v3206_v19 = vmul.f32 %v5779_v6, %v3205_v14  ;;  %v1899_v21 = vmax.f32 %v1635_v15, 0.0  ;;  %v2179_v22 = vadd.f32 %v6714_v62, %v2178_v18  ;;  %v3230_v54 = vor.u32 1.1754944e-38, %v3229_v41 }
 0x248   : > { %v1090_v24 = vpop.f32.mrf.mxu0 }
 0x249   : > { %v5781_v25 = vpop.eup %5780  ;;  %v3207_v26 = vadd.f32 %v5779_v6, %v3206_v19  ;;  %v5488_v27 = vmul.f32 -1.442695, %v2179_v22  ;;  %v1091_v28 = vadd.f32 %v6590_v48, %v1090_v24  ;;  %v2008_v29 = vpack.c.bf16 %v1899_v21, %v1898_v17 }
 0x24a   : > { %v5783_v30 = vpop.eup %5782  ;;  %v2853_v32 = vadd.f32 1.0, %v5781_v25 }
 0x24b   : > { %v3211_v33 = vsel %vm3210_vm12, %v5779_v6, %v3207_v26  ;;  %v3219_v34 = vmul.f32 %v5783_v30, %v6719_v8  ;;  %5784 = vpow2.f32 %v5488_v27  ;;  %2220 = vmatmul.bf16.gmra.mxu2 %v2008_v29  ;;  %v1328_v39 = vmax.f32 %v1091_v28, 0.0 }
 0x24c   : > { %v3216_v35 = vsel %vm3213_vm13, %v3215_v31, %v3211_v33  ;;  %5786 = vrcp.f32 %v2853_v32  ;;  %vm3224_vm14 = vweird.f32 %v5783_v30  ;;  %v1637_v44 = vpop.f32.mrf.mxu1  ;;  %v3242_v60 = vand.u32 2147483647, %v2853_v32 }
 0x24d   : > { %4900 = vst.msk [vmem:[%s6508_s13 + $0x80] sm:$0xff] %vm4883_vm4, %v3216_v35  ;;  %v3220_v36 = vsub.f32 1.0, %v3219_v34  ;;  %v1428_v46 = vpack.c.bf16 %v1328_v39, %v1327_v38  ;;  %vm3225_vm1 = vmor %vm3223_vm15, %vm3224_vm14  ;;  %v3244_v61 = vand.u32 2147483648, %v2853_v32  ;;  %v1638_v1 = vadd.f32 %v6642_v2, %v1637_v44 }
 0x24e   : > { %v2181_v42 = vpop.f32.mrf.mxu2  ;;  %vm3238_vm5 = vweird.f32 %v2853_v32  ;;  %vm3243_vm7 = vcmp.eq.f32.partialorder %v3242_v60, 8.507059e+37 }
 0x24f   : > { %v3221_v43 = vmul.f32 %v5783_v30, %v3220_v36  ;;  %v2182_v45 = vadd.f32 %v6714_v62, %v2181_v42  ;;  %1676 = vmatmul.bf16.gmra.mxu1 %v1428_v46  ;;  %v3245_v12 = vor.u32 1.1754944e-38, %v3244_v61  ;;  %v1900_v16 = vmax.f32 %v1638_v1, 0.0 }
 0x250   : > { %v1093_v50 = vpop.f32.mrf.mxu0 }
 0x251   : > { %v5785_v51 = vpop.eup %5784  ;;  %v3222_v52 = vadd.f32 %v5783_v30, %v3221_v43  ;;  %v5489_v47 = vmul.f32 -1.442695, %v2182_v45  ;;  %v1094_v8 = vadd.f32 %v6590_v48, %v1093_v50 }
 0x252   : > { %v5787_v53 = vpop.eup %5786  ;;  %v6742_v55 = vadd.f32 1.0, %v5785_v51 }
 0x253   : > { %v3226_v56 = vsel %vm3225_vm1, %v5783_v30, %v3222_v52  ;;  %v3234_v57 = vmul.f32 %v5787_v53, %v2853_v32  ;;  %5788 = vpow2.f32 %v5489_v47  ;;  %5377 = vmatmul.msk.bf16.gmra.mxu0 %vm751_vm0, %v5635_v49  ;;  %vm3239_vm3 = vweird.f32 %v5787_v53  ;;  %v5636_v30 = vld [vmem:[%s6315_s11 + $0x128] sm:$0xff] }
 0x254   : > { %v3231_v58 = vsel %vm3228_vm2, %v3230_v54, %v3226_v56  ;;  %5790 = vrcp.f32 %v6742_v55  ;;  %v1639_v37 = vpop.f32.mrf.mxu1  ;;  %vm3240_vm6 = vmor %vm3238_vm5, %vm3239_vm3  ;;  %v1329_v19 = vmax.f32 %v1094_v8, 0.0  ;;  %v3257_v23 = vand.u32 2147483647, %v6742_v55 }
 0x255   : > { %4901 = vst.msk [vmem:[%s6508_s13 + $0x88] sm:$0xff] %vm4883_vm4, %v3231_v58  ;;  %v3235_v59 = vsub.f32 1.0, %v3234_v57  ;;  %v1640_v4 = vadd.f32 %v6642_v2, %v1639_v37  ;;  %v3259_v24 = vand.u32 2147483648, %v6742_v55  ;;  %vm3253_vm9 = vweird.f32 %v6742_v55 }
 0x256   : > { %v2183_v63 = vpop.f32.mrf.mxu2  ;;  %vm3258_vm11 = vcmp.eq.f32.partialorder %v3257_v23, 8.507059e+37 }
 0x257   : > { %v3236_v0 = vmul.f32 %v5787_v53, %v3235_v59  ;;  %v2184_v3 = vadd.f32 %v6714_v62, %v2183_v63  ;;  %v1901_v14 = vmax.f32 %v1640_v4, 0.0  ;;  %v3260_v36 = vor.u32 1.1754944e-38, %v3259_v24 }
 0x258   : > { %v1095_v5 = vpop.f32.mrf.mxu0 }
 0x259   : > { %v5789_v6 = vpop.eup %5788  ;;  %v3237_v7 = vadd.f32 %v5787_v53, %v3236_v0  ;;  %v5490_v9 = vmul.f32 -1.442695, %v2184_v3  ;;  %v1096_v10 = vadd.f32 %v6590_v48, %v1095_v5  ;;  %v2009_v22 = vpack.c.bf16 %v1901_v14, %v1900_v16  ;;  %v5637_v14 = vld [vmem:[%s6315_s11 + $0x130] sm:$0xff] }
 0x25a   : > { %v5791_v11 = vpop.eup %5790  ;;  %v2855_v13 = vadd.f32 1.0, %v5789_v6 }
 0x25b   : > { %v3241_v15 = vsel %vm3240_vm6, %v5787_v53, %v3237_v7  ;;  %v3249_v20 = vmul.f32 %v5791_v11, %v6742_v55  ;;  %5792 = vpow2.f32 %v5490_v9  ;;  %v1330_v21 = vmax.f32 %v1096_v10, 0.0  ;;  %2225 = vmatmul.bf16.gmra.mxu2 %v2009_v22 }
 0x25c   : > { %v3246_v17 = vsel %vm3243_vm7, %v3245_v12, %v3241_v15  ;;  %5794 = vrcp.f32 %v2855_v13  ;;  %vm3254_vm8 = vweird.f32 %v5791_v11  ;;  %v1642_v27 = vpop.f32.mrf.mxu1  ;;  %v3272_v43 = vand.u32 2147483647, %v2855_v13 }
 0x25d   : > { %4902 = vst.msk [vmem:[%s6508_s13 + $0x90] sm:$0xff] %vm4883_vm4, %v3246_v17  ;;  %v3250_v18 = vsub.f32 1.0, %v3249_v20  ;;  %v1429_v29 = vpack.c.bf16 %v1330_v21, %v1329_v19  ;;  %vm3255_vm10 = vmor %vm3253_vm9, %vm3254_vm8  ;;  %v3274_v44 = vand.u32 2147483648, %v2855_v13  ;;  %v1643_v49 = vadd.f32 %v6642_v2, %v1642_v27 }
 0x25e   : > { %v2186_v25 = vpop.f32.mrf.mxu2  ;;  %vm3268_vm13 = vweird.f32 %v2855_v13  ;;  %vm3273_vm15 = vcmp.eq.f32.partialorder %v3272_v43, 8.507059e+37 }
 0x25f   : > { %v3251_v26 = vmul.f32 %v5791_v11, %v3250_v18  ;;  %v2187_v28 = vadd.f32 %v6714_v62, %v2186_v25  ;;  %1681 = vmatmul.bf16.gmra.mxu1 %v1429_v29  ;;  %v3275_v59 = vor.u32 1.1754944e-38, %v3274_v44  ;;  %v1902_v1 = vmax.f32 %v1643_v49, 0.0 }
 0x260   : > { %v1098_v31 = vpop.f32.mrf.mxu0 }
 0x261   : > { %v5793_v32 = vpop.eup %5792  ;;  %v3252_v33 = vadd.f32 %v5791_v11, %v3251_v26  ;;  %v5491_v34 = vmul.f32 -1.442695, %v2187_v28  ;;  %v1099_v55 = vadd.f32 %v6590_v48, %v1098_v31 }
 0x262   : > { %v5795_v35 = vpop.eup %5794  ;;  %v6761_v38 = vadd.f32 1.0, %v5793_v32 }
 0x263   : > { %v3256_v39 = vsel %vm3255_vm10, %v5791_v11, %v3252_v33  ;;  %v3264_v40 = vmul.f32 %v5795_v35, %v2855_v13  ;;  %5796 = vpow2.f32 %v5491_v34  ;;  %5378 = vmatmul.msk.bf16.gmra.mxu0 %vm751_vm0, %v5636_v30  ;;  %vm3269_vm12 = vweird.f32 %v5795_v35 }
 0x264   : > { %v3261_v41 = vsel %vm3258_vm11, %v3260_v36, %v3256_v39  ;;  %5798 = vrcp.f32 %v6761_v38  ;;  %v1644_v50 = vpop.f32.mrf.mxu1  ;;  %vm3270_vm14 = vmor %vm3268_vm13, %vm3269_vm12  ;;  %v1331_v4 = vmax.f32 %v1099_v55, 0.0  ;;  %v3287_v7 = vand.u32 2147483647, %v6761_v38 }
 0x265   : > { %4903 = vst.msk [vmem:[%s6508_s13 + $0x98] sm:$0xff] %vm4883_vm4, %v3261_v41  ;;  %v3265_v42 = vsub.f32 1.0, %v3264_v40  ;;  %v1645_v52 = vadd.f32 %v6642_v2, %v1644_v50  ;;  %v3289_v8 = vand.u32 2147483648, %v6761_v38  ;;  %vm3283_vm2 = vweird.f32 %v6761_v38 }
 0x266   : > { %v2188_v45 = vpop.f32.mrf.mxu2  ;;  %vm3288_vm5 = vcmp.eq.f32.partialorder %v3287_v7, 8.507059e+37 }
 0x267   : > { %v3266_v46 = vmul.f32 %v5795_v35, %v3265_v42  ;;  %v2189_v51 = vadd.f32 %v6714_v62, %v2188_v45  ;;  %v1903_v61 = vmax.f32 %v1645_v52, 0.0  ;;  %v3290_v19 = vor.u32 1.1754944e-38, %v3289_v8 }
 0x268   : > { %v1100_v47 = vpop.f32.mrf.mxu0 }
 0x269   : > { %v5797_v53 = vpop.eup %5796  ;;  %v3267_v54 = vadd.f32 %v5795_v35, %v3266_v46  ;;  %v5492_v56 = vmul.f32 -1.442695, %v2189_v51  ;;  %v1101_v57 = vadd.f32 %v6590_v48, %v1100_v47  ;;  %v2010_v6 = vpack.c.bf16 %v1903_v61, %v1902_v1 }
 0x26a   : > { %v5799_v58 = vpop.eup %5798  ;;  %v2857_v60 = vadd.f32 1.0, %v5797_v53 }
 0x26b   : > { %v3271_v63 = vsel %vm3270_vm14, %v5795_v35, %v3267_v54  ;;  %v3279_v0 = vmul.f32 %v5799_v58, %v6761_v38  ;;  %5800 = vpow2.f32 %v5492_v56  ;;  %v1332_v5 = vmax.f32 %v1101_v57, 0.0  ;;  %2230 = vmatmul.bf16.gmra.mxu2 %v2010_v6 }
 0x26c   : > { %v3276_v37 = vsel %vm3273_vm15, %v3275_v59, %v3271_v63  ;;  %5802 = vrcp.f32 %v2857_v60  ;;  %vm3284_vm1 = vweird.f32 %v5799_v58  ;;  %v1647_v11 = vpop.f32.mrf.mxu1  ;;  %v3302_v26 = vand.u32 2147483647, %v2857_v60 }
 0x26d   : > { %4904 = vst.msk [vmem:[%s6508_s13 + $0xa0] sm:$0xff] %vm4883_vm4, %v3276_v37  ;;  %v3280_v3 = vsub.f32 1.0, %v3279_v0  ;;  %v1430_v13 = vpack.c.bf16 %v1332_v5, %v1331_v4  ;;  %vm3285_vm3 = vmor %vm3283_vm2, %vm3284_vm1  ;;  %v3304_v27 = vand.u32 2147483648, %v2857_v60  ;;  %v1648_v30 = vadd.f32 %v6642_v2, %v1647_v11 }
 0x26e   : > { %v2191_v9 = vpop.f32.mrf.mxu2  ;;  %vm3298_vm7 = vweird.f32 %v2857_v60  ;;  %vm3303_vm9 = vcmp.eq.f32.partialorder %v3302_v26, 8.507059e+37 }
 0x26f   : > { %v3281_v10 = vmul.f32 %v5799_v58, %v3280_v3  ;;  %v2192_v12 = vadd.f32 %v6714_v62, %v2191_v9  ;;  %1686 = vmatmul.bf16.gmra.mxu1 %v1430_v13  ;;  %v3305_v42 = vor.u32 1.1754944e-38, %v3304_v27  ;;  %v1904_v49 = vmax.f32 %v1648_v30, 0.0 }
 0x270   : > { %v1103_v15 = vpop.f32.mrf.mxu0 }
 0x271   : > { %v5801_v20 = vpop.eup %5800  ;;  %v3282_v16 = vadd.f32 %v5799_v58, %v3281_v10  ;;  %v5493_v17 = vmul.f32 -1.442695, %v2192_v12  ;;  %v1104_v38 = vadd.f32 %v6590_v48, %v1103_v15 }
 0x272   : > { %v5803_v18 = vpop.eup %5802  ;;  %v6780_v21 = vadd.f32 1.0, %v5801_v20 }
 0x273   : > { %v3286_v22 = vsel %vm3285_vm3, %v5799_v58, %v3282_v16  ;;  %v3294_v23 = vmul.f32 %v5803_v18, %v2857_v60  ;;  %5804 = vpow2.f32 %v5493_v17  ;;  %5379 = vmatmul.msk.bf16.gmra.mxu0 %vm751_vm0, %v5637_v14  ;;  %vm3299_vm6 = vweird.f32 %v5803_v18  ;;  %v5638_v60 = vld [vmem:[%s6315_s11 + $0x138] sm:$0xff] }
 0x274   : > { %v3291_v24 = vsel %vm3288_vm5, %v3290_v19, %v3286_v22  ;;  %5806 = vrcp.f32 %v6780_v21  ;;  %v1649_v31 = vpop.f32.mrf.mxu1  ;;  %vm3300_vm8 = vmor %vm3298_vm7, %vm3299_vm6  ;;  %v3317_v53 = vand.u32 2147483647, %v6780_v21  ;;  %v3319_v54 = vand.u32 2147483648, %v6780_v21  ;;  %v6818_v19 = vld [vmem:[%s7832_s2] ss:$0 sm:$0xff] }
 0x275   : > { %4905 = vst.msk [vmem:[%s6508_s13 + $0xa8] sm:$0xff] %vm4883_vm4, %v3291_v24  ;;  %v3295_v25 = vsub.f32 1.0, %v3294_v23  ;;  %v1650_v33 = vadd.f32 %v6642_v2, %v1649_v31  ;;  %vm3313_vm11 = vweird.f32 %v6780_v21  ;;  %v5648_v24 = vld [vmem:[%s6315_s11 + $0x188] sm:$0xff] }
 0x276   : > { %v2193_v28 = vpop.f32.mrf.mxu2  ;;  %v3320_v3 = vor.u32 1.1754944e-38, %v3319_v54  ;;  %vm3318_vm13 = vcmp.eq.f32.partialorder %v3317_v53, 8.507059e+37  ;;  %5390 = vmatmul.msk.bf16.vlgmr.msra.gmra.mxu3 %vm751_vm0, %v5648_v24 }
 0x277   : > { %v3296_v29 = vmul.f32 %v5803_v18, %v3295_v25  ;;  %v2194_v32 = vadd.f32 %v6714_v62, %v2193_v28  ;;  %v1905_v44 = vmax.f32 %v1650_v33, 0.0  ;;  %v6226_v33 = vld [vmem:[%s7835_s5 + $0x38] sm:$0xff] }
 0x278   : > { %v1105_v34 = vpop.f32.mrf.mxu0  ;;  %5691 = vmatpush.bf16.msra.mxu3 %v6226_v33  ;;  %v5640_v33 = vld [vmem:[%s6315_s11 + $0x148] sm:$0xff] }
 0x279   : > { %v5805_v35 = vpop.eup %5804  ;;  %v3297_v36 = vadd.f32 %v5803_v18, %v3296_v29  ;;  %v5494_v39 = vmul.f32 -1.442695, %v2194_v32  ;;  %v1106_v40 = vadd.f32 %v6590_v48, %v1105_v34  ;;  %v1333_v48 = vmax.f32 %v1104_v38, 0.0 }
 0x27a   : > { %v5807_v41 = vpop.eup %5806  ;;  %v6791_v43 = vadd.f32 1.0, %v5805_v35  ;;  %v2011_v47 = vpack.c.bf16 %v1905_v44, %v1904_v49 }
 0x27b   : > { %v3301_v45 = vsel %vm3300_vm8, %v5803_v18, %v3297_v36  ;;  %v3309_v46 = vmul.f32 %v5807_v41, %v6780_v21  ;;  %5808 = vpow2.f32 %v5494_v39  ;;  %v1334_v52 = vmax.f32 %v1106_v40, 0.0 }
 0x27c   : > { %v3306_v50 = vsel %vm3303_vm9, %v3305_v42, %v3301_v45  ;;  %5810 = vrcp.f32 %v6791_v43  ;;  %vm3314_vm10 = vweird.f32 %v5807_v41  ;;  %2235 = vmatmul.bf16.gmra.mxu2 %v2011_v47  ;;  %v1652_v57 = vpop.f32.mrf.mxu1  ;;  %v3332_v9 = vand.u32 2147483647, %v6791_v43 }
 0x27d   : > { %4906 = vst.msk [vmem:[%s6508_s13 + $0xb0] sm:$0xff] %vm4883_vm4, %v3306_v50  ;;  %v3310_v51 = vsub.f32 1.0, %v3309_v46  ;;  %v1431_v59 = vpack.c.bf16 %v1334_v52, %v1333_v48  ;;  %vm3315_vm12 = vmor %vm3313_vm11, %vm3314_vm10  ;;  %v3334_v10 = vand.u32 2147483648, %v6791_v43  ;;  %v1653_v13 = vadd.f32 %v6642_v2, %v1652_v57  ;;  %v5639_v46 = vld [vmem:[%s6315_s11 + $0x140] sm:$0xff]  ;;  %v6227_v50 = vld [vmem:[%s7835_s5 + $0x30] sm:$0xff] }
 0x27e   : > { %v2196_v55 = vpop.f32.mrf.mxu2  ;;  %vm3328_vm15 = vweird.f32 %v6791_v43  ;;  %vm3333_vm2 = vcmp.eq.f32.partialorder %v3332_v9, 8.507059e+37  ;;  %5692 = vmatpush.bf16.msra.mxu3 %v6227_v50 }
 0x27f   : > { %v3311_v56 = vmul.f32 %v5807_v41, %v3310_v51  ;;  %v2197_v58 = vadd.f32 %v6714_v62, %v2196_v55  ;;  %1691 = vmatmul.bf16.gmra.mxu1 %v1431_v59  ;;  %v3335_v26 = vor.u32 1.1754944e-38, %v3334_v10  ;;  %v1906_v31 = vmax.f32 %v1653_v13, 0.0 }
 0x280   : > { %v1108_v61 = vpop.f32.mrf.mxu0 }
 0x281   : > { %v5809_v63 = vpop.eup %5808  ;;  %v3312_v0 = vadd.f32 %v5807_v41, %v3311_v56  ;;  %v5495_v1 = vmul.f32 -1.442695, %v2197_v58  ;;  %v1109_v21 = vadd.f32 %v6818_v19, %v1108_v61  ;;  %v6228_v58 = vld [vmem:[%s7835_s5 + $0x28] sm:$0xff] }
 0x282   : > { %v5811_v37 = vpop.eup %5810  ;;  %v6802_v4 = vadd.f32 1.0, %v5809_v63  ;;  %5693 = vmatpush.bf16.msra.mxu3 %v6228_v58  ;;  %v6234_v58 = vld [vmem:[%s7835_s5] sm:$0xff] }
 0x283   : > { %v3316_v5 = vsel %vm3315_vm12, %v5807_v41, %v3312_v0  ;;  %v3324_v6 = vmul.f32 %v5811_v37, %v6791_v43  ;;  %5812 = vpow2.f32 %v5495_v1  ;;  %5380 = vmatmul.msk.bf16.gmra.mxu0 %vm751_vm0, %v5638_v60  ;;  %vm3329_vm14 = vweird.f32 %v5811_v37 }
 0x284   : > { %v3321_v7 = vsel %vm3318_vm13, %v3320_v3, %v3316_v5  ;;  %5814 = vrcp.f32 %v6802_v4  ;;  %v1654_v14 = vpop.f32.mrf.mxu1  ;;  %vm3330_vm1 = vmor %vm3328_vm15, %vm3329_vm14  ;;  %v1335_v35 = vmax.f32 %v1109_v21, 0.0  ;;  %v3347_v39 = vand.u32 2147483647, %v6802_v4  ;;  %v6230_v21 = vld [vmem:[%s7835_s5 + $0x18] sm:$0xff] }
 0x285   : > { %4907 = vst.msk [vmem:[%s6508_s13 + $0xb8] sm:$0xff] %vm4883_vm4, %v3321_v7  ;;  %v3325_v8 = vsub.f32 1.0, %v3324_v6  ;;  %v1655_v20 = vadd.f32 %v6642_v2, %v1654_v14  ;;  %v3349_v40 = vand.u32 2147483648, %v6802_v4  ;;  %vm3343_vm5 = vweird.f32 %v6802_v4  ;;  %v6229_v6 = vld [vmem:[%s7835_s5 + $0x20] sm:$0xff] }
 0x286   : > { %v2198_v11 = vpop.f32.mrf.mxu2  ;;  %vm3348_vm7 = vcmp.eq.f32.partialorder %v3347_v39, 8.507059e+37  ;;  %5694 = vmatpush.bf16.msra.mxu3 %v6229_v6 }
 0x287   : > { %v3326_v12 = vmul.f32 %v5811_v37, %v3325_v8  ;;  %v2199_v15 = vadd.f32 %v6714_v62, %v2198_v11  ;;  %v1907_v28 = vmax.f32 %v1655_v20, 0.0  ;;  %v3350_v53 = vor.u32 1.1754944e-38, %v3349_v40 }
 0x288   : > { %v1110_v16 = vpop.f32.mrf.mxu0 }
 0x289   : > { %v5813_v17 = vpop.eup %5812  ;;  %v3327_v18 = vadd.f32 %v5811_v37, %v3326_v12  ;;  %v5496_v22 = vmul.f32 -1.442695, %v2199_v15  ;;  %v1111_v23 = vadd.f32 %v6818_v19, %v1110_v16  ;;  %v2012_v38 = vpack.c.bf16 %v1907_v28, %v1906_v31  ;;  %v5649_v12 = vld [vmem:[%s6315_s11 + $0x190] sm:$0xff] }
 0x28a   : > { %v5815_v25 = vpop.eup %5814  ;;  %v6824_v27 = vadd.f32 1.0, %v5813_v17  ;;  %5391 = vmatmul.msk.bf16.gmra.mxu3 %vm751_vm0, %v5649_v12 }
 0x28b   : > { %v3331_v29 = vsel %vm3330_vm1, %v5811_v37, %v3327_v18  ;;  %v3339_v30 = vmul.f32 %v5815_v25, %v6802_v4  ;;  %5816 = vpow2.f32 %v5496_v22  ;;  %v1336_v36 = vmax.f32 %v1111_v23, 0.0  ;;  %5695 = vmatpush.bf16.msra.mxu3 %v6230_v21  ;;  %v5641_v21 = vld [vmem:[%s6315_s11 + $0x150] sm:$0xff] }
 0x28c   : > { %v3336_v32 = vsel %vm3333_vm2, %v3335_v26, %v3331_v29  ;;  %5818 = vrcp.f32 %v6824_v27  ;;  %vm3344_vm3 = vweird.f32 %v5815_v25  ;;  %2240 = vmatmul.bf16.gmra.mxu2 %v2012_v38  ;;  %v1657_v43 = vpop.f32.mrf.mxu1  ;;  %v3362_v60 = vand.u32 2147483647, %v6824_v27 }
 0x28d   : > { %4908 = vst.msk [vmem:[%s6508_s13 + $0xc0] sm:$0xff] %vm4883_vm4, %v3336_v32  ;;  %v3340_v34 = vsub.f32 1.0, %v3339_v30  ;;  %v1432_v45 = vpack.c.bf16 %v1336_v36, %v1335_v35  ;;  %vm3345_vm6 = vmor %vm3343_vm5, %vm3344_vm3  ;;  %v3364_v61 = vand.u32 2147483648, %v6824_v27  ;;  %v1658_v1 = vadd.f32 %v6642_v2, %v1657_v43  ;;  %v6231_v35 = vld [vmem:[%s7835_s5 + $0x10] sm:$0xff] }
 0x28e   : > { %v2201_v41 = vpop.f32.mrf.mxu2  ;;  %vm3358_vm9 = vweird.f32 %v6824_v27  ;;  %vm3363_vm11 = vcmp.eq.f32.partialorder %v3362_v60, 8.507059e+37 }
 0x28f   : > { %v3341_v42 = vmul.f32 %v5815_v25, %v3340_v34  ;;  %v2202_v44 = vadd.f32 %v6714_v62, %v2201_v41  ;;  %1696 = vmatmul.bf16.gmra.mxu1 %v1432_v45  ;;  %v1908_v17 = vmax.f32 %v1658_v1, 0.0  ;;  %5696 = vmatpush.bf16.msra.mxu3 %v6231_v35  ;;  %v5650_v1 = vld [vmem:[%s6315_s11 + $0x198] sm:$0xff] }
 0x290   : > { %v1113_v49 = vpop.f32.mrf.mxu0 }
 0x291   : > { %v5817_v51 = vpop.eup %5816  ;;  %v3342_v48 = vadd.f32 %v5815_v25, %v3341_v42  ;;  %v5497_v52 = vmul.f32 -1.442695, %v2202_v44  ;;  %v1114_v9 = vadd.f32 %v6818_v19, %v1113_v49 }
 0x292   : > { %v5819_v47 = vpop.eup %5818  ;;  %v6842_v54 = vadd.f32 1.0, %v5817_v51 }
 0x293   : > { %v3346_v55 = vsel %vm3345_vm6, %v5815_v25, %v3342_v48  ;;  %v3354_v56 = vmul.f32 %v5819_v47, %v6824_v27  ;;  %5820 = vpow2.f32 %v5497_v52  ;;  %5381 = vmatmul.msk.bf16.gmra.mxu0 %vm751_vm0, %v5639_v46  ;;  %vm3359_vm8 = vweird.f32 %v5819_v47  ;;  %v6232_v46 = vld [vmem:[%s7835_s5 + $0x8] sm:$0xff] }
 0x294   : > { %v3351_v57 = vsel %vm3348_vm7, %v3350_v53, %v3346_v55  ;;  %5822 = vrcp.f32 %v6842_v54  ;;  %v1659_v37 = vpop.f32.mrf.mxu1  ;;  %vm3360_vm10 = vmor %vm3358_vm9, %vm3359_vm8  ;;  %v1337_v23 = vmax.f32 %v1114_v9, 0.0  ;;  %v3377_v26 = vand.u32 2147483647, %v6842_v54  ;;  %5697 = vmatpush.bf16.msra.mxu3 %v6232_v46 }
 0x295   : > { %4909 = vst.msk [vmem:[%s6508_s13 + $0xc8] sm:$0xff] %vm4883_vm4, %v3351_v57  ;;  %v3355_v59 = vsub.f32 1.0, %v3354_v56  ;;  %v1660_v4 = vadd.f32 %v6642_v2, %v1659_v37  ;;  %v3365_v2 = vor.u32 1.1754944e-38, %v3364_v61  ;;  %v3379_v27 = vand.u32 2147483648, %v6842_v54 }
 0x296   : > { %v2203_v63 = vpop.f32.mrf.mxu2  ;;  %vm3373_vm13 = vweird.f32 %v6842_v54  ;;  %vm3378_vm15 = vcmp.eq.f32.partialorder %v3377_v26, 8.507059e+37 }
 0x297   : > { %v3356_v0 = vmul.f32 %v5819_v47, %v3355_v59  ;;  %v2204_v3 = vadd.f32 %v6714_v62, %v2203_v63  ;;  %v1909_v15 = vmax.f32 %v1660_v4, 0.0  ;;  %v3380_v41 = vor.u32 1.1754944e-38, %v3379_v27 }
 0x298   : > { %v1115_v5 = vpop.f32.mrf.mxu0  ;;  %5698 = vmatpush.bf16.msra.mxu3 %v6234_v58 }
 0x299   : > { %v5821_v7 = vpop.eup %5820  ;;  %v3357_v8 = vadd.f32 %v5819_v47, %v3356_v0  ;;  %v5498_v10 = vmul.f32 -1.442695, %v2204_v3  ;;  %v1116_v11 = vadd.f32 %v6818_v19, %v1115_v5  ;;  %v2013_v25 = vpack.c.bf16 %v1909_v15, %v1908_v17 }
 0x29a   : > { %v5823_v13 = vpop.eup %5822  ;;  %v6865_v14 = vadd.f32 1.0, %v5821_v7  ;;  %5392 = vmatmul.msk.bf16.gmra.mxu3 %vm751_vm0, %v5650_v1 }
 0x29b   : > { %v3361_v20 = vsel %vm3360_vm10, %v5819_v47, %v3357_v8  ;;  %v3369_v16 = vmul.f32 %v5823_v13, %v6842_v54  ;;  %5824 = vpow2.f32 %v5498_v10  ;;  %v1338_v24 = vmax.f32 %v1116_v11, 0.0  ;;  %v6898_v47 = vld [vmem:[%s7834_s4] ss:$0 sm:$0xff] }
 0x29c   : > { %v3366_v18 = vsel %vm3363_vm11, %v3365_v2, %v3361_v20  ;;  %5826 = vrcp.f32 %v6865_v14  ;;  %vm3374_vm12 = vweird.f32 %v5823_v13  ;;  %2245 = vmatmul.bf16.gmra.mxu2 %v2013_v25  ;;  %v1662_v30 = vpop.f32.mrf.mxu1  ;;  %v3392_v50 = vand.u32 2147483647, %v6865_v14 }
 0x29d   : > { %4910 = vst.msk [vmem:[%s6508_s13 + $0xd0] sm:$0xff] %vm4883_vm4, %v3366_v18  ;;  %v3370_v22 = vsub.f32 1.0, %v3369_v16  ;;  %v1433_v32 = vpack.c.bf16 %v1338_v24, %v1337_v23  ;;  %vm3375_vm14 = vmor %vm3373_vm13, %vm3374_vm12  ;;  %v3394_v51 = vand.u32 2147483648, %v6865_v14  ;;  %v1663_v53 = vadd.f32 %v6898_v47, %v1662_v30 }
 0x29e   : > { %v2206_v28 = vpop.f32.mrf.mxu2  ;;  %vm3388_vm2 = vweird.f32 %v6865_v14  ;;  %vm3393_vm5 = vcmp.eq.f32.partialorder %v3392_v50, 8.507059e+37  ;;  %v5651_v50 = vld [vmem:[%s6315_s11 + $0x1a0] sm:$0xff] }
 0x29f   : > { %v3371_v29 = vmul.f32 %v5823_v13, %v3370_v22  ;;  %v2207_v31 = vadd.f32 %v6714_v62, %v2206_v28  ;;  %1701 = vmatmul.bf16.gmra.mxu1 %v1433_v32  ;;  %v3395_v3 = vor.u32 1.1754944e-38, %v3394_v51  ;;  %v1910_v8 = vmax.f32 %v1663_v53, 0.0 }
 0x2a0   : > { %v1118_v34 = vpop.f32.mrf.mxu0 }
 0x2a1   : > { %v5825_v36 = vpop.eup %5824  ;;  %v3372_v38 = vadd.f32 %v5823_v13, %v3371_v29  ;;  %v5499_v39 = vmul.f32 -1.442695, %v2207_v31  ;;  %v1119_v61 = vadd.f32 %v6818_v19, %v1118_v34 }
 0x2a2   : > { %v5827_v40 = vpop.eup %5826  ;;  %v6883_v42 = vadd.f32 1.0, %v5825_v36 }
 0x2a3   : > { %v3376_v43 = vsel %vm3375_vm14, %v5823_v13, %v3372_v38  ;;  %v3384_v44 = vmul.f32 %v5827_v40, %v6865_v14  ;;  %5828 = vpow2.f32 %v5499_v39  ;;  %5382 = vmatmul.msk.bf16.gmra.mxu0 %vm751_vm0, %v5640_v33  ;;  %vm3389_vm1 = vweird.f32 %v5827_v40 }
 0x2a4   : > { %v3381_v45 = vsel %vm3378_vm15, %v3380_v41, %v3376_v43  ;;  %5830 = vrcp.f32 %v6883_v42  ;;  %v1664_v54 = vpop.f32.mrf.mxu1  ;;  %vm3390_vm3 = vmor %vm3388_vm2, %vm3389_vm1  ;;  %v1339_v11 = vmax.f32 %v1119_v61, 0.0  ;;  %v3407_v2 = vand.u32 2147483647, %v6883_v42 }
 0x2a5   : > { %4911 = vst.msk [vmem:[%s6508_s13 + $0xd8] sm:$0xff] %vm4883_vm4, %v3381_v45  ;;  %v3385_v49 = vsub.f32 1.0, %v3384_v44  ;;  %v1665_v56 = vadd.f32 %v6898_v47, %v1664_v54  ;;  %v3409_v14 = vand.u32 2147483648, %v6883_v42  ;;  %vm3403_vm7 = vweird.f32 %v6883_v42 }
 0x2a6   : > { %v2208_v48 = vpop.f32.mrf.mxu2  ;;  %vm3408_vm9 = vcmp.eq.f32.partialorder %v3407_v2, 8.507059e+37 }
 0x2a7   : > { %v3386_v52 = vmul.f32 %v5827_v40, %v3385_v49  ;;  %v2209_v55 = vadd.f32 %v6714_v62, %v2208_v48  ;;  %v1911_v5 = vmax.f32 %v1665_v56, 0.0  ;;  %v3410_v27 = vor.u32 1.1754944e-38, %v3409_v14 }
 0x2a8   : > { %v1120_v57 = vpop.f32.mrf.mxu0 }
 0x2a9   : > { %v5829_v59 = vpop.eup %5828  ;;  %v3387_v60 = vadd.f32 %v5827_v40, %v3386_v52  ;;  %v5500_v63 = vmul.f32 -1.442695, %v2209_v55  ;;  %v1121_v0 = vadd.f32 %v6818_v19, %v1120_v57  ;;  %v2014_v13 = vpack.c.bf16 %v1911_v5, %v1910_v8 }
 0x2aa   : > { %v5831_v37 = vpop.eup %5830  ;;  %v6911_v4 = vadd.f32 1.0, %v5829_v59  ;;  %5393 = vmatmul.msk.bf16.gmra.mxu3 %vm751_vm0, %v5651_v50 }
 0x2ab   : > { %v3391_v6 = vsel %vm3390_vm3, %v5827_v40, %v3387_v60  ;;  %v3399_v7 = vmul.f32 %v5831_v37, %v6883_v42  ;;  %5832 = vpow2.f32 %v5500_v63  ;;  %v1340_v12 = vmax.f32 %v1121_v0, 0.0 }
 0x2ac   : > { %v3396_v9 = vsel %vm3393_vm5, %v3395_v3, %v3391_v6  ;;  %5834 = vrcp.f32 %v6911_v4  ;;  %vm3404_vm6 = vweird.f32 %v5831_v37  ;;  %2250 = vmatmul.bf16.gmra.mxu2 %v2014_v13  ;;  %v1667_v16 = vpop.f32.mrf.mxu1  ;;  %v3422_v33 = vand.u32 2147483647, %v6911_v4  ;;  %v6951_v3 = vld [vmem:[%s7836_s6] ss:$0 sm:$0xff]  ;;  %v5642_v6 = vld [vmem:[%s6315_s11 + $0x158] sm:$0xff] }
 0x2ad   : > { %4912 = vst.msk [vmem:[%s6508_s13 + $0xe0] sm:$0xff] %vm4883_vm4, %v3396_v9  ;;  %v3400_v10 = vsub.f32 1.0, %v3399_v7  ;;  %v1434_v18 = vpack.c.bf16 %v1340_v12, %v1339_v11  ;;  %vm3405_vm8 = vmor %vm3403_vm7, %vm3404_vm6  ;;  %v3424_v34 = vand.u32 2147483648, %v6911_v4  ;;  %v1668_v38 = vadd.f32 %v6898_v47, %v1667_v16 }
 0x2ae   : > { %v2211_v15 = vpop.f32.mrf.mxu2  ;;  %vm3418_vm11 = vweird.f32 %v6911_v4  ;;  %vm3423_vm13 = vcmp.eq.f32.partialorder %v3422_v33, 8.507059e+37 }
 0x2af   : > { %v3401_v20 = vmul.f32 %v5831_v37, %v3400_v10  ;;  %v2212_v17 = vadd.f32 %v6714_v62, %v2211_v15  ;;  %1706 = vmatmul.bf16.gmra.mxu1 %v1434_v18  ;;  %v3425_v48 = vor.u32 1.1754944e-38, %v3424_v34  ;;  %v1912_v55 = vmax.f32 %v1668_v38, 0.0 }
 0x2b0   : > { %v1123_v22 = vpop.f32.mrf.mxu0 }
 0x2b1   : > { %v5833_v23 = vpop.eup %5832  ;;  %v3402_v24 = vadd.f32 %v5831_v37, %v3401_v20  ;;  %v5501_v25 = vmul.f32 -1.442695, %v2212_v17  ;;  %v1124_v45 = vadd.f32 %v6818_v19, %v1123_v22 }
 0x2b2   : > { %v5835_v26 = vpop.eup %5834  ;;  %v6923_v28 = vadd.f32 1.0, %v5833_v23 }
 0x2b3   : > { %v3406_v29 = vsel %vm3405_vm8, %v5831_v37, %v3402_v24  ;;  %v3414_v30 = vmul.f32 %v5835_v26, %v6911_v4  ;;  %5836 = vpow2.f32 %v5501_v25  ;;  %5383 = vmatmul.msk.bf16.gmra.mxu0 %vm751_vm0, %v5641_v21  ;;  %vm3419_vm10 = vweird.f32 %v5835_v26 }
 0x2b4   : > { %v3411_v31 = vsel %vm3408_vm9, %v3410_v27, %v3406_v29  ;;  %5838 = vrcp.f32 %v6923_v28  ;;  %v1669_v39 = vpop.f32.mrf.mxu1  ;;  %vm3420_vm12 = vmor %vm3418_vm11, %vm3419_vm10  ;;  %v1341_v58 = vmax.f32 %v1124_v45, 0.0  ;;  %v3437_v61 = vand.u32 2147483647, %v6923_v28 }
 0x2b5   : > { %4913 = vst.msk [vmem:[%s6508_s13 + $0xe8] sm:$0xff] %vm4883_vm4, %v3411_v31  ;;  %v3415_v32 = vsub.f32 1.0, %v3414_v30  ;;  %v1670_v41 = vadd.f32 %v6898_v47, %v1669_v39  ;;  %v3439_v63 = vand.u32 2147483648, %v6923_v28  ;;  %vm3433_vm15 = vweird.f32 %v6923_v28 }
 0x2b6   : > { %v2213_v35 = vpop.f32.mrf.mxu2  ;;  %vm3438_vm2 = vcmp.eq.f32.partialorder %v3437_v61, 8.507059e+37 }
 0x2b7   : > { %v3416_v36 = vmul.f32 %v5835_v26, %v3415_v32  ;;  %v2214_v40 = vadd.f32 %v6714_v62, %v2213_v35  ;;  %v1913_v62 = vmax.f32 %v1670_v41, 0.0  ;;  %v3440_v12 = vor.u32 1.1754944e-38, %v3439_v63  ;;  %v5652_v32 = vld [vmem:[%s6315_s11 + $0x1a8] sm:$0xff] }
 0x2b8   : > { %v1125_v42 = vpop.f32.mrf.mxu0 }
 0x2b9   : > { %v5837_v43 = vpop.eup %5836  ;;  %v3417_v44 = vadd.f32 %v5835_v26, %v3416_v36  ;;  %v5502_v46 = vmul.f32 -1.442695, %v2214_v40  ;;  %v1126_v49 = vadd.f32 %v6818_v19, %v1125_v42  ;;  %v2015_v60 = vpack.c.bf16 %v1913_v62, %v1912_v55 }
 0x2ba   : > { %v5839_v51 = vpop.eup %5838  ;;  %v6939_v52 = vadd.f32 1.0, %v5837_v43  ;;  %5394 = vmatmul.msk.bf16.gmra.mxu3 %vm751_vm0, %v5652_v32 }
 0x2bb   : > { %v3421_v53 = vsel %vm3420_vm12, %v5835_v26, %v3417_v44  ;;  %v3429_v54 = vmul.f32 %v5839_v51, %v6923_v28  ;;  %5840 = vpow2.f32 %v5502_v46  ;;  %v1342_v59 = vmax.f32 %v1126_v49, 0.0 }
 0x2bc   : > { %v3426_v56 = vsel %vm3423_vm13, %v3425_v48, %v3421_v53  ;;  %5842 = vrcp.f32 %v6939_v52  ;;  %vm3434_vm14 = vweird.f32 %v5839_v51  ;;  %2255 = vmatmul.bf16.gmra.mxu2 %v2015_v60  ;;  %v1672_v37 = vpop.f32.mrf.mxu1  ;;  %v3452_v16 = vand.u32 2147483647, %v6939_v52  ;;  %v5643_v53 = vld [vmem:[%s6315_s11 + $0x160] sm:$0xff] }
 0x2bd   : > { %4914 = vst.msk [vmem:[%s6508_s13 + $0xf0] sm:$0xff] %vm4883_vm4, %v3426_v56  ;;  %v3430_v57 = vsub.f32 1.0, %v3429_v54  ;;  %v1435_v5 = vpack.c.bf16 %v1342_v59, %v1341_v58  ;;  %vm3435_vm1 = vmor %vm3433_vm15, %vm3434_vm14  ;;  %v3454_v17 = vand.u32 2147483648, %v6939_v52  ;;  %v1673_v22 = vadd.f32 %v6898_v47, %v1672_v37 }
 0x2be   : > { %v2216_v0 = vpop.f32.mrf.mxu2  ;;  %vm3448_vm5 = vweird.f32 %v6939_v52  ;;  %vm3453_vm7 = vcmp.eq.f32.partialorder %v3452_v16, 8.507059e+37 }
 0x2bf   : > { %v3431_v1 = vmul.f32 %v5839_v51, %v3430_v57  ;;  %v2217_v4 = vadd.f32 %v6951_v3, %v2216_v0  ;;  %1711 = vmatmul.bf16.gmra.mxu1 %v1435_v5  ;;  %v3455_v34 = vor.u32 1.1754944e-38, %v3454_v17  ;;  %v1914_v40 = vmax.f32 %v1673_v22, 0.0 }
 0x2c0   : > { %v1128_v7 = vpop.f32.mrf.mxu0 }
 0x2c1   : > { %v5841_v8 = vpop.eup %5840  ;;  %v3432_v9 = vadd.f32 %v5839_v51, %v3431_v1  ;;  %v5503_v10 = vmul.f32 -1.442695, %v2217_v4  ;;  %v1129_v29 = vadd.f32 %v6818_v19, %v1128_v7 }
 0x2c2   : > { %v5843_v11 = vpop.eup %5842  ;;  %v6956_v13 = vadd.f32 1.0, %v5841_v8 }
 0x2c3   : > { %v3436_v2 = vsel %vm3435_vm1, %v5839_v51, %v3432_v9  ;;  %v3444_v14 = vmul.f32 %v5843_v11, %v6939_v52  ;;  %5844 = vpow2.f32 %v5503_v10  ;;  %5384 = vmatmul.msk.bf16.gmra.mxu0 %vm751_vm0, %v5642_v6  ;;  %vm3449_vm3 = vweird.f32 %v5843_v11 }
 0x2c4   : > { %v3441_v15 = vsel %vm3438_vm2, %v3440_v12, %v3436_v2  ;;  %5846 = vrcp.f32 %v6956_v13  ;;  %v1674_v23 = vpop.f32.mrf.mxu1  ;;  %vm3450_vm6 = vmor %vm3448_vm5, %vm3449_vm3  ;;  %v1343_v43 = vmax.f32 %v1129_v29, 0.0  ;;  %v3467_v46 = vand.u32 2147483647, %v6956_v13 }
 0x2c5   : > { %4915 = vst.msk [vmem:[%s6508_s13 + $0xf8] sm:$0xff] %vm4883_vm4, %v3441_v15  ;;  %v3445_v20 = vsub.f32 1.0, %v3444_v14  ;;  %v1675_v25 = vadd.f32 %v6898_v47, %v1674_v23  ;;  %v3469_v49 = vand.u32 2147483648, %v6956_v13  ;;  %vm3463_vm9 = vweird.f32 %v6956_v13 }
 0x2c6   : > { %v2218_v18 = vpop.f32.mrf.mxu2  ;;  %vm3468_vm11 = vcmp.eq.f32.partialorder %v3467_v46, 8.507059e+37 }
 0x2c7   : > { %v3446_v21 = vmul.f32 %v5843_v11, %v3445_v20  ;;  %v2219_v24 = vadd.f32 %v6951_v3, %v2218_v18  ;;  %v1915_v36 = vmax.f32 %v1675_v25, 0.0  ;;  %v3470_v59 = vor.u32 1.1754944e-38, %v3469_v49 }
 0x2c8   : > { %v1130_v26 = vpop.f32.mrf.mxu0 }
 0x2c9   : > { %v5845_v27 = vpop.eup %5844  ;;  %v3447_v28 = vadd.f32 %v5843_v11, %v3446_v21  ;;  %v5504_v30 = vmul.f32 -1.442695, %v2219_v24  ;;  %v1131_v31 = vadd.f32 %v6818_v19, %v1130_v26  ;;  %v2016_v45 = vpack.c.bf16 %v1915_v36, %v1914_v40  ;;  %v5653_v21 = vld [vmem:[%s6315_s11 + $0x1b0] sm:$0xff] }
 0x2ca   : > { %v5847_v33 = vpop.eup %5846  ;;  %v2869_v35 = vadd.f32 1.0, %v5845_v27  ;;  %5395 = vmatmul.msk.bf16.gmra.mxu3 %vm751_vm0, %v5653_v21 }
 0x2cb   : > { %v3451_v38 = vsel %vm3450_vm6, %v5843_v11, %v3447_v28  ;;  %v3459_v39 = vmul.f32 %v5847_v33, %v6956_v13  ;;  %5848 = vpow2.f32 %v5504_v30  ;;  %v1344_v44 = vmax.f32 %v1131_v31, 0.0 }
 0x2cc   : > { %v3456_v41 = vsel %vm3453_vm7, %v3455_v34, %v3451_v38  ;;  %5850 = vrcp.f32 %v2869_v35  ;;  %vm3464_vm8 = vweird.f32 %v5847_v33  ;;  %2260 = vmatmul.bf16.gmra.mxu2 %v2016_v45  ;;  %v1677_v48 = vpop.f32.mrf.mxu1  ;;  %v3482_v37 = vand.u32 2147483647, %v2869_v35 }
 0x2cd   : > { %4916 = vst.msk [vmem:[%s6508_s13 + $0x100] sm:$0xff] %vm4883_vm4, %v3456_v41  ;;  %v3460_v42 = vsub.f32 1.0, %v3459_v39  ;;  %v1436_v62 = vpack.c.bf16 %v1344_v44, %v1343_v43  ;;  %vm3465_vm10 = vmor %vm3463_vm9, %vm3464_vm8  ;;  %v3484_v4 = vand.u32 2147483648, %v2869_v35  ;;  %v1678_v7 = vadd.f32 %v6898_v47, %v1677_v48 }
 0x2ce   : > { %v2221_v50 = vpop.f32.mrf.mxu2  ;;  %vm3478_vm13 = vweird.f32 %v2869_v35  ;;  %vm3483_vm15 = vcmp.eq.f32.partialorder %v3482_v37, 8.507059e+37  ;;  %v5654_v37 = vld [vmem:[%s6315_s11 + $0x1b8] sm:$0xff] }
 0x2cf   : > { %v3461_v51 = vmul.f32 %v5847_v33, %v3460_v42  ;;  %v2222_v52 = vadd.f32 %v6951_v3, %v2221_v50  ;;  %1716 = vmatmul.bf16.gmra.mxu1 %v1436_v62  ;;  %v3485_v16 = vor.u32 1.1754944e-38, %v3484_v4  ;;  %v1916_v24 = vmax.f32 %v1678_v7, 0.0 }
 0x2d0   : > { %v1133_v54 = vpop.f32.mrf.mxu0 }
 0x2d1   : > { %v5849_v55 = vpop.eup %5848  ;;  %v3462_v56 = vadd.f32 %v5847_v33, %v3461_v51  ;;  %v5505_v57 = vmul.f32 -1.442695, %v2222_v52  ;;  %v1134_v2 = vadd.f32 %v6818_v19, %v1133_v54 }
 0x2d2   : > { %v5851_v58 = vpop.eup %5850  ;;  %v6981_v60 = vadd.f32 1.0, %v5849_v55 }
 0x2d3   : > { %v3466_v61 = vsel %vm3465_vm10, %v5847_v33, %v3462_v56  ;;  %v3474_v63 = vmul.f32 %v5851_v58, %v2869_v35  ;;  %5852 = vpow2.f32 %v5505_v57  ;;  %5385 = vmatmul.msk.bf16.gmra.mxu0 %vm751_vm0, %v5643_v53  ;;  %vm3479_vm12 = vweird.f32 %v5851_v58  ;;  %v5644_v35 = vld [vmem:[%s6315_s11 + $0x168] sm:$0xff] }
 0x2d4   : > { %v3471_v0 = vsel %vm3468_vm11, %v3470_v59, %v3466_v61  ;;  %5854 = vrcp.f32 %v6981_v60  ;;  %v1679_v8 = vpop.f32.mrf.mxu1  ;;  %vm3480_vm14 = vmor %vm3478_vm13, %vm3479_vm12  ;;  %v1345_v27 = vmax.f32 %v1134_v2, 0.0  ;;  %v3499_v30 = vand.u32 2147483648, %v6981_v60 }
 0x2d5   : > { %4917 = vst.msk [vmem:[%s6508_s13 + $0x108] sm:$0xff] %vm4883_vm4, %v3471_v0  ;;  %v3475_v1 = vsub.f32 1.0, %v3474_v63  ;;  %v1680_v10 = vadd.f32 %v6898_v47, %v1679_v8  ;;  %v3497_v32 = vand.u32 2147483647, %v6981_v60  ;;  %vm3493_vm2 = vweird.f32 %v6981_v60 }
 0x2d6   : > { %v2223_v5 = vpop.f32.mrf.mxu2  ;;  %v3500_v41 = vor.u32 1.1754944e-38, %v3499_v30 }
 0x2d7   : > { %v3476_v6 = vmul.f32 %v5851_v58, %v3475_v1  ;;  %v2224_v9 = vadd.f32 %v6951_v3, %v2223_v5  ;;  %v1917_v18 = vmax.f32 %v1680_v10, 0.0  ;;  %vm3498_vm5 = vcmp.eq.f32.partialorder %v3497_v32, 8.507059e+37 }
 0x2d8   : > { %v1135_v11 = vpop.f32.mrf.mxu0 }
 0x2d9   : > { %v5853_v12 = vpop.eup %5852  ;;  %v3477_v13 = vadd.f32 %v5851_v58, %v3476_v6  ;;  %v5506_v14 = vmul.f32 -1.442695, %v2224_v9  ;;  %v1136_v15 = vadd.f32 %v6818_v19, %v1135_v11  ;;  %v2017_v29 = vpack.c.bf16 %v1917_v18, %v1916_v24  ;;  %v5645_v18 = vld [vmem:[%s6315_s11 + $0x170] sm:$0xff] }
 0x2da   : > { %v5855_v20 = vpop.eup %5854  ;;  %v6992_v17 = vadd.f32 1.0, %v5853_v12  ;;  %5396 = vmatmul.msk.bf16.gmra.mxu3 %vm751_vm0, %v5654_v37 }
 0x2db   : > { %v3481_v22 = vsel %vm3480_vm14, %v5851_v58, %v3477_v13  ;;  %v3489_v23 = vmul.f32 %v5855_v20, %v6981_v60  ;;  %5856 = vpow2.f32 %v5506_v14  ;;  %v1346_v28 = vmax.f32 %v1136_v15, 0.0 }
 0x2dc   : > { %v3486_v25 = vsel %vm3483_vm15, %v3485_v16, %v3481_v22  ;;  %5858 = vrcp.f32 %v6992_v17  ;;  %vm3494_vm1 = vweird.f32 %v5855_v20  ;;  %2265 = vmatmul.bf16.gmra.mxu2 %v2017_v29  ;;  %v1682_v33 = vpop.f32.mrf.mxu1  ;;  %v3514_v48 = vand.u32 2147483648, %v6992_v17 }
 0x2dd   : > { %4918 = vst.msk [vmem:[%s6508_s13 + $0x110] sm:$0xff] %vm4883_vm4, %v3486_v25  ;;  %v3490_v26 = vsub.f32 1.0, %v3489_v23  ;;  %v1437_v34 = vpack.c.bf16 %v1346_v28, %v1345_v27  ;;  %vm3495_vm3 = vmor %vm3493_vm2, %vm3494_vm1  ;;  %v1683_v52 = vadd.f32 %v6898_v47, %v1682_v33  ;;  %v3512_v53 = vand.u32 2147483647, %v6992_v17 }
 0x2de   : > { %v2226_v43 = vpop.f32.mrf.mxu2  ;;  %vm3508_vm7 = vweird.f32 %v6992_v17  ;;  %v3515_v61 = vor.u32 1.1754944e-38, %v3514_v48 }
 0x2df   : > { %v3491_v31 = vmul.f32 %v5855_v20, %v3490_v26  ;;  %1721 = vmatmul.bf16.gmra.mxu1 %v1437_v34  ;;  %v2227_v46 = vadd.f32 %v6951_v3, %v2226_v43  ;;  %v1918_v63 = vmax.f32 %v1683_v52, 0.0  ;;  %vm3513_vm9 = vcmp.eq.f32.partialorder %v3512_v53, 8.507059e+37 }
 0x2e0   : > { %v1138_v36 = vpop.f32.mrf.mxu0 }
 0x2e1   : > { %v5857_v38 = vpop.eup %5856  ;;  %v3492_v39 = vadd.f32 %v5855_v20, %v3491_v31  ;;  %v5507_v51 = vmul.f32 -1.442695, %v2227_v46  ;;  %v1139_v55 = vadd.f32 %v6818_v19, %v1138_v36 }
 0x2e2   : > { %v5859_v40 = vpop.eup %5858  ;;  %v7004_v42 = vadd.f32 1.0, %v5857_v38 }
 0x2e3   : > { %v3496_v44 = vsel %vm3495_vm3, %v5855_v20, %v3492_v39  ;;  %v3504_v45 = vmul.f32 %v5859_v40, %v6992_v17  ;;  %5386 = vmatmul.msk.bf16.gmra.mxu0 %vm751_vm0, %v5644_v35  ;;  %vm3509_vm6 = vweird.f32 %v5859_v40  ;;  %v1347_v8 = vmax.f32 %v1139_v55, 0.0 }
 0x2e4   : > { %v3501_v49 = vsel %vm3498_vm5, %v3500_v41, %v3496_v44  ;;  %5860 = vrcp.f32 %v7004_v42  ;;  %v1684_v54 = vpop.f32.mrf.mxu1  ;;  %vm3510_vm8 = vmor %vm3508_vm7, %vm3509_vm6  ;;  %v3529_v2 = vand.u32 2147483648, %v7004_v42  ;;  %v3527_v16 = vand.u32 2147483647, %v7004_v42 }
 0x2e5   : > { %4919 = vst.msk [vmem:[%s6508_s13 + $0x118] sm:$0xff] %vm4883_vm4, %v3501_v49  ;;  %v3505_v50 = vsub.f32 1.0, %v3504_v45  ;;  %5862 = vpow2.f32 %v5507_v51  ;;  %v1685_v56 = vadd.f32 %v6898_v47, %v1684_v54  ;;  %vm3523_vm11 = vweird.f32 %v7004_v42  ;;  %v5655_v45 = vld [vmem:[%s6315_s11 + $0x1c0] sm:$0xff] }
 0x2e6   : > { %v2228_v1 = vpop.f32.mrf.mxu2  ;;  %v3530_v23 = vor.u32 1.1754944e-38, %v3529_v2  ;;  %vm3528_vm13 = vcmp.eq.f32.partialorder %v3527_v16, 8.507059e+37 }
 0x2e7   : > { %v3506_v62 = vmul.f32 %v5859_v40, %v3505_v50  ;;  %v1919_v0 = vmax.f32 %v1685_v56, 0.0  ;;  %v2229_v6 = vadd.f32 %v6951_v3, %v2228_v1 }
 0x2e8   : > { %v1140_v57 = vpop.f32.mrf.mxu0 }
 0x2e9   : > { %v3507_v58 = vadd.f32 %v5859_v40, %v3506_v62  ;;  %v1141_v59 = vadd.f32 %v6818_v19, %v1140_v57  ;;  %v2018_v10 = vpack.c.bf16 %v1919_v0, %v1918_v63  ;;  %v5508_v13 = vmul.f32 -1.442695, %v2229_v6  ;;  %v5646_v63 = vld [vmem:[%s6315_s11 + $0x178] sm:$0xff] }
 0x2ea   : > { %v5861_v60 = vpop.eup %5860  ;;  %5397 = vmatmul.msk.bf16.gmra.mxu3 %vm751_vm0, %v5655_v45 }
 0x2eb   : > { %v3511_v4 = vsel %vm3510_vm8, %v5859_v40, %v3507_v58  ;;  %v3519_v5 = vmul.f32 %v5861_v60, %v7004_v42  ;;  %v1348_v9 = vmax.f32 %v1141_v59, 0.0  ;;  %v5863_v11 = vpop.eup %5862  ;;  %vm3524_vm10 = vweird.f32 %v5861_v60 }
 0x2ec   : > { %v3516_v7 = vsel %vm3513_vm9, %v3515_v61, %v3511_v4  ;;  %v2873_v14 = vadd.f32 1.0, %v5863_v11  ;;  %5864 = vpow2.f32 %v5508_v13  ;;  %2270 = vmatmul.bf16.gmra.mxu2 %v2018_v10  ;;  %v1687_v17 = vpop.f32.mrf.mxu1  ;;  %vm3525_vm12 = vmor %vm3523_vm11, %vm3524_vm10 }
 0x2ed   : > { %4920 = vst.msk [vmem:[%s6508_s13 + $0x120] sm:$0xff] %vm4883_vm4, %v3516_v7  ;;  %v3520_v12 = vsub.f32 1.0, %v3519_v5  ;;  %v1438_v15 = vpack.c.bf16 %v1348_v9, %v1347_v8  ;;  %v1688_v32 = vadd.f32 %v6898_v47, %v1687_v17 }
 0x2ee   : > { %5866 = vrcp.f32 %v2873_v14  ;;  %v2231_v24 = vpop.f32.mrf.mxu2  ;;  %v3542_v41 = vand.u32 2147483647, %v2873_v14  ;;  %v3544_v42 = vand.u32 2147483648, %v2873_v14  ;;  %vm3538_vm15 = vweird.f32 %v2873_v14 }
 0x2ef   : > { %v3521_v20 = vmul.f32 %v5861_v60, %v3520_v12  ;;  %1726 = vmatmul.bf16.gmra.mxu1 %v1438_v15  ;;  %v2232_v26 = vadd.f32 %v6951_v3, %v2231_v24  ;;  %v1920_v43 = vmax.f32 %v1688_v32, 0.0  ;;  %v7068_v24 = vld [vmem:[%s7832_s2] ss:$0 sm:$0xff] }
 0x2f0   : > { %v1143_v21 = vpop.f32.mrf.mxu0  ;;  %v3545_v56 = vor.u32 1.1754944e-38, %v3544_v42  ;;  %vm3543_vm2 = vcmp.eq.f32.partialorder %v3542_v41, 8.507059e+37 }
 0x2f1   : > { %v3522_v22 = vadd.f32 %v5861_v60, %v3521_v20  ;;  %v5509_v29 = vmul.f32 -1.442695, %v2232_v26  ;;  %v1144_v35 = vadd.f32 %v6818_v19, %v1143_v21 }
 0x2f2   : > { %v5865_v28 = vpop.eup %5864 }
 0x2f3   : > { %v3526_v25 = vsel %vm3525_vm12, %v5861_v60, %v3522_v22  ;;  %5387 = vmatmul.msk.bf16.gmra.mxu0 %vm751_vm0, %v5645_v18  ;;  %v7033_v31 = vadd.f32 1.0, %v5865_v28  ;;  %5868 = vpow2.f32 %v5509_v29  ;;  %v1349_v48 = vmax.f32 %v1144_v35, 0.0 }
 0x2f4   : > { %v3531_v27 = vsel %vm3528_vm13, %v3530_v23, %v3526_v25  ;;  %v5867_v30 = vpop.eup %5866  ;;  %v1689_v34 = vpop.f32.mrf.mxu1 }
 0x2f5   : > { %4921 = vst.msk [vmem:[%s6508_s13 + $0x128] sm:$0xff] %vm4883_vm4, %v3531_v27  ;;  %v3534_v33 = vmul.f32 %v5867_v30, %v2873_v14  ;;  %5870 = vrcp.f32 %v7033_v31  ;;  %v1690_v39 = vadd.f32 %v6898_v47, %v1689_v34  ;;  %vm3539_vm14 = vweird.f32 %v5867_v30 }
 0x2f6   : > { %v2233_v44 = vpop.f32.mrf.mxu2  ;;  %vm3540_vm1 = vmor %vm3538_vm15, %vm3539_vm14  ;;  %v3559_v4 = vand.u32 2147483648, %v7033_v31  ;;  %v3557_v7 = vand.u32 2147483647, %v7033_v31  ;;  %vm3553_vm5 = vweird.f32 %v7033_v31 }
 0x2f7   : > { %v3535_v38 = vsub.f32 1.0, %v3534_v33  ;;  %v1921_v49 = vmax.f32 %v1690_v39, 0.0  ;;  %v2234_v50 = vadd.f32 %v6951_v3, %v2233_v44 }
 0x2f8   : > { %v1145_v36 = vpop.f32.mrf.mxu0  ;;  %v3560_v13 = vor.u32 1.1754944e-38, %v3559_v4  ;;  %vm3558_vm7 = vcmp.eq.f32.partialorder %v3557_v7, 8.507059e+37 }
 0x2f9   : > { %v1146_v40 = vadd.f32 %v6818_v19, %v1145_v36  ;;  %v3536_v46 = vmul.f32 %v5867_v30, %v3535_v38  ;;  %v5869_v52 = vpop.eup %5868  ;;  %v5510_v53 = vmul.f32 -1.442695, %v2234_v50  ;;  %v2019_v54 = vpack.c.bf16 %v1921_v49, %v1920_v43  ;;  %v5647_v49 = vld [vmem:[%s6315_s11 + $0x180] sm:$0xff]  ;;  %v1198_v50 = vpop.f32.mrf.mxu3 }
 0x2fa   : > { %v7044_v57 = vadd.f32 1.0, %v5869_v52 }
 0x2fb   : > { %v1350_v51 = vmax.f32 %v1146_v40, 0.0  ;;  %v3537_v62 = vadd.f32 %v5867_v30, %v3536_v46  ;;  %v5871_v55 = vpop.eup %5870  ;;  %5872 = vpow2.f32 %v5510_v53 }
 0x2fc   : > { %v3549_v60 = vmul.f32 %v5871_v55, %v7033_v31  ;;  %2275 = vmatmul.bf16.gmra.mxu2 %v2019_v54  ;;  %v1692_v61 = vpop.f32.mrf.mxu1  ;;  %5874 = vrcp.f32 %v7044_v57  ;;  %vm3554_vm3 = vweird.f32 %v5871_v55  ;;  %v3572_v26 = vand.u32 2147483647, %v7044_v57 }
 0x2fd   : > { %v1439_v58 = vpack.c.bf16 %v1350_v51, %v1349_v48  ;;  %v3541_v59 = vsel %vm3540_vm1, %v5867_v30, %v3537_v62  ;;  %vm3555_vm6 = vmor %vm3553_vm5, %vm3554_vm3  ;;  %v1693_v14 = vadd.f32 %v6898_v47, %v1692_v61  ;;  %v3574_v27 = vand.u32 2147483648, %v7044_v57 }
 0x2fe   : > { %v3546_v0 = vsel %vm3543_vm2, %v3545_v56, %v3541_v59  ;;  %v3550_v37 = vsub.f32 1.0, %v3549_v60  ;;  %vm3568_vm9 = vweird.f32 %v7044_v57  ;;  %vm3573_vm11 = vcmp.eq.f32.partialorder %v3572_v26, 8.507059e+37 }
 0x2ff   : > { %4922 = vst.msk [vmem:[%s6508_s13 + $0x130] sm:$0xff] %vm4883_vm4, %v3546_v0  ;;  %v2236_v5 = vpop.f32.mrf.mxu2  ;;  %1731 = vmatmul.bf16.gmra.mxu1 %v1439_v58  ;;  %v1922_v28 = vmax.f32 %v1693_v14, 0.0  ;;  %v3575_v41 = vor.u32 1.1754944e-38, %v3574_v27 }
 0x300   : > { %v1148_v1 = vpop.f32.mrf.mxu0  ;;  %v3551_v6 = vmul.f32 %v5871_v55, %v3550_v37  ;;  %v2237_v8 = vadd.f32 %v6951_v3, %v2236_v5 }
 0x301   : > { %v5873_v9 = vpop.eup %5872  ;;  %v1149_v18 = vadd.f32 %v6818_v19, %v1148_v1  ;;  %v5656_v19 = vld [vmem:[%s6315_s11 + $0x1c8] sm:$0xff]  ;;  %v1200_v5 = vpop.f32.mrf.mxu3 }
 0x302   : > { %v3552_v10 = vadd.f32 %v5871_v55, %v3551_v6  ;;  %v5511_v11 = vmul.f32 -1.442695, %v2237_v8  ;;  %v5875_v12 = vpop.eup %5874  ;;  %v7056_v2 = vadd.f32 1.0, %v5873_v9  ;;  %5398 = vmatmul.msk.bf16.gmra.mxu3 %vm751_vm0, %v5656_v19 }
 0x303   : > { %5388 = vmatmul.msk.bf16.gmra.mxu0 %vm751_vm0, %v5646_v63  ;;  %v3564_v20 = vmul.f32 %v5875_v12, %v7044_v57  ;;  %vm3569_vm8 = vweird.f32 %v5875_v12  ;;  %v1351_v33 = vmax.f32 %v1149_v18, 0.0 }
 0x304   : > { %v3556_v15 = vsel %vm3555_vm6, %v5871_v55, %v3552_v10  ;;  %5876 = vpow2.f32 %v5511_v11  ;;  %v1694_v16 = vpop.f32.mrf.mxu1  ;;  %vm3570_vm10 = vmor %vm3568_vm9, %vm3569_vm8  ;;  %v3589_v62 = vand.u32 2147483648, %v7056_v2  ;;  %v3587_v55 = vand.u32 2147483647, %v7056_v2 }
 0x305   : > { %v3561_v17 = vsel %vm3558_vm7, %v3560_v13, %v3556_v15  ;;  %5878 = vrcp.f32 %v7056_v2  ;;  %v3565_v22 = vsub.f32 1.0, %v3564_v20  ;;  %v1695_v23 = vadd.f32 %v6898_v47, %v1694_v16  ;;  %v5657_v16 = vld [vmem:[%s6315_s11 + $0x1d0] sm:$0xff] }
 0x306   : > { %4923 = vst.msk [vmem:[%s6508_s13 + $0x138] sm:$0xff] %vm4883_vm4, %v3561_v17  ;;  %vm3583_vm13 = vweird.f32 %v7056_v2  ;;  %v3590_v61 = vor.u32 1.1754944e-38, %v3589_v62  ;;  %vm3588_vm15 = vcmp.eq.f32.partialorder %v3587_v55, 8.507059e+37  ;;  %v1199_v15 = vadd.f32 %v7068_v24, %v1198_v50 }
 0x307   : > { %v2238_v29 = vpop.f32.mrf.mxu2  ;;  %v3566_v30 = vmul.f32 %v5875_v12, %v3565_v22  ;;  %v1923_v31 = vmax.f32 %v1695_v23, 0.0  ;;  %v1201_v20 = vadd.f32 %v7068_v24, %v1200_v5 }
 0x308   : > { %v1150_v21 = vpop.f32.mrf.mxu0  ;;  %v2239_v32 = vadd.f32 %v6951_v3, %v2238_v29 }
 0x309   : > { %v1151_v25 = vadd.f32 %v7068_v24, %v1150_v21  ;;  %v3567_v36 = vadd.f32 %v5875_v12, %v3566_v30  ;;  %v2020_v39 = vpack.c.bf16 %v1923_v31, %v1922_v28  ;;  %v1372_v26 = vmax.f32 %v1201_v20, 0.0 }
 0x30a   : > { %v5877_v35 = vpop.eup %5876  ;;  %v5512_v38 = vmul.f32 -1.442695, %v2239_v32 }
 0x30b   : > { %v1352_v34 = vmax.f32 %v1151_v25, 0.0  ;;  %v5879_v40 = vpop.eup %5878  ;;  %v7077_v42 = vadd.f32 1.0, %v5877_v35  ;;  %v3571_v44 = vsel %vm3570_vm10, %v5875_v12, %v3567_v36  ;;  %v1371_v25 = vmax.f32 %v1199_v15, 0.0 }
 0x30c   : > { %v3579_v45 = vmul.f32 %v5879_v40, %v7056_v2  ;;  %5880 = vpow2.f32 %v5512_v38  ;;  %2280 = vmatmul.bf16.gmra.mxu2 %v2020_v39  ;;  %v1697_v46 = vpop.f32.mrf.mxu1  ;;  %v3576_v51 = vsel %vm3573_vm11, %v3575_v41, %v3571_v44  ;;  %vm3584_vm12 = vweird.f32 %v5879_v40 }
 0x30d   : > { %v1440_v43 = vpack.c.bf16 %v1352_v34, %v1351_v33  ;;  %5882 = vrcp.f32 %v7077_v42  ;;  %4924 = vst.msk [vmem:[%s6508_s13 + $0x140] sm:$0xff] %vm4883_vm4, %v3576_v51  ;;  %vm3585_vm14 = vmor %vm3583_vm13, %vm3584_vm12  ;;  %v1698_v0 = vadd.f32 %v6898_v47, %v1697_v46  ;;  %v3602_v10 = vand.u32 2147483647, %v7077_v42  ;;  %v1203_v39 = vpop.f32.mrf.mxu3 }
 0x30e   : > { %v3580_v52 = vsub.f32 1.0, %v3579_v45  ;;  %v3604_v13 = vand.u32 2147483648, %v7077_v42  ;;  %vm3598_vm2 = vweird.f32 %v7077_v42  ;;  %v7109_v34 = vpack.c.bf16 %v1372_v26, %v1371_v25 }
 0x30f   : > { %v2241_v53 = vpop.f32.mrf.mxu2  ;;  %1736 = vmatmul.bf16.gmra.mxu1 %v1440_v43  ;;  %v1924_v2 = vmax.f32 %v1698_v0, 0.0  ;;  %vm3603_vm5 = vcmp.eq.f32.partialorder %v3602_v10, 8.507059e+37 }
 0x310   : > { %v1153_v48 = vpop.f32.mrf.mxu0  ;;  %v3581_v54 = vmul.f32 %v5879_v40, %v3580_v52  ;;  %v2242_v56 = vadd.f32 %v6951_v3, %v2241_v53  ;;  %v3605_v31 = vor.u32 1.1754944e-38, %v3604_v13 }
 0x311   : > { %v1154_v7 = vadd.f32 %v7068_v24, %v1153_v48 }
 0x312   : > { %v5881_v57 = vpop.eup %5880  ;;  %v3582_v58 = vadd.f32 %v5879_v40, %v3581_v54  ;;  %v5513_v59 = vmul.f32 -1.442695, %v2242_v56  ;;  %5399 = vmatmul.msk.bf16.gmra.mxu3 %vm751_vm0, %v5657_v16 }
 0x313   : > { %5389 = vmatmul.msk.bf16.gmra.mxu0 %vm751_vm0, %v5647_v49  ;;  %v5883_v60 = vpop.eup %5882  ;;  %v7089_v63 = vadd.f32 1.0, %v5881_v57  ;;  %v1353_v22 = vmax.f32 %v1154_v7, 0.0  ;;  %v1204_v7 = vadd.f32 %v7068_v24, %v1203_v39 }
 0x314   : > { %v3586_v1 = vsel %vm3585_vm14, %v5879_v40, %v3582_v58  ;;  %v3594_v37 = vmul.f32 %v5883_v60, %v7077_v42  ;;  %5884 = vpow2.f32 %v5513_v59  ;;  %v1699_v4 = vpop.f32.mrf.mxu1  ;;  %vm3599_vm1 = vweird.f32 %v5883_v60 }
 0x315   : > { %v3591_v6 = vsel %vm3588_vm15, %v3590_v61, %v3586_v1  ;;  %5886 = vrcp.f32 %v7089_v63  ;;  %v1700_v11 = vadd.f32 %v6898_v47, %v1699_v4  ;;  %vm3600_vm3 = vmor %vm3598_vm2, %vm3599_vm1  ;;  %v3619_v43 = vand.u32 2147483648, %v7089_v63  ;;  %v1205_v58 = vpop.f32.mrf.mxu3 }
 0x316   : > { %4925 = vst.msk [vmem:[%s6508_s13 + $0x148] sm:$0xff] %vm4883_vm4, %v3591_v6  ;;  %v3595_v9 = vsub.f32 1.0, %v3594_v37  ;;  %v3617_v46 = vand.u32 2147483647, %v7089_v63  ;;  %vm3613_vm7 = vweird.f32 %v7089_v63 }
 0x317   : > { %v2243_v14 = vpop.f32.mrf.mxu2  ;;  %v1925_v18 = vmax.f32 %v1700_v11, 0.0  ;;  %v3620_v62 = vor.u32 1.1754944e-38, %v3619_v43 }
 0x318   : > { %v1155_v8 = vpop.f32.mrf.mxu0  ;;  %v3596_v17 = vmul.f32 %v5883_v60, %v3595_v9  ;;  %v2244_v21 = vadd.f32 %v6951_v3, %v2243_v14  ;;  %vm3618_vm9 = vcmp.eq.f32.partialorder %v3617_v46, 8.507059e+37  ;;  %v5658_v9 = vld [vmem:[%s6315_s11 + $0x1d8] sm:$0xff]  ;;  %v1373_v14 = vmax.f32 %v1204_v7, 0.0 }
 0x319   : > { %v1156_v12 = vadd.f32 %v7068_v24, %v1155_v8  ;;  %v2021_v19 = vpack.c.bf16 %v1925_v18, %v1924_v2  ;;  %v1206_v8 = vadd.f32 %v7068_v24, %v1205_v58 }
 0x31a   : > { %v5885_v27 = vpop.eup %5884  ;;  %v3597_v28 = vadd.f32 %v5883_v60, %v3596_v17  ;;  %v5514_v29 = vmul.f32 -1.442695, %v2244_v21 }
 0x31b   : > { %v1354_v23 = vmax.f32 %v1156_v12, 0.0  ;;  %v5887_v30 = vpop.eup %5886  ;;  %v7107_v32 = vadd.f32 1.0, %v5885_v27  ;;  %v1374_v15 = vmax.f32 %v1206_v8, 0.0 }
 0x31c   : > { %v3601_v35 = vsel %vm3600_vm3, %v5883_v60, %v3597_v28  ;;  %v3609_v36 = vmul.f32 %v5887_v30, %v7089_v63  ;;  %5888 = vpow2.f32 %v5514_v29  ;;  %2285 = vmatmul.bf16.gmra.mxu2 %v2021_v19  ;;  %v1702_v38 = vpop.f32.mrf.mxu1  ;;  %vm3614_vm6 = vweird.f32 %v5887_v30 }
 0x31d   : > { %v1441_v33 = vpack.c.bf16 %v1354_v23, %v1353_v22  ;;  %v3606_v40 = vsel %vm3603_vm5, %v3605_v31, %v3601_v35  ;;  %5890 = vrcp.f32 %v7107_v32  ;;  %vm3615_vm8 = vmor %vm3613_vm7, %vm3614_vm6  ;;  %v1703_v54 = vadd.f32 %v6898_v47, %v1702_v38  ;;  %v7131_v47 = vld [vmem:[%s7834_s4] ss:$0 sm:$0xff]  ;;  %v1208_v19 = vpop.f32.mrf.mxu3 }
 0x31e   : > { %4926 = vst.msk [vmem:[%s6508_s13 + $0x150] sm:$0xff] %vm4883_vm4, %v3606_v40  ;;  %v3610_v42 = vsub.f32 1.0, %v3609_v36  ;;  %v3632_v0 = vand.u32 2147483647, %v7107_v32  ;;  %v3634_v4 = vand.u32 2147483648, %v7107_v32  ;;  %vm3628_vm11 = vweird.f32 %v7107_v32 }
 0x31f   : > { %v2246_v44 = vpop.f32.mrf.mxu2  ;;  %1741 = vmatmul.bf16.gmra.mxu1 %v1441_v33  ;;  %v1926_v5 = vmax.f32 %v1703_v54, 0.0  ;;  %v7144_v26 = vpack.c.bf16 %v1374_v15, %v1373_v14 }
 0x320   : > { %v1158_v41 = vpop.f32.mrf.mxu0  ;;  %v3611_v45 = vmul.f32 %v5887_v30, %v3610_v42  ;;  %v2247_v49 = vadd.f32 %v6951_v3, %v2246_v44  ;;  %v3635_v22 = vor.u32 1.1754944e-38, %v3634_v4  ;;  %vm3633_vm13 = vcmp.eq.f32.partialorder %v3632_v0, 8.507059e+37  ;;  %v5659_v0 = vld [vmem:[%s6315_s11 + $0x1e0] sm:$0xff] }
 0x321   : > { %v1159_v60 = vadd.f32 %v7068_v24, %v1158_v41 }
 0x322   : > { %v5889_v50 = vpop.eup %5888  ;;  %v3612_v51 = vadd.f32 %v5887_v30, %v3611_v45  ;;  %v5515_v48 = vmul.f32 -1.442695, %v2247_v49  ;;  %5400 = vmatmul.msk.bf16.gmra.mxu3 %vm751_vm0, %v5658_v9 }
 0x323   : > { %v5891_v52 = vpop.eup %5890  ;;  %v7119_v53 = vadd.f32 1.0, %v5889_v50  ;;  %v1355_v13 = vmax.f32 %v1159_v60, 0.0 }
 0x324   : > { %v3616_v55 = vsel %vm3615_vm8, %v5887_v30, %v3612_v51  ;;  %v3624_v56 = vmul.f32 %v5891_v52, %v7107_v32  ;;  %5892 = vpow2.f32 %v5515_v48  ;;  %v1704_v57 = vpop.f32.mrf.mxu1  ;;  %vm3629_vm10 = vweird.f32 %v5891_v52 }
 0x325   : > { %v3621_v59 = vsel %vm3618_vm9, %v3620_v62, %v3616_v55  ;;  %5894 = vrcp.f32 %v7119_v53  ;;  %v1705_v1 = vadd.f32 %v7131_v47, %v1704_v57  ;;  %vm3630_vm12 = vmor %vm3628_vm11, %vm3629_vm10  ;;  %v3649_v33 = vand.u32 2147483648, %v7119_v53  ;;  %v1210_v48 = vpop.f32.mrf.mxu3 }
 0x326   : > { %4927 = vst.msk [vmem:[%s6508_s13 + $0x158] sm:$0xff] %vm4883_vm4, %v3621_v59  ;;  %v3625_v63 = vsub.f32 1.0, %v3624_v56  ;;  %v3647_v38 = vand.u32 2147483647, %v7119_v53  ;;  %vm3643_vm15 = vweird.f32 %v7119_v53 }
 0x327   : > { %v2248_v6 = vpop.f32.mrf.mxu2  ;;  %v1927_v11 = vmax.f32 %v1705_v1, 0.0  ;;  %v3650_v44 = vor.u32 1.1754944e-38, %v3649_v33 }
 0x328   : > { %v1160_v61 = vpop.f32.mrf.mxu0  ;;  %v3626_v10 = vmul.f32 %v5891_v52, %v3625_v63  ;;  %v2249_v12 = vadd.f32 %v6951_v3, %v2248_v6  ;;  %vm3648_vm2 = vcmp.eq.f32.partialorder %v3647_v38, 8.507059e+37  ;;  %v1211_v63 = vadd.f32 %v7068_v24, %v1210_v48 }
 0x329   : > { %v1161_v37 = vadd.f32 %v7068_v24, %v1160_v61  ;;  %v2022_v18 = vpack.c.bf16 %v1927_v11, %v1926_v5  ;;  %v1209_v61 = vadd.f32 %v7068_v24, %v1208_v19  ;;  %v7187_v19 = vld [vmem:[%s7836_s6] ss:$0 sm:$0xff] }
 0x32a   : > { %v5893_v20 = vpop.eup %5892  ;;  %v3627_v16 = vadd.f32 %v5891_v52, %v3626_v10  ;;  %v5516_v17 = vmul.f32 -1.442695, %v2249_v12  ;;  %v1376_v8 = vmax.f32 %v1211_v63, 0.0 }
 0x32b   : > { %v1356_v2 = vmax.f32 %v1161_v37, 0.0  ;;  %v5895_v21 = vpop.eup %5894  ;;  %v7142_v23 = vadd.f32 1.0, %v5893_v20  ;;  %v1375_v7 = vmax.f32 %v1209_v61, 0.0 }
 0x32c   : > { %v3631_v27 = vsel %vm3630_vm12, %v5891_v52, %v3627_v16  ;;  %v3639_v28 = vmul.f32 %v5895_v21, %v7119_v53  ;;  %5896 = vpow2.f32 %v5516_v17  ;;  %2290 = vmatmul.bf16.gmra.mxu2 %v2022_v18  ;;  %v1707_v29 = vpop.f32.mrf.mxu1  ;;  %vm3644_vm14 = vweird.f32 %v5895_v21 }
 0x32d   : > { %v1442_v25 = vpack.c.bf16 %v1356_v2, %v1355_v13  ;;  %v3636_v30 = vsel %vm3633_vm13, %v3635_v22, %v3631_v27  ;;  %5898 = vrcp.f32 %v7142_v23  ;;  %vm3645_vm1 = vmor %vm3643_vm15, %vm3644_vm14  ;;  %v1708_v46 = vadd.f32 %v7131_v47, %v1707_v29  ;;  %v7177_v18 = vpop.f32.mrf.mxu3 }
 0x32e   : > { %4928 = vst.msk [vmem:[%s6508_s13 + $0x160] sm:$0xff] %vm4883_vm4, %v3636_v30  ;;  %v3640_v32 = vsub.f32 1.0, %v3639_v28  ;;  %v3662_v55 = vand.u32 2147483647, %v7142_v23  ;;  %v3664_v58 = vand.u32 2147483648, %v7142_v23  ;;  %vm3658_vm5 = vweird.f32 %v7142_v23 }
 0x32f   : > { %v2251_v35 = vpop.f32.mrf.mxu2  ;;  %1746 = vmatmul.bf16.gmra.mxu1 %v1442_v25  ;;  %v1928_v59 = vmax.f32 %v1708_v46, 0.0 }
 0x330   : > { %v1163_v31 = vpop.f32.mrf.mxu0  ;;  %v3641_v36 = vmul.f32 %v5895_v21, %v3640_v32  ;;  %v2252_v39 = vadd.f32 %v6951_v3, %v2251_v35  ;;  %v3665_v2 = vor.u32 1.1754944e-38, %v3664_v58  ;;  %vm3663_vm7 = vcmp.eq.f32.partialorder %v3662_v55, 8.507059e+37 }
 0x331   : > { %v1164_v62 = vadd.f32 %v7068_v24, %v1163_v31 }
 0x332   : > { %v5897_v40 = vpop.eup %5896  ;;  %v3642_v41 = vadd.f32 %v5895_v21, %v3641_v36  ;;  %v5517_v42 = vmul.f32 -1.442695, %v2252_v39  ;;  %5401 = vmatmul.msk.bf16.gmra.mxu3 %vm751_vm0, %v5659_v0 }
 0x333   : > { %v5899_v43 = vpop.eup %5898  ;;  %v7154_v45 = vadd.f32 1.0, %v5897_v40  ;;  %v1357_v5 = vmax.f32 %v1164_v62, 0.0 }
 0x334   : > { %v3646_v49 = vsel %vm3645_vm1, %v5895_v21, %v3642_v41  ;;  %v3654_v50 = vmul.f32 %v5899_v43, %v7142_v23  ;;  %5900 = vpow2.f32 %v5517_v42  ;;  %v1709_v51 = vpop.f32.mrf.mxu1  ;;  %vm3659_vm3 = vweird.f32 %v5899_v43 }
 0x335   : > { %v3651_v52 = vsel %vm3648_vm2, %v3650_v44, %v3646_v49  ;;  %5902 = vrcp.f32 %v7154_v45  ;;  %v1710_v56 = vadd.f32 %v7131_v47, %v1709_v51  ;;  %vm3660_vm6 = vmor %vm3658_vm5, %vm3659_vm3  ;;  %v3679_v25 = vand.u32 2147483648, %v7154_v45 }
 0x336   : > { %4929 = vst.msk [vmem:[%s6508_s13 + $0x168] sm:$0xff] %vm4883_vm4, %v3651_v52  ;;  %v3655_v54 = vsub.f32 1.0, %v3654_v50  ;;  %v3677_v29 = vand.u32 2147483647, %v7154_v45  ;;  %vm3673_vm9 = vweird.f32 %v7154_v45 }
 0x337   : > { %v2253_v60 = vpop.f32.mrf.mxu2  ;;  %v1929_v37 = vmax.f32 %v1710_v56, 0.0  ;;  %v3680_v36 = vor.u32 1.1754944e-38, %v3679_v25 }
 0x338   : > { %v1165_v53 = vpop.f32.mrf.mxu0  ;;  %v3656_v1 = vmul.f32 %v5899_v43, %v3655_v54  ;;  %v2254_v4 = vadd.f32 %v6951_v3, %v2253_v60  ;;  %v7174_v3 = vpack.c.bf16 %v1376_v8, %v1375_v7  ;;  %vm3678_vm11 = vcmp.eq.f32.partialorder %v3677_v29, 8.507059e+37  ;;  %v5660_v54 = vld [vmem:[%s6315_s11 + $0x1e8] sm:$0xff] }
 0x339   : > { %v1166_v57 = vadd.f32 %v7068_v24, %v1165_v53  ;;  %v2023_v12 = vpack.c.bf16 %v1929_v37, %v1928_v59 }
 0x33a   : > { %v5901_v9 = vpop.eup %5900  ;;  %v3657_v10 = vadd.f32 %v5899_v43, %v3656_v1  ;;  %v5518_v11 = vmul.f32 -1.442695, %v2254_v4 }
 0x33b   : > { %v1358_v6 = vmax.f32 %v1166_v57, 0.0  ;;  %v5903_v13 = vpop.eup %5902  ;;  %v7172_v14 = vadd.f32 1.0, %v5901_v9 }
 0x33c   : > { %v3661_v20 = vsel %vm3660_vm6, %v5899_v43, %v3657_v10  ;;  %v3669_v16 = vmul.f32 %v5903_v13, %v7154_v45  ;;  %5904 = vpow2.f32 %v5518_v11  ;;  %2295 = vmatmul.bf16.gmra.mxu2 %v2023_v12  ;;  %v1712_v17 = vpop.f32.mrf.mxu1  ;;  %vm3674_vm8 = vweird.f32 %v5903_v13  ;;  %v7195_v43 = vpop.f32.mrf.mxu3 }
 0x33d   : > { %v1443_v15 = vpack.c.bf16 %v1358_v6, %v1357_v5  ;;  %v3666_v21 = vsel %vm3663_vm7, %v3665_v2, %v3661_v20  ;;  %5906 = vrcp.f32 %v7172_v14  ;;  %vm3675_vm10 = vmor %vm3673_vm9, %vm3674_vm8  ;;  %v1713_v39 = vadd.f32 %v7131_v47, %v1712_v17 }
 0x33e   : > { %4930 = vst.msk [vmem:[%s6508_s13 + $0x170] sm:$0xff] %vm4883_vm4, %v3666_v21  ;;  %v3670_v23 = vsub.f32 1.0, %v3669_v16  ;;  %v3692_v48 = vand.u32 2147483647, %v7172_v14  ;;  %v3694_v52 = vand.u32 2147483648, %v7172_v14  ;;  %vm3688_vm13 = vweird.f32 %v7172_v14 }
 0x33f   : > { %v2256_v27 = vpop.f32.mrf.mxu2  ;;  %1751 = vmatmul.bf16.gmra.mxu1 %v1443_v15  ;;  %v1930_v62 = vmax.f32 %v1713_v39, 0.0 }
 0x340   : > { %v1168_v22 = vpop.f32.mrf.mxu0  ;;  %v3671_v28 = vmul.f32 %v5903_v13, %v3670_v23  ;;  %v2257_v30 = vadd.f32 %v7187_v19, %v2256_v27  ;;  %v3695_v37 = vor.u32 1.1754944e-38, %v3694_v52  ;;  %vm3693_vm15 = vcmp.eq.f32.partialorder %v3692_v48, 8.507059e+37 }
 0x341   : > { %v1169_v45 = vadd.f32 %v7068_v24, %v1168_v22 }
 0x342   : > { %v5905_v31 = vpop.eup %5904  ;;  %v3672_v32 = vadd.f32 %v5903_v13, %v3671_v28  ;;  %v5519_v33 = vmul.f32 -1.442695, %v2257_v30  ;;  %5402 = vmatmul.msk.bf16.gmra.mxu3 %vm751_vm0, %v5660_v54 }
 0x343   : > { %v5907_v35 = vpop.eup %5906  ;;  %v7191_v38 = vadd.f32 1.0, %v5905_v31  ;;  %v1359_v58 = vmax.f32 %v1169_v45, 0.0  ;;  %v5661_v45 = vld [vmem:[%s6315_s11 + $0x1f0] sm:$0xff] }
 0x344   : > { %v3676_v40 = vsel %vm3675_vm10, %v5903_v13, %v3672_v32  ;;  %v3684_v41 = vmul.f32 %v5907_v35, %v7172_v14  ;;  %5908 = vpow2.f32 %v5519_v33  ;;  %v1714_v42 = vpop.f32.mrf.mxu1  ;;  %vm3689_vm12 = vweird.f32 %v5907_v35  ;;  %v7212_v9 = vpop.f32.mrf.mxu3 }
 0x345   : > { %v3681_v44 = vsel %vm3678_vm11, %v3680_v36, %v3676_v40  ;;  %5910 = vrcp.f32 %v7191_v38  ;;  %v1715_v50 = vadd.f32 %v7131_v47, %v1714_v42  ;;  %vm3690_vm14 = vmor %vm3688_vm13, %vm3689_vm12  ;;  %v3709_v13 = vand.u32 2147483648, %v7191_v38 }
 0x346   : > { %4931 = vst.msk [vmem:[%s6508_s13 + $0x178] sm:$0xff] %vm4883_vm4, %v3681_v44  ;;  %v3685_v49 = vsub.f32 1.0, %v3684_v41  ;;  %v3707_v15 = vand.u32 2147483647, %v7191_v38  ;;  %vm3703_vm2 = vweird.f32 %v7191_v38 }
 0x347   : > { %v2258_v53 = vpop.f32.mrf.mxu2  ;;  %v1931_v56 = vmax.f32 %v1715_v50, 0.0  ;;  %v3710_v23 = vor.u32 1.1754944e-38, %v3709_v13 }
 0x348   : > { %v1170_v46 = vpop.f32.mrf.mxu0  ;;  %v3686_v55 = vmul.f32 %v5907_v35, %v3685_v49  ;;  %v2259_v57 = vadd.f32 %v7187_v19, %v2258_v53  ;;  %vm3708_vm5 = vcmp.eq.f32.partialorder %v3707_v15, 8.507059e+37 }
 0x349   : > { %v1171_v51 = vadd.f32 %v7068_v24, %v1170_v46  ;;  %v2024_v0 = vpack.c.bf16 %v1931_v56, %v1930_v62 }
 0x34a   : > { %v5909_v60 = vpop.eup %5908  ;;  %v3687_v61 = vadd.f32 %v5907_v35, %v3686_v55  ;;  %v5520_v63 = vmul.f32 -1.442695, %v2259_v57 }
 0x34b   : > { %v1360_v59 = vmax.f32 %v1171_v51, 0.0  ;;  %v5911_v1 = vpop.eup %5910  ;;  %v7209_v4 = vadd.f32 1.0, %v5909_v60 }
 0x34c   : > { %v3691_v6 = vsel %vm3690_vm14, %v5907_v35, %v3687_v61  ;;  %v3699_v7 = vmul.f32 %v5911_v1, %v7191_v38  ;;  %5912 = vpow2.f32 %v5520_v63  ;;  %2300 = vmatmul.bf16.gmra.mxu2 %v2024_v0  ;;  %v1717_v8 = vpop.f32.mrf.mxu1  ;;  %vm3704_vm1 = vweird.f32 %v5911_v1  ;;  %v7225_v31 = vpop.f32.mrf.mxu3 }
 0x34d   : > { %v1444_v5 = vpack.c.bf16 %v1360_v59, %v1359_v58  ;;  %v3696_v10 = vsel %vm3693_vm15, %v3695_v37, %v3691_v6  ;;  %5914 = vrcp.f32 %v7209_v4  ;;  %vm3705_vm3 = vmor %vm3703_vm2, %vm3704_vm1  ;;  %v1718_v27 = vadd.f32 %v7131_v47, %v1717_v8 }
 0x34e   : > { %4932 = vst.msk [vmem:[%s6508_s13 + $0x180] sm:$0xff] %vm4883_vm4, %v3696_v10  ;;  %v3700_v12 = vsub.f32 1.0, %v3699_v7  ;;  %v3722_v40 = vand.u32 2147483647, %v7209_v4  ;;  %v3724_v41 = vand.u32 2147483648, %v7209_v4  ;;  %vm3718_vm7 = vweird.f32 %v7209_v4 }
 0x34f   : > { %v2261_v2 = vpop.f32.mrf.mxu2  ;;  %1756 = vmatmul.bf16.gmra.mxu1 %v1444_v5  ;;  %v1932_v42 = vmax.f32 %v1718_v27, 0.0 }
 0x350   : > { %v1173_v11 = vpop.f32.mrf.mxu0  ;;  %v3701_v14 = vmul.f32 %v5911_v1, %v3700_v12  ;;  %v2262_v20 = vadd.f32 %v7187_v19, %v2261_v2  ;;  %v3725_v56 = vor.u32 1.1754944e-38, %v3724_v41  ;;  %vm3723_vm9 = vcmp.eq.f32.partialorder %v3722_v40, 8.507059e+37 }
 0x351   : > { %v1174_v33 = vadd.f32 %v7068_v24, %v1173_v11 }
 0x352   : > { %v5913_v16 = vpop.eup %5912  ;;  %v3702_v17 = vadd.f32 %v5911_v1, %v3701_v14  ;;  %v5521_v21 = vmul.f32 -1.442695, %v2262_v20  ;;  %5403 = vmatmul.msk.bf16.gmra.mxu3 %vm751_vm0, %v5661_v45 }
 0x353   : > { %v5915_v22 = vpop.eup %5914  ;;  %v7221_v25 = vadd.f32 1.0, %v5913_v16  ;;  %v1361_v51 = vmax.f32 %v1174_v33, 0.0 }
 0x354   : > { %v3706_v28 = vsel %vm3705_vm3, %v5911_v1, %v3702_v17  ;;  %v3714_v29 = vmul.f32 %v5915_v22, %v7209_v4  ;;  %5916 = vpow2.f32 %v5521_v21  ;;  %v1719_v30 = vpop.f32.mrf.mxu1  ;;  %vm3719_vm6 = vweird.f32 %v5915_v22  ;;  %v7242_v63 = vpop.f32.mrf.mxu3 }
 0x355   : > { %v3711_v32 = vsel %vm3708_vm5, %v3710_v23, %v3706_v28  ;;  %5918 = vrcp.f32 %v7221_v25  ;;  %v1720_v38 = vadd.f32 %v7131_v47, %v1719_v30  ;;  %vm3720_vm8 = vmor %vm3718_vm7, %vm3719_vm6  ;;  %v3739_v4 = vand.u32 2147483648, %v7221_v25 }
 0x356   : > { %4933 = vst.msk [vmem:[%s6508_s13 + $0x188] sm:$0xff] %vm4883_vm4, %v3711_v32  ;;  %v3715_v36 = vsub.f32 1.0, %v3714_v29  ;;  %v3737_v7 = vand.u32 2147483647, %v7221_v25  ;;  %vm3733_vm11 = vweird.f32 %v7221_v25 }
 0x357   : > { %v2263_v44 = vpop.f32.mrf.mxu2  ;;  %v1933_v49 = vmax.f32 %v1720_v38, 0.0  ;;  %v3740_v2 = vor.u32 1.1754944e-38, %v3739_v4 }
 0x358   : > { %v1175_v35 = vpop.f32.mrf.mxu0  ;;  %v3716_v46 = vmul.f32 %v5915_v22, %v3715_v36  ;;  %v2264_v50 = vadd.f32 %v7187_v19, %v2263_v44  ;;  %vm3738_vm13 = vcmp.eq.f32.partialorder %v3737_v7, 8.507059e+37  ;;  %v5662_v36 = vld [vmem:[%s6315_s11 + $0x1f8] sm:$0xff] }
 0x359   : > { %v1176_v39 = vadd.f32 %v7068_v24, %v1175_v35  ;;  %v2025_v54 = vpack.c.bf16 %v1933_v49, %v1932_v42 }
 0x35a   : > { %v5917_v52 = vpop.eup %5916  ;;  %v3717_v62 = vadd.f32 %v5915_v22, %v3716_v46  ;;  %v5522_v53 = vmul.f32 -1.442695, %v2264_v50 }
 0x35b   : > { %v1362_v48 = vmax.f32 %v1176_v39, 0.0  ;;  %v5919_v55 = vpop.eup %5918  ;;  %v7239_v57 = vadd.f32 1.0, %v5917_v52 }
 0x35c   : > { %v3721_v59 = vsel %vm3720_vm8, %v5915_v22, %v3717_v62  ;;  %v3729_v60 = vmul.f32 %v5919_v55, %v7221_v25  ;;  %5920 = vpow2.f32 %v5522_v53  ;;  %2305 = vmatmul.bf16.gmra.mxu2 %v2025_v54  ;;  %v1722_v61 = vpop.f32.mrf.mxu1  ;;  %vm3734_vm10 = vweird.f32 %v5919_v55  ;;  %v7255_v21 = vpop.f32.mrf.mxu3 }
 0x35d   : > { %v1445_v58 = vpack.c.bf16 %v1362_v48, %v1361_v51  ;;  %v3726_v0 = vsel %vm3723_vm9, %v3725_v56, %v3721_v59  ;;  %5922 = vrcp.f32 %v7239_v57  ;;  %vm3735_vm12 = vmor %vm3733_vm11, %vm3734_vm10  ;;  %v1723_v15 = vadd.f32 %v7131_v47, %v1722_v61 }
 0x35e   : > { %4934 = vst.msk [vmem:[%s6508_s13 + $0x190] sm:$0xff] %vm4883_vm4, %v3726_v0  ;;  %v3730_v37 = vsub.f32 1.0, %v3729_v60  ;;  %v3752_v30 = vand.u32 2147483647, %v7239_v57  ;;  %v3754_v32 = vand.u32 2147483648, %v7239_v57  ;;  %vm3748_vm15 = vweird.f32 %v7239_v57 }
 0x35f   : > { %v2266_v5 = vpop.f32.mrf.mxu2  ;;  %1761 = vmatmul.bf16.gmra.mxu1 %v1445_v58  ;;  %v1934_v33 = vmax.f32 %v1723_v15, 0.0 }
 0x360   : > { %v1178_v1 = vpop.f32.mrf.mxu0  ;;  %v3731_v6 = vmul.f32 %v5919_v55, %v3730_v37  ;;  %v2267_v8 = vadd.f32 %v7187_v19, %v2266_v5  ;;  %v3755_v51 = vor.u32 1.1754944e-38, %v3754_v32  ;;  %vm3753_vm2 = vcmp.eq.f32.partialorder %v3752_v30, 8.507059e+37 }
 0x361   : > { %v1179_v23 = vadd.f32 %v7068_v24, %v1178_v1 }
 0x362   : > { %v5921_v10 = vpop.eup %5920  ;;  %v3732_v11 = vadd.f32 %v5919_v55, %v3731_v6  ;;  %v5523_v12 = vmul.f32 -1.442695, %v2267_v8  ;;  %5404 = vmatmul.msk.bf16.gmra.mxu3 %vm751_vm0, %v5662_v36 }
 0x363   : > { %v5923_v13 = vpop.eup %5922  ;;  %v7251_v14 = vadd.f32 1.0, %v5921_v10  ;;  %v1363_v41 = vmax.f32 %v1179_v23, 0.0 }
 0x364   : > { %v3736_v20 = vsel %vm3735_vm12, %v5919_v55, %v3732_v11  ;;  %v3744_v16 = vmul.f32 %v5923_v13, %v7239_v57  ;;  %5924 = vpow2.f32 %v5523_v12  ;;  %v1724_v17 = vpop.f32.mrf.mxu1  ;;  %vm3749_vm14 = vweird.f32 %v5923_v13  ;;  %v7275_v58 = vpop.f32.mrf.mxu3 }
 0x365   : > { %v3741_v22 = vsel %vm3738_vm13, %v3740_v2, %v3736_v20  ;;  %5926 = vrcp.f32 %v7251_v14  ;;  %v1725_v28 = vadd.f32 %v7131_v47, %v1724_v17  ;;  %vm3750_vm1 = vmor %vm3748_vm15, %vm3749_vm14  ;;  %v3769_v59 = vand.u32 2147483648, %v7251_v14 }
 0x366   : > { %4935 = vst.msk [vmem:[%s6508_s13 + $0x198] sm:$0xff] %vm4883_vm4, %v3741_v22  ;;  %v3745_v27 = vsub.f32 1.0, %v3744_v16  ;;  %v3767_v0 = vand.u32 2147483647, %v7251_v14  ;;  %vm3763_vm3 = vweird.f32 %v7251_v14 }
 0x367   : > { %v2268_v35 = vpop.f32.mrf.mxu2  ;;  %v1935_v39 = vmax.f32 %v1725_v28, 0.0  ;;  %v3770_v7 = vor.u32 1.1754944e-38, %v3769_v59 }
 0x368   : > { %v1180_v25 = vpop.f32.mrf.mxu0  ;;  %v3746_v38 = vmul.f32 %v5923_v13, %v3745_v27  ;;  %v2269_v40 = vadd.f32 %v7187_v19, %v2268_v35  ;;  %vm3768_vm6 = vcmp.eq.f32.partialorder %v3767_v0, 8.507059e+37 }
 0x369   : > { %v1181_v29 = vadd.f32 %v7068_v24, %v1180_v25  ;;  %v2026_v46 = vpack.c.bf16 %v1935_v39, %v1934_v33 }
 0x36a   : > { %v5925_v44 = vpop.eup %5924  ;;  %v3747_v45 = vadd.f32 %v5923_v13, %v3746_v38  ;;  %v5524_v49 = vmul.f32 -1.442695, %v2269_v40 }
 0x36b   : > { %v1364_v42 = vmax.f32 %v1181_v29, 0.0  ;;  %v5927_v50 = vpop.eup %5926  ;;  %v7269_v48 = vadd.f32 1.0, %v5925_v44 }
 0x36c   : > { %v3751_v62 = vsel %vm3750_vm1, %v5923_v13, %v3747_v45  ;;  %v3759_v53 = vmul.f32 %v5927_v50, %v7251_v14  ;;  %5928 = vpow2.f32 %v5524_v49  ;;  %2310 = vmatmul.bf16.gmra.mxu2 %v2026_v46  ;;  %v1727_v54 = vpop.f32.mrf.mxu1  ;;  %vm3764_vm0 = vweird.f32 %v5927_v50  ;;  %v7294_v32 = vpop.f32.mrf.mxu3 }
 0x36d   : > { %v1446_v52 = vpack.c.bf16 %v1364_v42, %v1363_v41  ;;  %v3756_v55 = vsel %vm3753_vm2, %v3755_v51, %v3751_v62  ;;  %5930 = vrcp.f32 %v7269_v48  ;;  %vm3765_vm5 = vmor %vm3763_vm3, %vm3764_vm0  ;;  %v1728_v10 = vadd.f32 %v7131_v47, %v1727_v54 }
 0x36e   : > { %4936 = vst.msk [vmem:[%s6508_s13 + $0x1a0] sm:$0xff] %vm4883_vm4, %v3756_v55  ;;  %v3760_v57 = vsub.f32 1.0, %v3759_v53  ;;  %v3782_v22 = vand.u32 2147483647, %v7269_v48  ;;  %v3784_v23 = vand.u32 2147483648, %v7269_v48  ;;  %vm3778_vm8 = vweird.f32 %v7269_v48 }
 0x36f   : > { %v2271_v60 = vpop.f32.mrf.mxu2  ;;  %1766 = vmatmul.bf16.gmra.mxu1 %v1446_v52  ;;  %v1936_v25 = vmax.f32 %v1728_v10, 0.0 }
 0x370   : > { %v1183_v56 = vpop.f32.mrf.mxu0  ;;  %v3761_v61 = vmul.f32 %v5927_v50, %v3760_v57  ;;  %v2272_v1 = vadd.f32 %v7187_v19, %v2271_v60  ;;  %v3785_v41 = vor.u32 1.1754944e-38, %v3784_v23  ;;  %vm3783_vm10 = vcmp.eq.f32.partialorder %v3782_v22, 8.507059e+37 }
 0x371   : > { %v1184_v14 = vadd.f32 %v7068_v24, %v1183_v56 }
 0x372   : > { %v5929_v37 = vpop.eup %5928  ;;  %v3762_v4 = vadd.f32 %v5927_v50, %v3761_v61  ;;  %v5525_v5 = vmul.f32 -1.442695, %v2272_v1 }
 0x373   : > { %v5931_v6 = vpop.eup %5930  ;;  %v7281_v8 = vadd.f32 1.0, %v5929_v37  ;;  %v1365_v33 = vmax.f32 %v1184_v14, 0.0 }
 0x374   : > { %v3766_v11 = vsel %vm3765_vm5, %v5927_v50, %v3762_v4  ;;  %v3774_v12 = vmul.f32 %v5931_v6, %v7269_v48  ;;  %5932 = vpow2.f32 %v5525_v5  ;;  %v1729_v13 = vpop.f32.mrf.mxu1  ;;  %vm3779_vm7 = vweird.f32 %v5931_v6  ;;  %v7307_v60 = vpop.f32.mrf.mxu3 }
 0x375   : > { %v3771_v2 = vsel %vm3768_vm6, %v3770_v7, %v3766_v11  ;;  %5934 = vrcp.f32 %v7281_v8  ;;  %v1730_v16 = vadd.f32 %v7131_v47, %v1729_v13  ;;  %vm3780_vm9 = vmor %vm3778_vm8, %vm3779_vm7  ;;  %v3799_v52 = vand.u32 2147483648, %v7281_v8 }
 0x376   : > { %4937 = vst.msk [vmem:[%s6508_s13 + $0x1a8] sm:$0xff] %vm4883_vm4, %v3771_v2  ;;  %v3775_v20 = vsub.f32 1.0, %v3774_v12  ;;  %v3797_v54 = vand.u32 2147483647, %v7281_v8  ;;  %vm3793_vm12 = vweird.f32 %v7281_v8 }
 0x377   : > { %v2273_v27 = vpop.f32.mrf.mxu2  ;;  %v1937_v29 = vmax.f32 %v1730_v16, 0.0  ;;  %v3800_v0 = vor.u32 1.1754944e-38, %v3799_v52 }
 0x378   : > { %v1185_v15 = vpop.f32.mrf.mxu0  ;;  %v3776_v28 = vmul.f32 %v5931_v6, %v3775_v20  ;;  %v2274_v30 = vadd.f32 %v7187_v19, %v2273_v27  ;;  %vm3798_vm14 = vcmp.eq.f32.partialorder %v3797_v54, 8.507059e+37 }
 0x379   : > { %v1186_v17 = vadd.f32 %v7068_v24, %v1185_v15  ;;  %v2027_v24 = vpack.c.bf16 %v1937_v29, %v1936_v25 }
 0x37a   : > { %v5933_v36 = vpop.eup %5932  ;;  %v3777_v38 = vadd.f32 %v5931_v6, %v3776_v28  ;;  %v5526_v39 = vmul.f32 -1.442695, %v2274_v30 }
 0x37b   : > { %v1366_v35 = vmax.f32 %v1186_v17, 0.0  ;;  %v5935_v40 = vpop.eup %5934  ;;  %v7297_v42 = vadd.f32 1.0, %v5933_v36 }
 0x37c   : > { %v3781_v45 = vsel %vm3780_vm9, %v5931_v6, %v3777_v38  ;;  %v3789_v46 = vmul.f32 %v5935_v40, %v7281_v8  ;;  %5936 = vpow2.f32 %v5526_v39  ;;  %2315 = vmatmul.bf16.gmra.mxu2 %v2027_v24  ;;  %v1732_v49 = vpop.f32.mrf.mxu1  ;;  %vm3794_vm11 = vweird.f32 %v5935_v40  ;;  %v7317_v8 = vld [vmem:[%s7832_s2] ss:$0 sm:$0xff] }
 0x37d   : > { %v1447_v44 = vpack.c.bf16 %v1366_v35, %v1365_v33  ;;  %v3786_v50 = vsel %vm3783_vm10, %v3785_v41, %v3781_v45  ;;  %5938 = vrcp.f32 %v7297_v42  ;;  %vm3795_vm13 = vmor %vm3793_vm12, %vm3794_vm11  ;;  %v1733_v37 = vadd.f32 %v7131_v47, %v1732_v49 }
 0x37e   : > { %4938 = vst.msk [vmem:[%s6508_s13 + $0x1b0] sm:$0xff] %vm4883_vm4, %v3786_v50  ;;  %v3790_v48 = vsub.f32 1.0, %v3789_v46  ;;  %v3812_v14 = vand.u32 2147483647, %v7297_v42  ;;  %v3814_v15 = vand.u32 2147483648, %v7297_v42  ;;  %vm3808_vm1 = vweird.f32 %v7297_v42 }
 0x37f   : > { %v2276_v62 = vpop.f32.mrf.mxu2  ;;  %1771 = vmatmul.bf16.gmra.mxu1 %v1447_v44  ;;  %v1938_v20 = vmax.f32 %v1733_v37, 0.0  ;;  %v7331_v44 = vpop.f32.mrf.mxu3 }
 0x380   : > { %v1188_v51 = vpop.f32.mrf.mxu0  ;;  %v3791_v53 = vmul.f32 %v5935_v40, %v3790_v48  ;;  %v2277_v55 = vadd.f32 %v7187_v19, %v2276_v62  ;;  %v3815_v36 = vor.u32 1.1754944e-38, %v3814_v15  ;;  %vm3813_vm0 = vcmp.eq.f32.partialorder %v3812_v14, 8.507059e+37 }
 0x381   : > { %v1189_v10 = vadd.f32 %v7317_v8, %v1188_v51 }
 0x382   : > { %v5937_v56 = vpop.eup %5936  ;;  %v3792_v57 = vadd.f32 %v5935_v40, %v3791_v53  ;;  %v5527_v59 = vmul.f32 -1.442695, %v2277_v55 }
 0x383   : > { %v5939_v61 = vpop.eup %5938  ;;  %v7309_v1 = vadd.f32 1.0, %v5937_v56  ;;  %v1367_v25 = vmax.f32 %v1189_v10, 0.0 }
 0x384   : > { %v3796_v4 = vsel %vm3795_vm13, %v5935_v40, %v3792_v57  ;;  %v3804_v5 = vmul.f32 %v5939_v61, %v7297_v42  ;;  %5940 = vpow2.f32 %v5527_v59  ;;  %v1734_v6 = vpop.f32.mrf.mxu1  ;;  %vm3809_vm15 = vweird.f32 %v5939_v61 }
 0x385   : > { %v3801_v7 = vsel %vm3798_vm14, %v3800_v0, %v3796_v4  ;;  %5942 = vrcp.f32 %v7309_v1  ;;  %v1735_v13 = vadd.f32 %v7131_v47, %v1734_v6  ;;  %vm3810_vm2 = vmor %vm3808_vm1, %vm3809_vm15  ;;  %v3829_v49 = vand.u32 2147483648, %v7309_v1 }
 0x386   : > { %4939 = vst.msk [vmem:[%s6508_s13 + $0x1b8] sm:$0xff] %vm4883_vm4, %v3801_v7  ;;  %v3805_v12 = vsub.f32 1.0, %v3804_v5  ;;  %v3827_v48 = vand.u32 2147483647, %v7309_v1  ;;  %vm3823_vm5 = vweird.f32 %v7309_v1 }
 0x387   : > { %v2278_v16 = vpop.f32.mrf.mxu2  ;;  %v1939_v22 = vmax.f32 %v1735_v13, 0.0  ;;  %v3830_v56 = vor.u32 1.1754944e-38, %v3829_v49 }
 0x388   : > { %v1190_v11 = vpop.f32.mrf.mxu0  ;;  %v3806_v17 = vmul.f32 %v5939_v61, %v3805_v12  ;;  %v2279_v23 = vadd.f32 %v7187_v19, %v2278_v16  ;;  %vm3828_vm7 = vcmp.eq.f32.partialorder %v3827_v48, 8.507059e+37 }
 0x389   : > { %v1191_v2 = vadd.f32 %v7317_v8, %v1190_v11  ;;  %v2028_v30 = vpack.c.bf16 %v1939_v22, %v1938_v20  ;;  %v7350_v11 = vpop.f32.mrf.mxu3 }
 0x38a   : > { %v5941_v28 = vpop.eup %5940  ;;  %v3807_v29 = vadd.f32 %v5939_v61, %v3806_v17  ;;  %v5528_v33 = vmul.f32 -1.442695, %v2279_v23 }
 0x38b   : > { %v1368_v27 = vmax.f32 %v1191_v2, 0.0  ;;  %v5943_v35 = vpop.eup %5942  ;;  %v7328_v38 = vadd.f32 1.0, %v5941_v28 }
 0x38c   : > { %v3811_v39 = vsel %vm3810_vm2, %v5939_v61, %v3807_v29  ;;  %v3819_v40 = vmul.f32 %v5943_v35, %v7309_v1  ;;  %5944 = vpow2.f32 %v5528_v33  ;;  %2320 = vmatmul.bf16.gmra.mxu2 %v2028_v30  ;;  %v1737_v41 = vpop.f32.mrf.mxu1  ;;  %vm3824_vm3 = vweird.f32 %v5943_v35 }
 0x38d   : > { %v1448_v24 = vpack.c.bf16 %v1368_v27, %v1367_v25  ;;  %v3816_v45 = vsel %vm3813_vm0, %v3815_v36, %v3811_v39  ;;  %5946 = vrcp.f32 %v7328_v38  ;;  %vm3825_vm6 = vmor %vm3823_vm5, %vm3824_vm3  ;;  %v1738_v59 = vadd.f32 %v7131_v47, %v1737_v41 }
 0x38e   : > { %4940 = vst.msk [vmem:[%s6508_s13 + $0x1c0] sm:$0xff] %vm4883_vm4, %v3816_v45  ;;  %v3820_v46 = vsub.f32 1.0, %v3819_v40  ;;  %v3842_v12 = vand.u32 2147483647, %v7328_v38  ;;  %v3844_v13 = vand.u32 2147483648, %v7328_v38  ;;  %vm3838_vm9 = vweird.f32 %v7328_v38 }
 0x38f   : > { %v2281_v50 = vpop.f32.mrf.mxu2  ;;  %1776 = vmatmul.bf16.gmra.mxu1 %v1448_v24  ;;  %v1940_v2 = vmax.f32 %v1738_v59, 0.0 }
 0x390   : > { %v1193_v42 = vpop.f32.mrf.mxu0  ;;  %v3821_v51 = vmul.f32 %v5943_v35, %v3820_v46  ;;  %v2282_v52 = vadd.f32 %v7187_v19, %v2281_v50  ;;  %v3845_v30 = vor.u32 1.1754944e-38, %v3844_v13  ;;  %vm3843_vm11 = vcmp.eq.f32.partialorder %v3842_v12, 8.507059e+37 }
 0x391   : > { %v1194_v1 = vadd.f32 %v7317_v8, %v1193_v42  ;;  %v7362_v50 = vpop.f32.mrf.mxu3 }
 0x392   : > { %v5945_v62 = vpop.eup %5944  ;;  %v3822_v53 = vadd.f32 %v5943_v35, %v3821_v51  ;;  %v5529_v54 = vmul.f32 -1.442695, %v2282_v52 }
 0x393   : > { %v5947_v55 = vpop.eup %5946  ;;  %v7340_v57 = vadd.f32 1.0, %v5945_v62  ;;  %v1369_v17 = vmax.f32 %v1194_v1, 0.0 }
 0x394   : > { %v3826_v61 = vsel %vm3825_vm6, %v5943_v35, %v3822_v53  ;;  %v3834_v0 = vmul.f32 %v5947_v55, %v7328_v38  ;;  %5948 = vpow2.f32 %v5529_v54  ;;  %v1739_v37 = vpop.f32.mrf.mxu1  ;;  %vm3839_vm8 = vweird.f32 %v5947_v55 }
 0x395   : > { %v3831_v4 = vsel %vm3828_vm7, %v3830_v56, %v3826_v61  ;;  %5950 = vrcp.f32 %v7340_v57  ;;  %v1740_v7 = vadd.f32 %v7131_v47, %v1739_v37  ;;  %vm3840_vm10 = vmor %vm3838_vm9, %vm3839_vm8  ;;  %v3859_v41 = vand.u32 2147483648, %v7340_v57 }
 0x396   : > { %4941 = vst.msk [vmem:[%s6508_s13 + $0x1c8] sm:$0xff] %vm4883_vm4, %v3831_v4  ;;  %v3835_v6 = vsub.f32 1.0, %v3834_v0  ;;  %v3857_v46 = vand.u32 2147483647, %v7340_v57  ;;  %vm3853_vm13 = vweird.f32 %v7340_v57 }
 0x397   : > { %v2283_v14 = vpop.f32.mrf.mxu2  ;;  %v1941_v20 = vmax.f32 %v1740_v7, 0.0  ;;  %v3860_v53 = vor.u32 1.1754944e-38, %v3859_v41 }
 0x398   : > { %v1195_v5 = vpop.f32.mrf.mxu0  ;;  %v3836_v15 = vmul.f32 %v5947_v55, %v3835_v6  ;;  %v2284_v16 = vadd.f32 %v7187_v19, %v2283_v14  ;;  %vm3858_vm15 = vcmp.eq.f32.partialorder %v3857_v46, 8.507059e+37 }
 0x399   : > { %v1196_v10 = vadd.f32 %v7317_v8, %v1195_v5  ;;  %v2029_v27 = vpack.c.bf16 %v1941_v20, %v1940_v2  ;;  %v7370_v20 = vpop.f32.mrf.mxu3 }
 0x39a   : > { %v5949_v23 = vpop.eup %5948  ;;  %v3837_v25 = vadd.f32 %v5947_v55, %v3836_v15  ;;  %v5530_v28 = vmul.f32 -1.442695, %v2284_v16 }
 0x39b   : > { %v1370_v22 = vmax.f32 %v1196_v10, 0.0  ;;  %v5951_v29 = vpop.eup %5950  ;;  %v2895_v33 = vadd.f32 1.0, %v5949_v23 }
 0x39c   : > { %v3841_v36 = vsel %vm3840_vm10, %v5947_v55, %v3837_v25  ;;  %v3849_v24 = vmul.f32 %v5951_v29, %v7340_v57  ;;  %5952 = vpow2.f32 %v5530_v28  ;;  %2325 = vmatmul.bf16.gmra.mxu2 %v2029_v27  ;;  %v1742_v39 = vpop.f32.mrf.mxu1  ;;  %vm3854_vm12 = vweird.f32 %v5951_v29 }
 0x39d   : > { %v1449_v35 = vpack.c.bf16 %v1370_v22, %v1369_v17  ;;  %v3846_v40 = vsel %vm3843_vm11, %v3845_v30, %v3841_v36  ;;  %5954 = vrcp.f32 %v2895_v33  ;;  %vm3855_vm14 = vmor %vm3853_vm13, %vm3854_vm12  ;;  %v1743_v55 = vadd.f32 %v7131_v47, %v1742_v39 }
 0x39e   : > { %4942 = vst.msk [vmem:[%s6508_s13 + $0x1d0] sm:$0xff] %vm4883_vm4, %v3846_v40  ;;  %v3850_v38 = vsub.f32 1.0, %v3849_v24  ;;  %v3872_v57 = vand.u32 2147483647, %v2895_v33  ;;  %v3874_v1 = vand.u32 2147483648, %v2895_v33  ;;  %vm3868_vm2 = vweird.f32 %v2895_v33 }
 0x39f   : > { %1781 = vmatmul.bf16.vlgmr.msrb.gmra.mxu3 %v1449_v35  ;;  %v2286_v45 = vpop.f32.mrf.mxu2  ;;  %v1942_v5 = vmax.f32 %v1743_v55, 0.0 }
 0x3a0   : > { %v3851_v42 = vmul.f32 %v5951_v29, %v3850_v38  ;;  %v2287_v49 = vadd.f32 %v7187_v19, %v2286_v45  ;;  %vm3873_vm3 = vcmp.eq.f32.partialorder %v3872_v57, 8.507059e+37 }
 0x3a2   : > { %v5953_v51 = vpop.eup %5952  ;;  %v3852_v48 = vadd.f32 %v5951_v29, %v3851_v42  ;;  %v5531_v52 = vmul.f32 -1.442695, %v2287_v49 }
 0x3a3   : > { %v5955_v62 = vpop.eup %5954  ;;  %v2896_v54 = vadd.f32 1.0, %v5953_v51 }
 0x3a4   : > { %v3856_v56 = vsel %vm3855_vm14, %v5951_v29, %v3852_v48  ;;  %v3864_v59 = vmul.f32 %v5955_v62, %v2895_v33  ;;  %5956 = vpow2.f32 %v5531_v52  ;;  %v1744_v61 = vpop.f32.mrf.mxu1  ;;  %vm3869_vm1 = vweird.f32 %v5955_v62  ;;  %v7382_v48 = vpop.f32.mrf.mxu3 }
 0x3a5   : > { %v3861_v0 = vsel %vm3858_vm15, %v3860_v53, %v3856_v56  ;;  %5958 = vrcp.f32 %v2896_v54  ;;  %v1745_v4 = vadd.f32 %v7131_v47, %v1744_v61  ;;  %vm3870_vm0 = vmor %vm3868_vm2, %vm3869_vm1  ;;  %v3875_v47 = vor.u32 1.1754944e-38, %v3874_v1 }
 0x3a6   : > { %4943 = vst.msk [vmem:[%s6508_s13 + $0x1d8] sm:$0xff] %vm4883_vm4, %v3861_v0  ;;  %v3865_v37 = vsub.f32 1.0, %v3864_v59  ;;  %v3889_v29 = vand.u32 2147483648, %v2896_v54  ;;  %v3887_v35 = vand.u32 2147483647, %v2896_v54  ;;  %vm3883_vm6 = vweird.f32 %v2896_v54 }
 0x3a7   : > { %v2288_v6 = vpop.f32.mrf.mxu2  ;;  %v1943_v10 = vmax.f32 %v1745_v4, 0.0 }
 0x3a8   : > { %v3866_v7 = vmul.f32 %v5955_v62, %v3865_v37  ;;  %v2289_v12 = vadd.f32 %v7187_v19, %v2288_v6  ;;  %v3890_v41 = vor.u32 1.1754944e-38, %v3889_v29  ;;  %vm3888_vm8 = vcmp.eq.f32.partialorder %v3887_v35, 8.507059e+37 }
 0x3a9   : > { %v2030_v14 = vpack.c.bf16 %v1943_v10, %v1942_v5 }
 0x3aa   : > { %v5957_v13 = vpop.eup %5956  ;;  %v3867_v2 = vadd.f32 %v5955_v62, %v3866_v7  ;;  %v5532_v15 = vmul.f32 -1.442695, %v2289_v12 }
 0x3ab   : > { %v5959_v16 = vpop.eup %5958  ;;  %v2897_v17 = vadd.f32 1.0, %v5957_v13 }
 0x3ac   : > { %v3871_v22 = vsel %vm3870_vm0, %v5955_v62, %v3867_v2  ;;  %v3879_v23 = vmul.f32 %v5959_v16, %v2896_v54  ;;  %5960 = vpow2.f32 %v5532_v15  ;;  %2330 = vmatmul.bf16.gmra.mxu2 %v2030_v14  ;;  %v1747_v25 = vpop.f32.mrf.mxu1  ;;  %vm3884_vm5 = vweird.f32 %v5959_v16 }
 0x3ad   : > { %v3876_v27 = vsel %vm3873_vm3, %v3875_v47, %v3871_v22  ;;  %5962 = vrcp.f32 %v2897_v17  ;;  %vm3885_vm7 = vmor %vm3883_vm6, %vm3884_vm5  ;;  %v3902_v54 = vand.u32 2147483647, %v2897_v17  ;;  %v3904_v55 = vand.u32 2147483648, %v2897_v17 }
 0x3ae   : > { %4944 = vst.msk [vmem:[%s6508_s13 + $0x1e0] sm:$0xff] %vm4883_vm4, %v3876_v27  ;;  %v3880_v28 = vsub.f32 1.0, %v3879_v23  ;;  %vm3898_vm10 = vweird.f32 %v2897_v17 }
 0x3af   : > { %1786 = vmatmul.bf16.gmra.mxu3 %v7109_v34  ;;  %v2291_v30 = vpop.f32.mrf.mxu2  ;;  %v7379_v34 = vld [vmem:[%s7834_s4] ss:$0 sm:$0xff]  ;;  %v3905_v7 = vor.u32 1.1754944e-38, %v3904_v55  ;;  %vm3903_vm12 = vcmp.eq.f32.partialorder %v3902_v54, 8.507059e+37 }
 0x3b0   : > { %v3881_v33 = vmul.f32 %v5959_v16, %v3880_v28  ;;  %v2292_v36 = vadd.f32 %v7187_v19, %v2291_v30  ;;  %v1748_v42 = vadd.f32 %v7379_v34, %v1747_v25 }
 0x3b2   : > { %v5961_v24 = vpop.eup %5960  ;;  %v3882_v39 = vadd.f32 %v5959_v16, %v3881_v33  ;;  %v5533_v40 = vmul.f32 -1.442695, %v2292_v36  ;;  %v1944_v56 = vmax.f32 %v1748_v42, 0.0 }
 0x3b3   : > { %v5963_v38 = vpop.eup %5962  ;;  %v2898_v45 = vadd.f32 1.0, %v5961_v24 }
 0x3b4   : > { %v3886_v46 = vsel %vm3885_vm7, %v5959_v16, %v3882_v39  ;;  %v3894_v49 = vmul.f32 %v5963_v38, %v2897_v17  ;;  %5964 = vpow2.f32 %v5533_v40  ;;  %v1749_v51 = vpop.f32.mrf.mxu1  ;;  %vm3899_vm9 = vweird.f32 %v5963_v38  ;;  %v7391_v16 = vpop.f32.mrf.mxu3 }
 0x3b5   : > { %v3891_v52 = vsel %vm3888_vm8, %v3890_v41, %v3886_v46  ;;  %5966 = vrcp.f32 %v2898_v45  ;;  %v1750_v53 = vadd.f32 %v7379_v34, %v1749_v51  ;;  %vm3900_vm11 = vmor %vm3898_vm10, %vm3899_vm9  ;;  %v3919_v47 = vand.u32 2147483648, %v2898_v45 }
 0x3b6   : > { %4945 = vst.msk [vmem:[%s6508_s13 + $0x1e8] sm:$0xff] %vm4883_vm4, %v3891_v52  ;;  %v3895_v62 = vsub.f32 1.0, %v3894_v49  ;;  %v3917_v23 = vand.u32 2147483647, %v2898_v45  ;;  %vm3913_vm14 = vweird.f32 %v2898_v45  ;;  %v7401_v52 = vld [vmem:[%s7836_s6] ss:$0 sm:$0xff] }
 0x3b7   : > { %v2293_v59 = vpop.f32.mrf.mxu2  ;;  %v1945_v0 = vmax.f32 %v1750_v53, 0.0 }
 0x3b8   : > { %v3896_v61 = vmul.f32 %v5963_v38, %v3895_v62  ;;  %v2294_v37 = vadd.f32 %v7187_v19, %v2293_v59  ;;  %vm3918_vm1 = vcmp.eq.f32.partialorder %v3917_v23, 8.507059e+37  ;;  %v1216_v23 = vadd.f32 %v7317_v8, %v7195_v43 }
 0x3b9   : > { %v2031_v1 = vpack.c.bf16 %v1945_v0, %v1944_v56 }
 0x3ba   : > { %v5965_v4 = vpop.eup %5964  ;;  %v3897_v57 = vadd.f32 %v5963_v38, %v3896_v61  ;;  %v5534_v5 = vmul.f32 -1.442695, %v2294_v37 }
 0x3bb   : > { %v5967_v6 = vpop.eup %5966  ;;  %v2899_v10 = vadd.f32 1.0, %v5965_v4 }
 0x3bc   : > { %v3901_v12 = vsel %vm3900_vm11, %v5963_v38, %v3897_v57  ;;  %v3909_v13 = vmul.f32 %v5967_v6, %v2898_v45  ;;  %5968 = vpow2.f32 %v5534_v5  ;;  %2335 = vmatmul.bf16.gmra.mxu2 %v2031_v1  ;;  %v1752_v2 = vpop.f32.mrf.mxu1  ;;  %vm3914_vm13 = vweird.f32 %v5967_v6  ;;  %v7404_v53 = vpop.f32.mrf.mxu3 }
 0x3bd   : > { %v3906_v14 = vsel %vm3903_vm12, %v3905_v7, %v3901_v12  ;;  %5970 = vrcp.f32 %v2899_v10  ;;  %vm3915_vm15 = vmor %vm3913_vm14, %vm3914_vm13  ;;  %v1753_v35 = vadd.f32 %v7379_v34, %v1752_v2  ;;  %v3932_v41 = vand.u32 2147483647, %v2899_v10 }
 0x3be   : > { %4946 = vst.msk [vmem:[%s6508_s13 + $0x1f0] sm:$0xff] %vm4883_vm4, %v3906_v14  ;;  %v3910_v15 = vsub.f32 1.0, %v3909_v13  ;;  %v3934_v45 = vand.u32 2147483648, %v2899_v10  ;;  %vm3928_vm0 = vweird.f32 %v2899_v10 }
 0x3bf   : > { %1791 = vmatmul.bf16.gmra.mxu3 %v7144_v26  ;;  %v2296_v17 = vpop.f32.mrf.mxu2  ;;  %v3920_v26 = vor.u32 1.1754944e-38, %v3919_v47  ;;  %v1946_v42 = vmax.f32 %v1753_v35, 0.0  ;;  %vm3933_vm5 = vcmp.eq.f32.partialorder %v3932_v41, 8.507059e+37 }
 0x3c0   : > { %v3911_v22 = vmul.f32 %v5967_v6, %v3910_v15  ;;  %v2297_v25 = vadd.f32 %v7187_v19, %v2296_v17  ;;  %v3935_v0 = vor.u32 1.1754944e-38, %v3934_v45  ;;  %v1214_v15 = vadd.f32 %v7317_v8, %v7177_v18 }
 0x3c2   : > { %v5969_v27 = vpop.eup %5968  ;;  %v3912_v28 = vadd.f32 %v5967_v6, %v3911_v22  ;;  %v5535_v29 = vmul.f32 -1.442695, %v2297_v25 }
 0x3c3   : > { %v5971_v30 = vpop.eup %5970  ;;  %v2900_v33 = vadd.f32 1.0, %v5969_v27 }
 0x3c4   : > { %v3916_v36 = vsel %vm3915_vm15, %v5967_v6, %v3912_v28  ;;  %v3924_v24 = vmul.f32 %v5971_v30, %v2899_v10  ;;  %5972 = vpow2.f32 %v5535_v29  ;;  %v1754_v39 = vpop.f32.mrf.mxu1  ;;  %vm3929_vm2 = vweird.f32 %v5971_v30  ;;  %v7412_v22 = vpop.f32.mrf.mxu3 }
 0x3c5   : > { %v3921_v40 = vsel %vm3918_vm1, %v3920_v26, %v3916_v36  ;;  %5974 = vrcp.f32 %v2900_v33  ;;  %v1755_v38 = vadd.f32 %v7379_v34, %v1754_v39  ;;  %vm3930_vm3 = vmor %vm3928_vm0, %vm3929_vm2  ;;  %v3949_v7 = vand.u32 2147483648, %v2900_v33 }
 0x3c6   : > { %4947 = vst.msk [vmem:[%s6508_s13 + $0x1f8] sm:$0xff] %vm4883_vm4, %v3921_v40  ;;  %v3925_v19 = vsub.f32 1.0, %v3924_v24  ;;  %v3947_v13 = vand.u32 2147483647, %v2900_v33  ;;  %vm3943_vm7 = vweird.f32 %v2900_v33  ;;  %v1378_v36 = vmax.f32 %v1216_v23, 0.0 }
 0x3c7   : > { %v2298_v46 = vpop.f32.mrf.mxu2  ;;  %v1947_v51 = vmax.f32 %v1755_v38, 0.0  ;;  %v3950_v25 = vor.u32 1.1754944e-38, %v3949_v7 }
 0x3c8   : > { %v3926_v49 = vmul.f32 %v5971_v30, %v3925_v19  ;;  %v2299_v62 = vadd.f32 %v7401_v52, %v2298_v46  ;;  %vm3948_vm9 = vcmp.eq.f32.partialorder %v3947_v13, 8.507059e+37  ;;  %v1219_v13 = vadd.f32 %v7317_v8, %v7212_v9 }
 0x3c9   : > { %v2032_v56 = vpack.c.bf16 %v1947_v51, %v1946_v42 }
 0x3ca   : > { %v5973_v54 = vpop.eup %5972  ;;  %v3927_v55 = vadd.f32 %v5971_v30, %v3926_v49  ;;  %v5536_v59 = vmul.f32 -1.442695, %v2299_v62 }
 0x3cb   : > { %v5975_v61 = vpop.eup %5974  ;;  %v2901_v37 = vadd.f32 1.0, %v5973_v54 }
 0x3cc   : > { %v3931_v4 = vsel %vm3930_vm3, %v5971_v30, %v3927_v55  ;;  %v3939_v57 = vmul.f32 %v5975_v61, %v2900_v33  ;;  %5976 = vpow2.f32 %v5536_v59  ;;  %2340 = vmatmul.bf16.gmra.mxu2 %v2032_v56  ;;  %v1757_v1 = vpop.f32.mrf.mxu1  ;;  %vm3944_vm6 = vweird.f32 %v5975_v61 }
 0x3cd   : > { %v3936_v5 = vsel %vm3933_vm5, %v3935_v0, %v3931_v4  ;;  %5978 = vrcp.f32 %v2901_v37  ;;  %vm3945_vm8 = vmor %vm3943_vm7, %vm3944_vm6  ;;  %v1758_v28 = vadd.f32 %v7379_v34, %v1757_v1  ;;  %v1377_v33 = vmax.f32 %v1214_v15, 0.0  ;;  %v7427_v4 = vpop.f32.mrf.mxu3 }
 0x3ce   : > { %4948 = vst.msk [vmem:[%s6508_s13 + $0x200] sm:$0xff] %vm4883_vm4, %v3936_v5  ;;  %v3940_v6 = vsub.f32 1.0, %v3939_v57  ;;  %v3962_v24 = vand.u32 2147483647, %v2901_v37  ;;  %v3964_v39 = vand.u32 2147483648, %v2901_v37  ;;  %vm3958_vm11 = vweird.f32 %v2901_v37 }
 0x3cf   : > { %1796 = vmatmul.bf16.gmra.mxu3 %v7174_v3  ;;  %v2301_v10 = vpop.f32.mrf.mxu2  ;;  %v1948_v40 = vmax.f32 %v1758_v28, 0.0  ;;  %v1453_v56 = vpack.c.bf16 %v1378_v36, %v1377_v33 }
 0x3d0   : > { %v3941_v12 = vmul.f32 %v5975_v61, %v3940_v6  ;;  %v2302_v2 = vadd.f32 %v7401_v52, %v2301_v10  ;;  %v3965_v54 = vor.u32 1.1754944e-38, %v3964_v39  ;;  %vm3963_vm13 = vcmp.eq.f32.partialorder %v3962_v24, 8.507059e+37 }
 0x3d2   : > { %v5977_v14 = vpop.eup %5976  ;;  %v3942_v47 = vadd.f32 %v5975_v61, %v3941_v12  ;;  %v5537_v17 = vmul.f32 -1.442695, %v2302_v2 }
 0x3d3   : > { %v5979_v3 = vpop.eup %5978  ;;  %v7416_v27 = vadd.f32 1.0, %v5977_v14 }
 0x3d4   : > { %v3946_v29 = vsel %vm3945_vm8, %v5975_v61, %v3942_v47  ;;  %v3954_v30 = vmul.f32 %v5979_v3, %v2901_v37  ;;  %5980 = vpow2.f32 %v5537_v17  ;;  %v1759_v18 = vpop.f32.mrf.mxu1  ;;  %vm3959_vm10 = vweird.f32 %v5979_v3 }
 0x3d5   : > { %v3951_v26 = vsel %vm3948_vm9, %v3950_v25, %v3946_v29  ;;  %5982 = vrcp.f32 %v7416_v27  ;;  %v1760_v43 = vadd.f32 %v7379_v34, %v1759_v18  ;;  %vm3960_vm12 = vmor %vm3958_vm11, %vm3959_vm10  ;;  %v3979_v1 = vand.u32 2147483648, %v7416_v27  ;;  %v7448_v18 = vpop.f32.mrf.mxu3 }
 0x3d6   : > { %4949 = vst.msk [vmem:[%s6508_s13 + $0x208] sm:$0xff] %vm4883_vm4, %v3951_v26  ;;  %v3955_v35 = vsub.f32 1.0, %v3954_v30  ;;  %v3977_v7 = vand.u32 2147483647, %v7416_v27  ;;  %vm3973_vm15 = vweird.f32 %v7416_v27  ;;  %v1221_v47 = vadd.f32 %v7317_v8, %v7225_v31 }
 0x3d7   : > { %v2303_v19 = vpop.f32.mrf.mxu2  ;;  %v1949_v41 = vmax.f32 %v1760_v43, 0.0  ;;  %v3980_v17 = vor.u32 1.1754944e-38, %v3979_v1 }
 0x3d8   : > { %v3956_v38 = vmul.f32 %v5979_v3, %v3955_v35  ;;  %v2304_v45 = vadd.f32 %v7401_v52, %v2303_v19  ;;  %vm3978_vm2 = vcmp.eq.f32.partialorder %v3977_v7, 8.507059e+37  ;;  %v1380_v26 = vmax.f32 %v1221_v47, 0.0 }
 0x3d9   : > { %v2033_v49 = vpack.c.bf16 %v1949_v41, %v1948_v40  ;;  %v1224_v7 = vadd.f32 %v7317_v8, %v7242_v63 }
 0x3da   : > { %v5981_v42 = vpop.eup %5980  ;;  %v3957_v46 = vadd.f32 %v5979_v3, %v3956_v38  ;;  %v5538_v51 = vmul.f32 -1.442695, %v2304_v45 }
 0x3db   : > { %v5983_v62 = vpop.eup %5982  ;;  %v7424_v55 = vadd.f32 1.0, %v5981_v42 }
 0x3dc   : > { %v3961_v59 = vsel %vm3960_vm12, %v5979_v3, %v3957_v46  ;;  %v3969_v61 = vmul.f32 %v5983_v62, %v7416_v27  ;;  %5984 = vpow2.f32 %v5538_v51  ;;  %2345 = vmatmul.bf16.gmra.mxu2 %v2033_v49  ;;  %v1762_v0 = vpop.f32.mrf.mxu1  ;;  %vm3974_vm14 = vweird.f32 %v5983_v62 }
 0x3dd   : > { %v3966_v57 = vsel %vm3963_vm13, %v3965_v54, %v3961_v59  ;;  %5986 = vrcp.f32 %v7424_v55  ;;  %vm3975_vm1 = vmor %vm3973_vm15, %vm3974_vm14  ;;  %v1763_v23 = vadd.f32 %v7379_v34, %v1762_v0  ;;  %v1379_v27 = vmax.f32 %v1219_v13, 0.0 }
 0x3de   : > { %4950 = vst.msk [vmem:[%s6508_s13 + $0x210] sm:$0xff] %vm4883_vm4, %v3966_v57  ;;  %v3970_v37 = vsub.f32 1.0, %v3969_v61  ;;  %v3992_v33 = vand.u32 2147483647, %v7424_v55  ;;  %v3994_v35 = vand.u32 2147483648, %v7424_v55  ;;  %vm3988_vm3 = vweird.f32 %v7424_v55 }
 0x3df   : > { %1801 = vmatmul.bf16.gmra.mxu3 %v1453_v56  ;;  %v2306_v5 = vpop.f32.mrf.mxu2  ;;  %v1950_v43 = vmax.f32 %v1763_v23, 0.0  ;;  %v1454_v51 = vpack.c.bf16 %v1380_v26, %v1379_v27 }
 0x3e0   : > { %v3971_v6 = vmul.f32 %v5983_v62, %v3970_v37  ;;  %v2307_v10 = vadd.f32 %v7401_v52, %v2306_v5  ;;  %v3995_v46 = vor.u32 1.1754944e-38, %v3994_v35  ;;  %vm3993_vm6 = vcmp.eq.f32.partialorder %v3992_v33, 8.507059e+37  ;;  %v7463_v5 = vpop.f32.mrf.mxu3 }
 0x3e2   : > { %v5985_v12 = vpop.eup %5984  ;;  %v3972_v2 = vadd.f32 %v5983_v62, %v3971_v6  ;;  %v5539_v14 = vmul.f32 -1.442695, %v2307_v10 }
 0x3e3   : > { %v5987_v15 = vpop.eup %5986  ;;  %v7440_v3 = vadd.f32 1.0, %v5985_v12 }
 0x3e4   : > { %v3976_v25 = vsel %vm3975_vm1, %v5983_v62, %v3972_v2  ;;  %v3984_v28 = vmul.f32 %v5987_v15, %v7424_v55  ;;  %5988 = vpow2.f32 %v5539_v14  ;;  %v1764_v9 = vpop.f32.mrf.mxu1  ;;  %vm3989_vm0 = vweird.f32 %v5987_v15 }
 0x3e5   : > { %v3981_v29 = vsel %vm3978_vm2, %v3980_v17, %v3976_v25  ;;  %5990 = vrcp.f32 %v7440_v3  ;;  %v1765_v31 = vadd.f32 %v7379_v34, %v1764_v9  ;;  %vm3990_vm5 = vmor %vm3988_vm3, %vm3989_vm0  ;;  %v4009_v61 = vand.u32 2147483648, %v7440_v3 }
 0x3e6   : > { %4951 = vst.msk [vmem:[%s6508_s13 + $0x218] sm:$0xff] %vm4883_vm4, %v3981_v29  ;;  %v3985_v30 = vsub.f32 1.0, %v3984_v28  ;;  %v4007_v37 = vand.u32 2147483647, %v7440_v3  ;;  %vm4003_vm8 = vweird.f32 %v7440_v3  ;;  %v1226_v2 = vadd.f32 %v7317_v8, %v7255_v21 }
 0x3e7   : > { %v2308_v36 = vpop.f32.mrf.mxu2  ;;  %v1951_v39 = vmax.f32 %v1765_v31, 0.0  ;;  %v4010_v14 = vor.u32 1.1754944e-38, %v4009_v61 }
 0x3e8   : > { %v3986_v24 = vmul.f32 %v5987_v15, %v3985_v30  ;;  %v2309_v40 = vadd.f32 %v7401_v52, %v2308_v36  ;;  %vm4008_vm10 = vcmp.eq.f32.partialorder %v4007_v37, 8.507059e+37  ;;  %v1382_v9 = vmax.f32 %v1226_v2, 0.0 }
 0x3e9   : > { %v2034_v41 = vpack.c.bf16 %v1951_v39, %v1950_v43 }
 0x3ea   : > { %v5989_v19 = vpop.eup %5988  ;;  %v3987_v38 = vadd.f32 %v5987_v15, %v3986_v24  ;;  %v5540_v45 = vmul.f32 -1.442695, %v2309_v40  ;;  %v7482_v40 = vpop.f32.mrf.mxu3 }
 0x3eb   : > { %v5991_v42 = vpop.eup %5990  ;;  %v7454_v49 = vadd.f32 1.0, %v5989_v19 }
 0x3ec   : > { %v3991_v62 = vsel %vm3990_vm5, %v5987_v15, %v3987_v38  ;;  %v3999_v54 = vmul.f32 %v5991_v42, %v7440_v3  ;;  %5992 = vpow2.f32 %v5540_v45  ;;  %2350 = vmatmul.bf16.gmra.mxu2 %v2034_v41  ;;  %v1767_v56 = vpop.f32.mrf.mxu1  ;;  %vm4004_vm7 = vweird.f32 %v5991_v42 }
 0x3ed   : > { %v3996_v59 = vsel %vm3993_vm6, %v3995_v46, %v3991_v62  ;;  %5994 = vrcp.f32 %v7454_v49  ;;  %vm4005_vm9 = vmor %vm4003_vm8, %vm4004_vm7  ;;  %v1768_v47 = vadd.f32 %v7379_v34, %v1767_v56  ;;  %v1381_v3 = vmax.f32 %v1224_v7, 0.0 }
 0x3ee   : > { %4952 = vst.msk [vmem:[%s6508_s13 + $0x220] sm:$0xff] %vm4883_vm4, %v3996_v59  ;;  %v4000_v55 = vsub.f32 1.0, %v3999_v54  ;;  %v4022_v29 = vand.u32 2147483647, %v7454_v49  ;;  %v4024_v27 = vand.u32 2147483648, %v7454_v49  ;;  %vm4018_vm12 = vweird.f32 %v7454_v49 }
 0x3ef   : > { %1806 = vmatmul.bf16.gmra.mxu3 %v1454_v51  ;;  %v2311_v0 = vpop.f32.mrf.mxu2  ;;  %v1952_v30 = vmax.f32 %v1768_v47, 0.0  ;;  %v1455_v45 = vpack.c.bf16 %v1382_v9, %v1381_v3  ;;  %v1231_v7 = vadd.f32 %v7317_v8, %v7294_v32 }
 0x3f0   : > { %v4001_v57 = vmul.f32 %v5991_v42, %v4000_v55  ;;  %v2312_v1 = vadd.f32 %v7401_v52, %v2311_v0  ;;  %v4025_v38 = vor.u32 1.1754944e-38, %v4024_v27  ;;  %vm4023_vm14 = vcmp.eq.f32.partialorder %v4022_v29, 8.507059e+37 }
 0x3f2   : > { %v5993_v6 = vpop.eup %5992  ;;  %v4002_v10 = vadd.f32 %v5991_v42, %v4001_v57  ;;  %v5541_v12 = vmul.f32 -1.442695, %v2312_v1  ;;  %v1229_v57 = vadd.f32 %v7317_v8, %v7275_v58  ;;  %v7502_v58 = vpop.f32.mrf.mxu3 }
 0x3f3   : > { %v5995_v13 = vpop.eup %5994  ;;  %v7470_v15 = vadd.f32 1.0, %v5993_v6 }
 0x3f4   : > { %v4006_v17 = vsel %vm4005_vm9, %v5991_v42, %v4002_v10  ;;  %v4014_v23 = vmul.f32 %v5995_v13, %v7454_v49  ;;  %5996 = vpow2.f32 %v5541_v12  ;;  %v1769_v63 = vpop.f32.mrf.mxu1  ;;  %vm4019_vm11 = vweird.f32 %v5995_v13 }
 0x3f5   : > { %v4011_v25 = vsel %vm4008_vm10, %v4010_v14, %v4006_v17  ;;  %5998 = vrcp.f32 %v7470_v15  ;;  %v1770_v21 = vadd.f32 %v7379_v34, %v1769_v63  ;;  %vm4020_vm13 = vmor %vm4018_vm12, %vm4019_vm11  ;;  %v4039_v54 = vand.u32 2147483648, %v7470_v15 }
 0x3f6   : > { %4953 = vst.msk [vmem:[%s6508_s13 + $0x228] sm:$0xff] %vm4883_vm4, %v4011_v25  ;;  %v4015_v28 = vsub.f32 1.0, %v4014_v23  ;;  %v4037_v55 = vand.u32 2147483647, %v7470_v15  ;;  %vm4033_vm1 = vweird.f32 %v7470_v15  ;;  %v1383_v17 = vmax.f32 %v1229_v57, 0.0 }
 0x3f7   : > { %v2313_v31 = vpop.f32.mrf.mxu2  ;;  %v1953_v33 = vmax.f32 %v1770_v21, 0.0  ;;  %v4040_v10 = vor.u32 1.1754944e-38, %v4039_v54  ;;  %v1384_v63 = vmax.f32 %v1231_v7, 0.0  ;;  %v7529_v57 = vld [vmem:[%s7832_s2] ss:$0 sm:$0xff] }
 0x3f8   : > { %v4016_v26 = vmul.f32 %v5995_v13, %v4015_v28  ;;  %v2314_v35 = vadd.f32 %v7401_v52, %v2313_v31  ;;  %vm4038_vm0 = vcmp.eq.f32.partialorder %v4037_v55, 8.507059e+37 }
 0x3f9   : > { %v2035_v24 = vpack.c.bf16 %v1953_v33, %v1952_v30 }
 0x3fa   : > { %v5997_v43 = vpop.eup %5996  ;;  %v4017_v36 = vadd.f32 %v5995_v13, %v4016_v26  ;;  %v5542_v39 = vmul.f32 -1.442695, %v2314_v35 }
 0x3fb   : > { %v5999_v19 = vpop.eup %5998  ;;  %v7484_v41 = vadd.f32 1.0, %v5997_v43 }
 0x3fc   : > { %v4021_v42 = vsel %vm4020_vm13, %v5995_v13, %v4017_v36  ;;  %v4029_v46 = vmul.f32 %v5999_v19, %v7470_v15  ;;  %6000 = vpow2.f32 %v5542_v39  ;;  %2355 = vmatmul.bf16.gmra.mxu2 %v2035_v24  ;;  %v1772_v51 = vpop.f32.mrf.mxu1  ;;  %vm4034_vm15 = vweird.f32 %v5999_v19 }
 0x3fd   : > { %v4026_v62 = vsel %vm4023_vm14, %v4025_v38, %v4021_v42  ;;  %6002 = vrcp.f32 %v7484_v41  ;;  %vm4035_vm2 = vmor %vm4033_vm1, %vm4034_vm15  ;;  %v1773_v13 = vadd.f32 %v7379_v34, %v1772_v51  ;;  %v4052_v25 = vand.u32 2147483647, %v7484_v41  ;;  %v7518_v42 = vpop.f32.mrf.mxu3 }
 0x3fe   : > { %4954 = vst.msk [vmem:[%s6508_s13 + $0x230] sm:$0xff] %vm4883_vm4, %v4026_v62  ;;  %v4030_v49 = vsub.f32 1.0, %v4029_v46  ;;  %v4054_v3 = vand.u32 2147483648, %v7484_v41  ;;  %vm4048_vm5 = vweird.f32 %v7484_v41  ;;  %v1456_v24 = vpack.c.bf16 %v1384_v63, %v1383_v17 }
 0x3ff   : > { %1811 = vmatmul.bf16.gmra.mxu3 %v1455_v45  ;;  %v2316_v56 = vpop.f32.mrf.mxu2  ;;  %v1954_v28 = vmax.f32 %v1773_v13, 0.0  ;;  %vm4053_vm7 = vcmp.eq.f32.partialorder %v4052_v25, 8.507059e+37 }
 0x400   : > { %v4031_v59 = vmul.f32 %v5999_v19, %v4030_v49  ;;  %v2317_v61 = vadd.f32 %v7401_v52, %v2316_v56  ;;  %v4055_v43 = vor.u32 1.1754944e-38, %v4054_v3 }
 0x402   : > { %v6001_v0 = vpop.eup %6000  ;;  %v4032_v37 = vadd.f32 %v5999_v19, %v4031_v59  ;;  %v5543_v1 = vmul.f32 -1.442695, %v2317_v61  ;;  %v1234_v59 = vadd.f32 %v7317_v8, %v7307_v60 }
 0x403   : > { %v6003_v6 = vpop.eup %6002  ;;  %v7498_v12 = vadd.f32 1.0, %v6001_v0 }
 0x404   : > { %v4036_v2 = vsel %vm4035_vm2, %v5999_v19, %v4032_v37  ;;  %v4044_v14 = vmul.f32 %v6003_v6, %v7484_v41  ;;  %6004 = vpow2.f32 %v5543_v1  ;;  %v1774_v15 = vpop.f32.mrf.mxu1  ;;  %vm4049_vm3 = vweird.f32 %v6003_v6 }
 0x405   : > { %v4041_v47 = vsel %vm4038_vm0, %v4040_v10, %v4036_v2  ;;  %6006 = vrcp.f32 %v7498_v12  ;;  %v1775_v23 = vadd.f32 %v7379_v34, %v1774_v15  ;;  %vm4050_vm6 = vmor %vm4048_vm5, %vm4049_vm3  ;;  %v4069_v46 = vand.u32 2147483648, %v7498_v12  ;;  %v7540_v63 = vpop.f32.mrf.mxu3 }
 0x406   : > { %4955 = vst.msk [vmem:[%s6508_s13 + $0x238] sm:$0xff] %vm4883_vm4, %v4041_v47  ;;  %v4045_v32 = vsub.f32 1.0, %v4044_v14  ;;  %v4067_v49 = vand.u32 2147483647, %v7498_v12  ;;  %vm4063_vm9 = vweird.f32 %v7498_v12  ;;  %v1236_v37 = vadd.f32 %v7529_v57, %v7331_v44 }
 0x407   : > { %v2318_v21 = vpop.f32.mrf.mxu2  ;;  %v1955_v29 = vmax.f32 %v1775_v23, 0.0  ;;  %v4070_v1 = vor.u32 1.1754944e-38, %v4069_v46  ;;  %v1385_v13 = vmax.f32 %v1234_v59, 0.0  ;;  %v1239_v46 = vadd.f32 %v7529_v57, %v7350_v11 }
 0x408   : > { %v4046_v9 = vmul.f32 %v6003_v6, %v4045_v32  ;;  %v2319_v27 = vadd.f32 %v7401_v52, %v2318_v21  ;;  %vm4068_vm11 = vcmp.eq.f32.partialorder %v4067_v49, 8.507059e+37  ;;  %v1386_v44 = vmax.f32 %v1236_v37, 0.0 }
 0x409   : > { %v2036_v26 = vpack.c.bf16 %v1955_v29, %v1954_v28 }
 0x40a   : > { %v6005_v30 = vpop.eup %6004  ;;  %v4047_v31 = vadd.f32 %v6003_v6, %v4046_v9  ;;  %v5544_v33 = vmul.f32 -1.442695, %v2319_v27 }
 0x40b   : > { %v6007_v35 = vpop.eup %6006  ;;  %v7512_v36 = vadd.f32 1.0, %v6005_v30 }
 0x40c   : > { %v4051_v39 = vsel %vm4050_vm6, %v6003_v6, %v4047_v31  ;;  %v4059_v19 = vmul.f32 %v6007_v35, %v7498_v12  ;;  %6008 = vpow2.f32 %v5544_v33  ;;  %2360 = vmatmul.bf16.gmra.mxu2 %v2036_v26  ;;  %v1777_v38 = vpop.f32.mrf.mxu1  ;;  %vm4064_vm8 = vweird.f32 %v6007_v35 }
 0x40d   : > { %v4056_v45 = vsel %vm4053_vm7, %v4055_v43, %v4051_v39  ;;  %6010 = vrcp.f32 %v7512_v36  ;;  %vm4065_vm10 = vmor %vm4063_vm9, %vm4064_vm8  ;;  %v1778_v7 = vadd.f32 %v7379_v34, %v1777_v38  ;;  %v4082_v15 = vand.u32 2147483647, %v7512_v36 }
 0x40e   : > { %4956 = vst.msk [vmem:[%s6508_s13 + $0x240] sm:$0xff] %vm4883_vm4, %v4056_v45  ;;  %v4060_v41 = vsub.f32 1.0, %v4059_v19  ;;  %v4084_v47 = vand.u32 2147483648, %v7512_v36  ;;  %vm4078_vm13 = vweird.f32 %v7512_v36  ;;  %v1457_v26 = vpack.c.bf16 %v1386_v44, %v1385_v13 }
 0x40f   : > { %1816 = vmatmul.bf16.gmra.mxu3 %v1456_v24  ;;  %v2321_v51 = vpop.f32.mrf.mxu2  ;;  %v1956_v17 = vmax.f32 %v1778_v7, 0.0  ;;  %vm4083_vm15 = vcmp.eq.f32.partialorder %v4082_v15, 8.507059e+37 }
 0x410   : > { %v4061_v62 = vmul.f32 %v6007_v35, %v4060_v41  ;;  %v2322_v54 = vadd.f32 %v7401_v52, %v2321_v51  ;;  %v4085_v30 = vor.u32 1.1754944e-38, %v4084_v47 }
 0x412   : > { %v6009_v56 = vpop.eup %6008  ;;  %v4062_v55 = vadd.f32 %v6007_v35, %v4061_v62  ;;  %v5545_v61 = vmul.f32 -1.442695, %v2322_v54  ;;  %v1241_v62 = vadd.f32 %v7529_v57, %v7362_v50 }
 0x413   : > { %v6011_v0 = vpop.eup %6010  ;;  %v2910_v6 = vadd.f32 1.0, %v6009_v56 }
 0x414   : > { %v4066_v60 = vsel %vm4065_vm10, %v6007_v35, %v4062_v55  ;;  %v4074_v8 = vmul.f32 %v6011_v0, %v7512_v36  ;;  %6012 = vpow2.f32 %v5545_v61  ;;  %v1779_v10 = vpop.f32.mrf.mxu1  ;;  %vm4079_vm12 = vweird.f32 %v6011_v0 }
 0x415   : > { %v4071_v12 = vsel %vm4068_vm11, %v4070_v1, %v4066_v60  ;;  %6014 = vrcp.f32 %v2910_v6  ;;  %v1780_v14 = vadd.f32 %v7379_v34, %v1779_v10  ;;  %vm4080_vm14 = vmor %vm4078_vm13, %vm4079_vm12  ;;  %v4099_v36 = vand.u32 2147483648, %v2910_v6 }
 0x416   : > { %4957 = vst.msk [vmem:[%s6508_s13 + $0x248] sm:$0xff] %vm4883_vm4, %v4071_v12  ;;  %v4075_v2 = vsub.f32 1.0, %v4074_v8  ;;  %v4097_v38 = vand.u32 2147483647, %v2910_v6  ;;  %vm4093_vm2 = vweird.f32 %v2910_v6  ;;  %v1387_v1 = vmax.f32 %v1239_v46, 0.0 }
 0x417   : > { %v2323_v32 = vpop.f32.mrf.mxu2  ;;  %v1957_v25 = vmax.f32 %v1780_v14, 0.0  ;;  %v4100_v59 = vor.u32 1.1754944e-38, %v4099_v36  ;;  %v1388_v11 = vmax.f32 %v1241_v62, 0.0 }
 0x418   : > { %v4076_v23 = vmul.f32 %v6011_v0, %v4075_v2  ;;  %v2324_v3 = vadd.f32 %v7401_v52, %v2323_v32  ;;  %vm4098_vm3 = vcmp.eq.f32.partialorder %v4097_v38, 8.507059e+37 }
 0x419   : > { %v2037_v9 = vpack.c.bf16 %v1957_v25, %v1956_v17  ;;  %v1458_v47 = vpack.c.bf16 %v1388_v11, %v1387_v1 }
 0x41a   : > { %v6013_v28 = vpop.eup %6012  ;;  %v4077_v21 = vadd.f32 %v6011_v0, %v4076_v23  ;;  %v5546_v29 = vmul.f32 -1.442695, %v2324_v3 }
 0x41b   : > { %v6015_v27 = vpop.eup %6014  ;;  %v2911_v31 = vadd.f32 1.0, %v6013_v28 }
 0x41c   : > { %v4081_v33 = vsel %vm4080_vm14, %v6011_v0, %v4077_v21  ;;  %v4089_v35 = vmul.f32 %v6015_v27, %v2910_v6  ;;  %6016 = vpow2.f32 %v5546_v29  ;;  %2365 = vmatmul.bf16.gmra.mxu2 %v2037_v9  ;;  %vm4094_vm1 = vweird.f32 %v6015_v27 }
 0x41d   : > { %v4086_v43 = vsel %vm4083_vm15, %v4085_v30, %v4081_v33  ;;  %6018 = vrcp.f32 %v2911_v31  ;;  %vm4095_vm0 = vmor %vm4093_vm2, %vm4094_vm1  ;;  %v4112_v50 = vand.u32 2147483647, %v2911_v31  ;;  %v4114_v60 = vand.u32 2147483648, %v2911_v31 }
 0x41e   : > { %4958 = vst.msk [vmem:[%s6508_s13 + $0x250] sm:$0xff] %vm4883_vm4, %v4086_v43  ;;  %v4090_v24 = vsub.f32 1.0, %v4089_v35  ;;  %vm4108_vm6 = vweird.f32 %v2911_v31 }
 0x41f   : > { %1821 = vmatmul.bf16.gmra.mxu3 %v1457_v26  ;;  %v2326_v39 = vpop.f32.mrf.mxu2  ;;  %vm4113_vm8 = vcmp.eq.f32.partialorder %v4112_v50, 8.507059e+37  ;;  %v4115_v32 = vor.u32 1.1754944e-38, %v4114_v60 }
 0x420   : > { %v4091_v19 = vmul.f32 %v6015_v27, %v4090_v24  ;;  %v2327_v45 = vadd.f32 %v7401_v52, %v2326_v39  ;;  %v1244_v24 = vadd.f32 %v7529_v57, %v7370_v20  ;;  %v1246_v39 = vadd.f32 %v7529_v57, %v7382_v48 }
 0x422   : > { %v1782_v41 = vpop.f32.mrf.mxu3  ;;  %v6017_v51 = vpop.eup %6016  ;;  %v4092_v49 = vadd.f32 %v6015_v27, %v4091_v19  ;;  %v5547_v54 = vmul.f32 -1.442695, %v2327_v45  ;;  %v1390_v20 = vmax.f32 %v1246_v39, 0.0 }
 0x423   : > { %v6019_v56 = vpop.eup %6018  ;;  %v2912_v55 = vadd.f32 1.0, %v6017_v51  ;;  %v1783_v10 = vadd.f32 %v7379_v34, %v1782_v41 }
 0x424   : > { %v4096_v61 = vsel %vm4095_vm0, %v6015_v27, %v4092_v49  ;;  %v4104_v0 = vmul.f32 %v6019_v56, %v2911_v31  ;;  %6020 = vpow2.f32 %v5547_v54  ;;  %vm4109_vm5 = vweird.f32 %v6019_v56 }
 0x425   : > { %v4101_v37 = vsel %vm4098_vm3, %v4100_v59, %v4096_v61  ;;  %6022 = vrcp.f32 %v2912_v55  ;;  %vm4110_vm7 = vmor %vm4108_vm6, %vm4109_vm5  ;;  %v1958_v21 = vmax.f32 %v1783_v10, 0.0  ;;  %v4129_v30 = vand.u32 2147483648, %v2912_v55 }
 0x426   : > { %4959 = vst.msk [vmem:[%s6508_s13 + $0x258] sm:$0xff] %vm4883_vm4, %v4101_v37  ;;  %v4105_v7 = vsub.f32 1.0, %v4104_v0  ;;  %v4127_v33 = vand.u32 2147483647, %v2912_v55  ;;  %vm4123_vm10 = vweird.f32 %v2912_v55  ;;  %v1389_v54 = vmax.f32 %v1244_v24, 0.0 }
 0x427   : > { %v2328_v8 = vpop.f32.mrf.mxu2  ;;  %v4130_v41 = vor.u32 1.1754944e-38, %v4129_v30 }
 0x428   : > { %v4106_v6 = vmul.f32 %v6019_v56, %v4105_v7  ;;  %v2329_v12 = vadd.f32 %v7401_v52, %v2328_v8  ;;  %vm4128_vm12 = vcmp.eq.f32.partialorder %v4127_v33, 8.507059e+37  ;;  %v1459_v8 = vpack.c.bf16 %v1390_v20, %v1389_v54 }
 0x42a   : > { %v1784_v13 = vpop.f32.mrf.mxu3  ;;  %v6021_v14 = vpop.eup %6020  ;;  %v4107_v44 = vadd.f32 %v6019_v56, %v4106_v6  ;;  %v5548_v15 = vmul.f32 -1.442695, %v2329_v12 }
 0x42b   : > { %v1785_v2 = vadd.f32 %v7379_v34, %v1784_v13  ;;  %v6023_v17 = vpop.eup %6022  ;;  %v2913_v23 = vadd.f32 1.0, %v6021_v14 }
 0x42c   : > { %v4111_v3 = vsel %vm4110_vm7, %v6019_v56, %v4107_v44  ;;  %v4119_v28 = vmul.f32 %v6023_v17, %v2912_v55  ;;  %6024 = vpow2.f32 %v5548_v15  ;;  %vm4124_vm9 = vweird.f32 %v6023_v17 }
 0x42d   : > { %v1959_v25 = vmax.f32 %v1785_v2, 0.0  ;;  %v4116_v9 = vsel %vm4113_vm8, %v4115_v32, %v4111_v3  ;;  %6026 = vrcp.f32 %v2913_v23  ;;  %vm4125_vm11 = vmor %vm4123_vm10, %vm4124_vm9  ;;  %v4142_v48 = vand.u32 2147483647, %v2913_v23 }
 0x42e   : > { %4960 = vst.msk [vmem:[%s6508_s13 + $0x260] sm:$0xff] %vm4883_vm4, %v4116_v9  ;;  %v4120_v29 = vsub.f32 1.0, %v4119_v28  ;;  %v4144_v59 = vand.u32 2147483648, %v2913_v23  ;;  %vm4138_vm14 = vweird.f32 %v2913_v23 }
 0x42f   : > { %1826 = vmatmul.bf16.gmra.mxu3 %v1458_v47  ;;  %v7558_v27 = vpack.c.bf16 %v1959_v25, %v1958_v21  ;;  %v2331_v31 = vpop.f32.mrf.mxu2  ;;  %vm4143_vm1 = vcmp.eq.f32.partialorder %v4142_v48, 8.507059e+37  ;;  %v1249_v21 = vadd.f32 %v7529_v57, %v7391_v16 }
 0x430   : > { %v4121_v26 = vmul.f32 %v6023_v17, %v4120_v29  ;;  %v2332_v35 = vadd.f32 %v7401_v52, %v2331_v31  ;;  %v4145_v10 = vor.u32 1.1754944e-38, %v4144_v59  ;;  %v1251_v29 = vadd.f32 %v7529_v57, %v7404_v53 }
 0x431   : > { %v1391_v39 = vmax.f32 %v1249_v21, 0.0 }
 0x432   : > { %v1787_v43 = vpop.f32.mrf.mxu3  ;;  %v6025_v36 = vpop.eup %6024  ;;  %v4122_v19 = vadd.f32 %v6023_v17, %v4121_v26  ;;  %v5549_v38 = vmul.f32 -1.442695, %v2332_v35  ;;  %v1392_v16 = vmax.f32 %v1251_v29, 0.0 }
 0x433   : > { %v6027_v45 = vpop.eup %6026  ;;  %v2914_v46 = vadd.f32 1.0, %v6025_v36  ;;  %v1788_v0 = vadd.f32 %v7379_v34, %v1787_v43 }
 0x434   : > { %v4126_v51 = vsel %vm4125_vm11, %v6023_v17, %v4122_v19  ;;  %v4134_v62 = vmul.f32 %v6027_v45, %v2913_v23  ;;  %6028 = vpow2.f32 %v5549_v38  ;;  %vm4139_vm13 = vweird.f32 %v6027_v45 }
 0x435   : > { %v4131_v49 = vsel %vm4128_vm12, %v4130_v41, %v4126_v51  ;;  %6030 = vrcp.f32 %v2914_v46  ;;  %vm4140_vm15 = vmor %vm4138_vm14, %vm4139_vm13  ;;  %v1960_v44 = vmax.f32 %v1788_v0, 0.0  ;;  %v4159_v17 = vand.u32 2147483648, %v2914_v46 }
 0x436   : > { %4961 = vst.msk [vmem:[%s6508_s13 + $0x268] sm:$0xff] %vm4883_vm4, %v4131_v49  ;;  %v4135_v56 = vsub.f32 1.0, %v4134_v62  ;;  %v4157_v25 = vand.u32 2147483647, %v2914_v46  ;;  %vm4153_vm0 = vweird.f32 %v2914_v46  ;;  %v1460_v59 = vpack.c.bf16 %v1392_v16, %v1391_v39 }
 0x437   : > { %v2333_v61 = vpop.f32.mrf.mxu2  ;;  %v4160_v33 = vor.u32 1.1754944e-38, %v4159_v17 }
 0x438   : > { %v4136_v55 = vmul.f32 %v6027_v45, %v4135_v56  ;;  %v2334_v37 = vadd.f32 %v7401_v52, %v2333_v61  ;;  %vm4158_vm5 = vcmp.eq.f32.partialorder %v4157_v25, 8.507059e+37 }
 0x43a   : > { %v1789_v1 = vpop.f32.mrf.mxu3  ;;  %v6029_v7 = vpop.eup %6028  ;;  %v4137_v50 = vadd.f32 %v6027_v45, %v4136_v55  ;;  %v5550_v60 = vmul.f32 -1.442695, %v2334_v37 }
 0x43b   : > { %v1790_v11 = vadd.f32 %v7379_v34, %v1789_v1  ;;  %v6031_v6 = vpop.eup %6030  ;;  %v2915_v12 = vadd.f32 1.0, %v6029_v7 }
 0x43c   : > { %v4141_v2 = vsel %vm4140_vm15, %v6027_v45, %v4137_v50  ;;  %v4149_v14 = vmul.f32 %v6031_v6, %v2914_v46  ;;  %6032 = vpow2.f32 %v5550_v60  ;;  %vm4154_vm2 = vweird.f32 %v6031_v6  ;;  %v7584_v46 = vld [vmem:[%s7834_s4] ss:$0 sm:$0xff] }
 0x43d   : > { %v1961_v13 = vmax.f32 %v1790_v11, 0.0  ;;  %v4146_v15 = vsel %vm4143_vm1, %v4145_v10, %v4141_v2  ;;  %6034 = vrcp.f32 %v2915_v12  ;;  %vm4155_vm3 = vmor %vm4153_vm0, %vm4154_vm2  ;;  %v4172_v53 = vand.u32 2147483647, %v2915_v12 }
 0x43e   : > { %4962 = vst.msk [vmem:[%s6508_s13 + $0x270] sm:$0xff] %vm4883_vm4, %v4146_v15  ;;  %v4150_v34 = vsub.f32 1.0, %v4149_v14  ;;  %v4174_v38 = vand.u32 2147483648, %v2915_v12  ;;  %vm4168_vm7 = vweird.f32 %v2915_v12 }
 0x43f   : > { %1831 = vmatmul.bf16.gmra.mxu3 %v1459_v8  ;;  %v7572_v47 = vpack.c.bf16 %v1961_v13, %v1960_v44  ;;  %v2336_v32 = vpop.f32.mrf.mxu2  ;;  %vm4173_vm9 = vcmp.eq.f32.partialorder %v4172_v53, 8.507059e+37  ;;  %v1254_v44 = vadd.f32 %v7529_v57, %v7412_v22 }
 0x440   : > { %v4151_v23 = vmul.f32 %v6031_v6, %v4150_v34  ;;  %v2337_v3 = vadd.f32 %v7401_v52, %v2336_v32  ;;  %v4175_v55 = vor.u32 1.1754944e-38, %v4174_v38  ;;  %v1256_v34 = vadd.f32 %v7529_v57, %v7427_v4 }
 0x442   : > { %v1792_v28 = vpop.f32.mrf.mxu3  ;;  %v6033_v9 = vpop.eup %6032  ;;  %v4152_v30 = vadd.f32 %v6031_v6, %v4151_v23  ;;  %v5551_v31 = vmul.f32 -1.442695, %v2337_v3  ;;  %v1394_v22 = vmax.f32 %v1256_v34, 0.0 }
 0x443   : > { %v6035_v26 = vpop.eup %6034  ;;  %v2916_v35 = vadd.f32 1.0, %v6033_v9  ;;  %v1793_v51 = vadd.f32 %v7584_v46, %v1792_v28  ;;  %v1393_v9 = vmax.f32 %v1254_v44, 0.0 }
 0x444   : > { %v4156_v43 = vsel %vm4155_vm3, %v6031_v6, %v4152_v30  ;;  %v4164_v24 = vmul.f32 %v6035_v26, %v2915_v12  ;;  %6036 = vpow2.f32 %v5551_v31  ;;  %vm4169_vm6 = vweird.f32 %v6035_v26 }
 0x445   : > { %v4161_v36 = vsel %vm4158_vm5, %v4160_v33, %v4156_v43  ;;  %6038 = vrcp.f32 %v2916_v35  ;;  %vm4170_vm8 = vmor %vm4168_vm7, %vm4169_vm6  ;;  %v1962_v7 = vmax.f32 %v1793_v51, 0.0  ;;  %v4189_v6 = vand.u32 2147483648, %v2916_v35 }
 0x446   : > { %4963 = vst.msk [vmem:[%s6508_s13 + $0x278] sm:$0xff] %vm4883_vm4, %v4161_v36  ;;  %v4165_v19 = vsub.f32 1.0, %v4164_v24  ;;  %v4187_v13 = vand.u32 2147483647, %v2916_v35  ;;  %vm4183_vm11 = vweird.f32 %v2916_v35  ;;  %v1461_v53 = vpack.c.bf16 %v1394_v22, %v1393_v9 }
 0x447   : > { %v2338_v45 = vpop.f32.mrf.mxu2  ;;  %v4190_v25 = vor.u32 1.1754944e-38, %v4189_v6 }
 0x448   : > { %v4166_v41 = vmul.f32 %v6035_v26, %v4165_v19  ;;  %v2339_v62 = vadd.f32 %v7401_v52, %v2338_v45  ;;  %vm4188_vm13 = vcmp.eq.f32.partialorder %v4187_v13, 8.507059e+37 }
 0x44a   : > { %v1794_v49 = vpop.f32.mrf.mxu3  ;;  %v6037_v20 = vpop.eup %6036  ;;  %v4167_v56 = vadd.f32 %v6035_v26, %v4166_v41  ;;  %v5552_v48 = vmul.f32 -1.442695, %v2339_v62 }
 0x44b   : > { %v1795_v54 = vadd.f32 %v7584_v46, %v1794_v49  ;;  %v6039_v61 = vpop.eup %6038  ;;  %v2917_v0 = vadd.f32 1.0, %v6037_v20 }
 0x44c   : > { %v4171_v1 = vsel %vm4170_vm8, %v6035_v26, %v4167_v56  ;;  %v4179_v11 = vmul.f32 %v6039_v61, %v2916_v35  ;;  %6040 = vpow2.f32 %v5552_v48  ;;  %vm4184_vm10 = vweird.f32 %v6039_v61  ;;  %v7604_v35 = vld [vmem:[%s7836_s6] ss:$0 sm:$0xff] }
 0x44d   : > { %v1963_v37 = vmax.f32 %v1795_v54, 0.0  ;;  %v4176_v50 = vsel %vm4173_vm9, %v4175_v55, %v4171_v1  ;;  %6042 = vrcp.f32 %v2917_v0  ;;  %vm4185_vm12 = vmor %vm4183_vm11, %vm4184_vm10  ;;  %v4202_v4 = vand.u32 2147483647, %v2917_v0 }
 0x44e   : > { %4964 = vst.msk [vmem:[%s6508_s13 + $0x280] sm:$0xff] %vm4883_vm4, %v4176_v50  ;;  %v4180_v60 = vsub.f32 1.0, %v4179_v11  ;;  %v4204_v30 = vand.u32 2147483648, %v2917_v0  ;;  %vm4198_vm15 = vweird.f32 %v2917_v0  ;;  %v1259_v11 = vadd.f32 %v7529_v57, %v7448_v18 }
 0x44f   : > { %1836 = vmatmul.bf16.gmra.mxu3 %v1460_v59  ;;  %v7591_v8 = vpack.c.bf16 %v1963_v37, %v1962_v7  ;;  %v2341_v10 = vpop.f32.mrf.mxu2  ;;  %vm4203_vm2 = vcmp.eq.f32.partialorder %v4202_v4, 8.507059e+37  ;;  %v1261_v50 = vadd.f32 %v7529_v57, %v7463_v5 }
 0x450   : > { %v4181_v12 = vmul.f32 %v6039_v61, %v4180_v60  ;;  %v2342_v2 = vadd.f32 %v7401_v52, %v2341_v10  ;;  %v4205_v45 = vor.u32 1.1754944e-38, %v4204_v30 }
 0x451   : > { %v1396_v18 = vmax.f32 %v1261_v50, 0.0 }
 0x452   : > { %v1797_v14 = vpop.f32.mrf.mxu3  ;;  %v6041_v15 = vpop.eup %6040  ;;  %v4182_v17 = vadd.f32 %v6039_v61, %v4181_v12  ;;  %v5553_v32 = vmul.f32 -1.442695, %v2342_v2 }
 0x453   : > { %v6043_v23 = vpop.eup %6042  ;;  %v2918_v3 = vadd.f32 1.0, %v6041_v15  ;;  %v1798_v33 = vadd.f32 %v7584_v46, %v1797_v14  ;;  %v1395_v15 = vmax.f32 %v1259_v11, 0.0 }
 0x454   : > { %v4186_v28 = vsel %vm4185_vm12, %v6039_v61, %v4182_v17  ;;  %v4194_v21 = vmul.f32 %v6043_v23, %v2917_v0  ;;  %6044 = vpow2.f32 %v5553_v32  ;;  %vm4199_vm14 = vweird.f32 %v6043_v23 }
 0x455   : > { %v4191_v52 = vsel %vm4188_vm13, %v4190_v25, %v4186_v28  ;;  %6046 = vrcp.f32 %v2918_v3  ;;  %vm4200_vm1 = vmor %vm4198_vm15, %vm4199_vm14  ;;  %v1964_v54 = vmax.f32 %v1798_v33, 0.0  ;;  %v4219_v59 = vand.u32 2147483648, %v2918_v3 }
 0x456   : > { %4965 = vst.msk [vmem:[%s6508_s13 + $0x288] sm:$0xff] %vm4883_vm4, %v4191_v52  ;;  %v4195_v29 = vsub.f32 1.0, %v4194_v21  ;;  %v4217_v0 = vand.u32 2147483647, %v2918_v3  ;;  %vm4213_vm3 = vweird.f32 %v2918_v3 }
 0x457   : > { %v2343_v31 = vpop.f32.mrf.mxu2  ;;  %v4220_v12 = vor.u32 1.1754944e-38, %v4219_v59 }
 0x458   : > { %v4196_v26 = vmul.f32 %v6043_v23, %v4195_v29  ;;  %v2344_v43 = vadd.f32 %v7604_v35, %v2343_v31  ;;  %vm4218_vm6 = vcmp.eq.f32.partialorder %v4217_v0, 8.507059e+37  ;;  %v1462_v29 = vpack.c.bf16 %v1396_v18, %v1395_v15 }
 0x45a   : > { %v1799_v24 = vpop.f32.mrf.mxu3  ;;  %v6045_v39 = vpop.eup %6044  ;;  %v4197_v16 = vadd.f32 %v6043_v23, %v4196_v26  ;;  %v5554_v19 = vmul.f32 -1.442695, %v2344_v43 }
 0x45b   : > { %v1800_v36 = vadd.f32 %v7584_v46, %v1799_v24  ;;  %v6047_v38 = vpop.eup %6046  ;;  %v2919_v41 = vadd.f32 1.0, %v6045_v39 }
 0x45c   : > { %v4201_v62 = vsel %vm4200_vm1, %v6043_v23, %v4197_v16  ;;  %v4209_v49 = vmul.f32 %v6047_v38, %v2918_v3  ;;  %6048 = vpow2.f32 %v5554_v19  ;;  %vm4214_vm0 = vweird.f32 %v6047_v38 }
 0x45d   : > { %v1965_v51 = vmax.f32 %v1800_v36, 0.0  ;;  %v4206_v20 = vsel %vm4203_vm2, %v4205_v45, %v4201_v62  ;;  %6050 = vrcp.f32 %v2919_v41  ;;  %vm4215_vm5 = vmor %vm4213_vm3, %vm4214_vm0  ;;  %v4232_v5 = vand.u32 2147483647, %v2919_v41 }
 0x45e   : > { %4966 = vst.msk [vmem:[%s6508_s13 + $0x290] sm:$0xff] %vm4883_vm4, %v4206_v20  ;;  %v4210_v56 = vsub.f32 1.0, %v4209_v49  ;;  %v4234_v17 = vand.u32 2147483648, %v2919_v41  ;;  %vm4228_vm8 = vweird.f32 %v2919_v41  ;;  %v1264_v62 = vadd.f32 %v7529_v57, %v7482_v40 }
 0x45f   : > { %1841 = vmatmul.bf16.gmra.mxu3 %v1461_v53  ;;  %v7610_v48 = vpack.c.bf16 %v1965_v51, %v1964_v54  ;;  %v2346_v61 = vpop.f32.mrf.mxu2  ;;  %vm4233_vm10 = vcmp.eq.f32.partialorder %v4232_v5, 8.507059e+37  ;;  %v1266_v54 = vadd.f32 %v7529_v57, %v7502_v58 }
 0x460   : > { %v4211_v55 = vmul.f32 %v6047_v38, %v4210_v56  ;;  %v2347_v37 = vadd.f32 %v7604_v35, %v2346_v61  ;;  %v4235_v30 = vor.u32 1.1754944e-38, %v4234_v17  ;;  %v1397_v11 = vmax.f32 %v1264_v62, 0.0 }
 0x461   : > { %v1398_v40 = vmax.f32 %v1266_v54, 0.0 }
 0x462   : > { %v1802_v1 = vpop.f32.mrf.mxu3  ;;  %v6049_v7 = vpop.eup %6048  ;;  %v4212_v60 = vadd.f32 %v6047_v38, %v4211_v55  ;;  %v5555_v6 = vmul.f32 -1.442695, %v2347_v37 }
 0x463   : > { %v6051_v10 = vpop.eup %6050  ;;  %v2920_v13 = vadd.f32 1.0, %v6049_v7  ;;  %v1803_v25 = vadd.f32 %v7584_v46, %v1802_v1  ;;  %v1463_v18 = vpack.c.bf16 %v1398_v40, %v1397_v11 }
 0x464   : > { %v4216_v2 = vsel %vm4215_vm5, %v6047_v38, %v4212_v60  ;;  %v4224_v14 = vmul.f32 %v6051_v10, %v2919_v41  ;;  %6052 = vpow2.f32 %v5555_v6  ;;  %vm4229_vm7 = vweird.f32 %v6051_v10 }
 0x465   : > { %v4221_v44 = vsel %vm4218_vm6, %v4220_v12, %v4216_v2  ;;  %6054 = vrcp.f32 %v2920_v13  ;;  %vm4230_vm9 = vmor %vm4228_vm8, %vm4229_vm7  ;;  %v1966_v24 = vmax.f32 %v1803_v25, 0.0  ;;  %v4249_v19 = vand.u32 2147483648, %v2920_v13 }
 0x466   : > { %4967 = vst.msk [vmem:[%s6508_s13 + $0x298] sm:$0xff] %vm4883_vm4, %v4221_v44  ;;  %v4225_v34 = vsub.f32 1.0, %v4224_v14  ;;  %v4247_v45 = vand.u32 2147483647, %v2920_v13  ;;  %vm4243_vm12 = vweird.f32 %v2920_v13 }
 0x467   : > { %v2348_v32 = vpop.f32.mrf.mxu2  ;;  %v4250_v61 = vor.u32 1.1754944e-38, %v4249_v19 }
 0x468   : > { %v4226_v23 = vmul.f32 %v6051_v10, %v4225_v34  ;;  %v2349_v3 = vadd.f32 %v7604_v35, %v2348_v32  ;;  %vm4248_vm14 = vcmp.eq.f32.partialorder %v4247_v45, 8.507059e+37 }
 0x46a   : > { %v1804_v28 = vpop.f32.mrf.mxu3  ;;  %v6053_v52 = vpop.eup %6052  ;;  %v4227_v9 = vadd.f32 %v6051_v10, %v4226_v23  ;;  %v5556_v22 = vmul.f32 -1.442695, %v2349_v3 }
 0x46b   : > { %v1805_v21 = vadd.f32 %v7584_v46, %v1804_v28  ;;  %v6055_v4 = vpop.eup %6054  ;;  %v2921_v31 = vadd.f32 1.0, %v6053_v52 }
 0x46c   : > { %v4231_v33 = vsel %vm4230_vm9, %v6051_v10, %v4227_v9  ;;  %v4239_v43 = vmul.f32 %v6055_v4, %v2920_v13  ;;  %6056 = vpow2.f32 %v5556_v22  ;;  %vm4244_vm11 = vweird.f32 %v6055_v4 }
 0x46d   : > { %v1967_v26 = vmax.f32 %v1805_v21, 0.0  ;;  %v4236_v36 = vsel %vm4233_vm10, %v4235_v30, %v4231_v33  ;;  %6058 = vrcp.f32 %v2921_v31  ;;  %vm4245_vm13 = vmor %vm4243_vm12, %vm4244_vm11  ;;  %v4262_v58 = vand.u32 2147483647, %v2921_v31 }
 0x46e   : > { %4968 = vst.msk [vmem:[%s6508_s13 + $0x2a0] sm:$0xff] %vm4883_vm4, %v4236_v36  ;;  %v4240_v39 = vsub.f32 1.0, %v4239_v43  ;;  %v4264_v50 = vand.u32 2147483648, %v2921_v31  ;;  %vm4258_vm1 = vweird.f32 %v2921_v31  ;;  %v1271_v43 = vadd.f32 %v7529_v57, %v7540_v63 }
 0x46f   : > { %1846 = vmatmul.bf16.gmra.mxu3 %v1462_v29  ;;  %v7624_v16 = vpack.c.bf16 %v1967_v26, %v1966_v24  ;;  %v2351_v53 = vpop.f32.mrf.mxu2  ;;  %vm4263_vm0 = vcmp.eq.f32.partialorder %v4262_v58, 8.507059e+37  ;;  %v1269_v26 = vadd.f32 %v7529_v57, %v7518_v42 }
 0x470   : > { %v4241_v38 = vmul.f32 %v6055_v4, %v4240_v39  ;;  %v2352_v41 = vadd.f32 %v7604_v35, %v2351_v53  ;;  %v4265_v5 = vor.u32 1.1754944e-38, %v4264_v50  ;;  %v1400_v42 = vmax.f32 %v1271_v43, 0.0 }
 0x472   : > { %v1807_v51 = vpop.f32.mrf.mxu3  ;;  %v6057_v49 = vpop.eup %6056  ;;  %v4242_v20 = vadd.f32 %v6055_v4, %v4241_v38  ;;  %v5557_v56 = vmul.f32 -1.442695, %v2352_v41 }
 0x473   : > { %v6059_v59 = vpop.eup %6058  ;;  %v2922_v55 = vadd.f32 1.0, %v6057_v49  ;;  %v1808_v10 = vadd.f32 %v7584_v46, %v1807_v51  ;;  %v1399_v51 = vmax.f32 %v1269_v26, 0.0 }
 0x474   : > { %v4246_v0 = vsel %vm4245_vm13, %v6055_v4, %v4242_v20  ;;  %v4254_v37 = vmul.f32 %v6059_v59, %v2921_v31  ;;  %6060 = vpow2.f32 %v5557_v56  ;;  %vm4259_vm15 = vweird.f32 %v6059_v59 }
 0x475   : > { %v4251_v1 = vsel %vm4248_vm14, %v4250_v61, %v4246_v0  ;;  %6062 = vrcp.f32 %v2922_v55  ;;  %vm4260_vm2 = vmor %vm4258_vm1, %vm4259_vm15  ;;  %v1968_v3 = vmax.f32 %v1808_v10, 0.0  ;;  %v4279_v9 = vand.u32 2147483648, %v2922_v55 }
 0x476   : > { %4969 = vst.msk [vmem:[%s6508_s13 + $0x2a8] sm:$0xff] %vm4883_vm4, %v4251_v1  ;;  %v4255_v7 = vsub.f32 1.0, %v4254_v37  ;;  %v4277_v4 = vand.u32 2147483647, %v2922_v55  ;;  %vm4273_vm5 = vweird.f32 %v2922_v55  ;;  %v1464_v1 = vpack.c.bf16 %v1400_v42, %v1399_v51 }
 0x477   : > { %v2353_v60 = vpop.f32.mrf.mxu2  ;;  %v4280_v19 = vor.u32 1.1754944e-38, %v4279_v9 }
 0x478   : > { %v4256_v6 = vmul.f32 %v6059_v59, %v4255_v7  ;;  %v2354_v12 = vadd.f32 %v7604_v35, %v2353_v60  ;;  %vm4278_vm7 = vcmp.eq.f32.partialorder %v4277_v4, 8.507059e+37 }
 0x47a   : > { %v1809_v13 = vpop.f32.mrf.mxu3  ;;  %v6061_v14 = vpop.eup %6060  ;;  %v4257_v44 = vadd.f32 %v6059_v59, %v4256_v6  ;;  %v5558_v15 = vmul.f32 -1.442695, %v2354_v12 }
 0x47b   : > { %v1810_v2 = vadd.f32 %v7584_v46, %v1809_v13  ;;  %v6063_v34 = vpop.eup %6062  ;;  %v2923_v17 = vadd.f32 1.0, %v6061_v14 }
 0x47c   : > { %v4261_v23 = vsel %vm4260_vm2, %v6059_v59, %v4257_v44  ;;  %v4269_v25 = vmul.f32 %v6063_v34, %v2922_v55  ;;  %6064 = vpow2.f32 %v5558_v15  ;;  %vm4274_vm3 = vweird.f32 %v6063_v34 }
 0x47d   : > { %v1969_v32 = vmax.f32 %v1810_v2, 0.0  ;;  %v4266_v28 = vsel %vm4263_vm0, %v4265_v5, %v4261_v23  ;;  %6066 = vrcp.f32 %v2923_v17  ;;  %vm4275_vm6 = vmor %vm4273_vm5, %vm4274_vm3  ;;  %v4292_v57 = vand.u32 2147483647, %v2923_v17 }
 0x47e   : > { %4970 = vst.msk [vmem:[%s6508_s13 + $0x2b0] sm:$0xff] %vm4883_vm4, %v4266_v28  ;;  %v4270_v21 = vsub.f32 1.0, %v4269_v25  ;;  %v4294_v63 = vand.u32 2147483648, %v2923_v17  ;;  %vm4288_vm9 = vweird.f32 %v2923_v17 }
 0x47f   : > { %1851 = vmatmul.bf16.gmra.mxu3 %v1463_v18  ;;  %v7638_v52 = vpack.c.bf16 %v1969_v32, %v1968_v3  ;;  %v2356_v22 = vpop.f32.mrf.mxu2  ;;  %vm4293_vm11 = vcmp.eq.f32.partialorder %v4292_v57, 8.507059e+37 }
 0x480   : > { %v4271_v29 = vmul.f32 %v6063_v34, %v4270_v21  ;;  %v2357_v30 = vadd.f32 %v7604_v35, %v2356_v22  ;;  %v4295_v40 = vor.u32 1.1754944e-38, %v4294_v63 }
 0x482   : > { %v1812_v31 = vpop.f32.mrf.mxu3  ;;  %v6065_v33 = vpop.eup %6064  ;;  %v4272_v24 = vadd.f32 %v6063_v34, %v4271_v29  ;;  %v5559_v36 = vmul.f32 -1.442695, %v2357_v30 }
 0x483   : > { %v6067_v39 = vpop.eup %6066  ;;  %v2924_v53 = vadd.f32 1.0, %v6065_v33  ;;  %v1813_v20 = vadd.f32 %v7584_v46, %v1812_v31 }
 0x484   : > { %v4276_v38 = vsel %vm4275_vm6, %v6063_v34, %v4272_v24  ;;  %v4284_v45 = vmul.f32 %v6067_v39, %v2923_v17  ;;  %6068 = vpow2.f32 %v5559_v36  ;;  %vm4289_vm8 = vweird.f32 %v6067_v39 }
 0x485   : > { %v4281_v41 = vsel %vm4278_vm7, %v4280_v19, %v4276_v38  ;;  %6070 = vrcp.f32 %v2924_v53  ;;  %vm4290_vm10 = vmor %vm4288_vm9, %vm4289_vm8  ;;  %v1970_v6 = vmax.f32 %v1813_v20, 0.0  ;;  %v4309_v2 = vand.u32 2147483648, %v2924_v53 }
 0x486   : > { %4971 = vst.msk [vmem:[%s6508_s13 + $0x2b8] sm:$0xff] %vm4883_vm4, %v4281_v41  ;;  %v4285_v62 = vsub.f32 1.0, %v4284_v45  ;;  %v4307_v15 = vand.u32 2147483647, %v2924_v53  ;;  %vm4303_vm13 = vweird.f32 %v2924_v53 }
 0x487   : > { %v2358_v49 = vpop.f32.mrf.mxu2  ;;  %v4310_v25 = vor.u32 1.1754944e-38, %v4309_v2 }
 0x488   : > { %v4286_v54 = vmul.f32 %v6067_v39, %v4285_v62  ;;  %v2359_v56 = vadd.f32 %v7604_v35, %v2358_v49  ;;  %vm4308_vm15 = vcmp.eq.f32.partialorder %v4307_v15, 8.507059e+37 }
 0x48a   : > { %v1814_v59 = vpop.f32.mrf.mxu3  ;;  %v6069_v55 = vpop.eup %6068  ;;  %v4287_v0 = vadd.f32 %v6067_v39, %v4286_v54  ;;  %v5560_v37 = vmul.f32 -1.442695, %v2359_v56 }
 0x48b   : > { %v1815_v61 = vadd.f32 %v7584_v46, %v1814_v59  ;;  %v6071_v11 = vpop.eup %6070  ;;  %v2925_v7 = vadd.f32 1.0, %v6069_v55 }
 0x48c   : > { %v4291_v50 = vsel %vm4290_vm10, %v6067_v39, %v4287_v0  ;;  %v4299_v60 = vmul.f32 %v6071_v11, %v2924_v53  ;;  %6072 = vpow2.f32 %v5560_v37  ;;  %vm4304_vm12 = vweird.f32 %v6071_v11 }
 0x48d   : > { %v1971_v58 = vmax.f32 %v1815_v61, 0.0  ;;  %v4296_v10 = vsel %vm4293_vm11, %v4295_v40, %v4291_v50  ;;  %6074 = vrcp.f32 %v2925_v7  ;;  %vm4305_vm14 = vmor %vm4303_vm13, %vm4304_vm12  ;;  %v4322_v29 = vand.u32 2147483647, %v2925_v7 }
 0x48e   : > { %4972 = vst.msk [vmem:[%s6508_s13 + $0x2c0] sm:$0xff] %vm4883_vm4, %v4296_v10  ;;  %v4300_v12 = vsub.f32 1.0, %v4299_v60  ;;  %v4324_v4 = vand.u32 2147483648, %v2925_v7  ;;  %vm4318_vm2 = vweird.f32 %v2925_v7 }
 0x48f   : > { %1856 = vmatmul.bf16.gmra.mxu3 %v1464_v1  ;;  %v7652_v13 = vpack.c.bf16 %v1971_v58, %v1970_v6  ;;  %v2361_v14 = vpop.f32.mrf.mxu2  ;;  %vm4323_vm3 = vcmp.eq.f32.partialorder %v4322_v29, 8.507059e+37 }
 0x490   : > { %v4301_v44 = vmul.f32 %v6071_v11, %v4300_v12  ;;  %v2362_v18 = vadd.f32 %v7604_v35, %v2361_v14  ;;  %v4325_v38 = vor.u32 1.1754944e-38, %v4324_v4 }
 0x492   : > { %v1817_v34 = vpop.f32.mrf.mxu3  ;;  %v6073_v5 = vpop.eup %6072  ;;  %v4302_v17 = vadd.f32 %v6071_v11, %v4301_v44  ;;  %v5561_v32 = vmul.f32 -1.442695, %v2362_v18 }
 0x493   : > { %v6075_v23 = vpop.eup %6074  ;;  %v2926_v3 = vadd.f32 1.0, %v6073_v5  ;;  %v1818_v26 = vadd.f32 %v7584_v46, %v1817_v34 }
 0x494   : > { %v4306_v28 = vsel %vm4305_vm14, %v6071_v11, %v4302_v17  ;;  %v4314_v21 = vmul.f32 %v6075_v23, %v2925_v7  ;;  %6076 = vpow2.f32 %v5561_v32  ;;  %vm4319_vm1 = vweird.f32 %v6075_v23 }
 0x495   : > { %v4311_v9 = vsel %vm4308_vm15, %v4310_v25, %v4306_v28  ;;  %6078 = vrcp.f32 %v2926_v3  ;;  %vm4320_vm0 = vmor %vm4318_vm2, %vm4319_vm1  ;;  %v1972_v62 = vmax.f32 %v1818_v26, 0.0  ;;  %v4339_v54 = vand.u32 2147483648, %v2926_v3 }
 0x496   : > { %4973 = vst.msk [vmem:[%s6508_s13 + $0x2c8] sm:$0xff] %vm4883_vm4, %v4311_v9  ;;  %v4315_v22 = vsub.f32 1.0, %v4314_v21  ;;  %v4337_v59 = vand.u32 2147483647, %v2926_v3  ;;  %vm4333_vm6 = vweird.f32 %v2926_v3 }
 0x497   : > { %v2363_v30 = vpop.f32.mrf.mxu2 }
 0x498   : > { %v4316_v31 = vmul.f32 %v6075_v23, %v4315_v22  ;;  %v2364_v33 = vadd.f32 %v7604_v35, %v2363_v30  ;;  %vm4338_vm8 = vcmp.eq.f32.partialorder %v4337_v59, 8.507059e+37 }
 0x49a   : > { %v1819_v43 = vpop.f32.mrf.mxu3  ;;  %v6077_v36 = vpop.eup %6076  ;;  %v4317_v39 = vadd.f32 %v6075_v23, %v4316_v31  ;;  %v5562_v19 = vmul.f32 -1.442695, %v2364_v33 }
 0x49b   : > { %v1820_v24 = vadd.f32 %v7584_v46, %v1819_v43  ;;  %v6079_v53 = vpop.eup %6078  ;;  %v2927_v45 = vadd.f32 1.0, %v6077_v36 }
 0x49c   : > { %v4321_v51 = vsel %vm4320_vm0, %v6075_v23, %v4317_v39  ;;  %v4329_v42 = vmul.f32 %v6079_v53, %v2926_v3  ;;  %6080 = vpow2.f32 %v5562_v19  ;;  %vm4334_vm5 = vweird.f32 %v6079_v53 }
 0x49d   : > { %v1973_v41 = vmax.f32 %v1820_v24, 0.0  ;;  %v4326_v57 = vsel %vm4323_vm3, %v4325_v38, %v4321_v51  ;;  %6082 = vrcp.f32 %v2927_v45  ;;  %vm4335_vm7 = vmor %vm4333_vm6, %vm4334_vm5  ;;  %v4352_v6 = vand.u32 2147483647, %v2927_v45 }
 0x49e   : > { %4974 = vst.msk [vmem:[%s6508_s13 + $0x2d0] sm:$0xff] %vm4883_vm4, %v4326_v57  ;;  %v4330_v63 = vsub.f32 1.0, %v4329_v42  ;;  %v4354_v10 = vand.u32 2147483648, %v2927_v45  ;;  %vm4348_vm10 = vweird.f32 %v2927_v45 }
 0x49f   : > { %2370 = vmatmul.bf16.vlgmr.msra.gmra.mxu3 %v7558_v27  ;;  %v7663_v49 = vpack.c.bf16 %v1973_v41, %v1972_v62  ;;  %v2366_v20 = vpop.f32.mrf.mxu2  ;;  %v4340_v27 = vor.u32 1.1754944e-38, %v4339_v54  ;;  %vm4353_vm12 = vcmp.eq.f32.partialorder %v4352_v6, 8.507059e+37 }
 0x4a0   : > { %v4331_v56 = vmul.f32 %v6079_v53, %v4330_v63  ;;  %v2367_v61 = vadd.f32 %v7604_v35, %v2366_v20  ;;  %v4355_v23 = vor.u32 1.1754944e-38, %v4354_v10 }
 0x4a2   : > { %v1822_v55 = vpop.f32.mrf.mxu3  ;;  %v6081_v0 = vpop.eup %6080  ;;  %v4332_v37 = vadd.f32 %v6079_v53, %v4331_v56  ;;  %v5563_v1 = vmul.f32 -1.442695, %v2367_v61 }
 0x4a3   : > { %v6083_v11 = vpop.eup %6082  ;;  %v2928_v40 = vadd.f32 1.0, %v6081_v0  ;;  %v1823_v14 = vadd.f32 %v7584_v46, %v1822_v55 }
 0x4a4   : > { %v4336_v7 = vsel %vm4335_vm7, %v6079_v53, %v4332_v37  ;;  %v4344_v58 = vmul.f32 %v6083_v11, %v2927_v45  ;;  %6084 = vpow2.f32 %v5563_v1  ;;  %vm4349_vm9 = vweird.f32 %v6083_v11 }
 0x4a5   : > { %v4341_v50 = vsel %vm4338_vm8, %v4340_v27, %v4336_v7  ;;  %6086 = vrcp.f32 %v2928_v40  ;;  %vm4350_vm11 = vmor %vm4348_vm10, %vm4349_vm9  ;;  %v1974_v9 = vmax.f32 %v1823_v14, 0.0  ;;  %v4369_v30 = vand.u32 2147483648, %v2928_v40 }
 0x4a6   : > { %4975 = vst.msk [vmem:[%s6508_s13 + $0x2d8] sm:$0xff] %vm4883_vm4, %v4341_v50  ;;  %v4345_v60 = vsub.f32 1.0, %v4344_v58  ;;  %v4367_v26 = vand.u32 2147483647, %v2928_v40  ;;  %vm4363_vm14 = vweird.f32 %v2928_v40 }
 0x4a7   : > { %v2368_v12 = vpop.f32.mrf.mxu2  ;;  %v4370_v39 = vor.u32 1.1754944e-38, %v4369_v30 }
 0x4a8   : > { %v4346_v2 = vmul.f32 %v6083_v11, %v4345_v60  ;;  %v2369_v44 = vadd.f32 %v7604_v35, %v2368_v12  ;;  %vm4368_vm1 = vcmp.eq.f32.partialorder %v4367_v26, 8.507059e+37 }
 0x4aa   : > { %v1824_v15 = vpop.f32.mrf.mxu3  ;;  %v6085_v34 = vpop.eup %6084  ;;  %v4347_v5 = vadd.f32 %v6083_v11, %v4346_v2  ;;  %v5564_v17 = vmul.f32 -1.442695, %v2369_v44 }
 0x4ab   : > { %v1825_v18 = vadd.f32 %v7584_v46, %v1824_v15  ;;  %v6087_v32 = vpop.eup %6086  ;;  %v2929_v25 = vadd.f32 1.0, %v6085_v34 }
 0x4ac   : > { %v4351_v28 = vsel %vm4350_vm11, %v6083_v11, %v4347_v5  ;;  %v4359_v21 = vmul.f32 %v6087_v32, %v2928_v40  ;;  %6088 = vpow2.f32 %v5564_v17  ;;  %vm4364_vm13 = vweird.f32 %v6087_v32 }
 0x4ad   : > { %v1975_v3 = vmax.f32 %v1825_v18, 0.0  ;;  %v4356_v22 = vsel %vm4353_vm12, %v4355_v23, %v4351_v28  ;;  %6090 = vrcp.f32 %v2929_v25  ;;  %vm4365_vm15 = vmor %vm4363_vm14, %vm4364_vm13  ;;  %v4384_v41 = vand.u32 2147483648, %v2929_v25 }
 0x4ae   : > { %4976 = vst.msk [vmem:[%s6508_s13 + $0x2e0] sm:$0xff] %vm4883_vm4, %v4356_v22  ;;  %v4360_v29 = vsub.f32 1.0, %v4359_v21  ;;  %v4382_v62 = vand.u32 2147483647, %v2929_v25  ;;  %vm4378_vm0 = vweird.f32 %v2929_v25 }
 0x4af   : > { %2375 = vmatmul.bf16.gmra.mxu3 %v7572_v47  ;;  %v7674_v4 = vpack.c.bf16 %v1975_v3, %v1974_v9  ;;  %v4385_v56 = vor.u32 1.1754944e-38, %v4384_v41 }
 0x4b0   : > { %v4361_v31 = vmul.f32 %v6087_v32, %v4360_v29  ;;  %vm4383_vm5 = vcmp.eq.f32.partialorder %v4382_v62, 8.507059e+37 }
 0x4b2   : > { %v1827_v33 = vpop.f32.mrf.mxu3  ;;  %v6089_v43 = vpop.eup %6088  ;;  %v4362_v24 = vadd.f32 %v6087_v32, %v4361_v31 }
 0x4b3   : > { %v6091_v36 = vpop.eup %6090  ;;  %v2930_v19 = vadd.f32 1.0, %v6089_v43  ;;  %v1828_v51 = vadd.f32 %v7584_v46, %v1827_v33 }
 0x4b4   : > { %v4366_v53 = vsel %vm4365_vm15, %v6087_v32, %v4362_v24  ;;  %v4374_v47 = vmul.f32 %v6091_v36, %v2929_v25  ;;  %vm4379_vm2 = vweird.f32 %v6091_v36 }
 0x4b5   : > { %v4371_v38 = vsel %vm4368_vm1, %v4370_v39, %v4366_v53  ;;  %6092 = vrcp.f32 %v2930_v19  ;;  %vm4380_vm3 = vmor %vm4378_vm0, %vm4379_vm2  ;;  %v1976_v59 = vmax.f32 %v1828_v51, 0.0  ;;  %v4399_v27 = vand.u32 2147483648, %v2930_v19 }
 0x4b6   : > { %4977 = vst.msk [vmem:[%s6508_s13 + $0x2e8] sm:$0xff] %vm4883_vm4, %v4371_v38  ;;  %v4375_v45 = vsub.f32 1.0, %v4374_v47  ;;  %v4397_v7 = vand.u32 2147483647, %v2930_v19  ;;  %vm4393_vm7 = vweird.f32 %v2930_v19 }
 0x4b7   : > { %v4400_v60 = vor.u32 1.1754944e-38, %v4399_v27 }
 0x4b8   : > { %v4376_v42 = vmul.f32 %v6091_v36, %v4375_v45  ;;  %vm4398_vm9 = vcmp.eq.f32.partialorder %v4397_v7, 8.507059e+37 }
 0x4ba   : > { %v1829_v57 = vpop.f32.mrf.mxu3  ;;  %v4377_v54 = vadd.f32 %v6091_v36, %v4376_v42 }
 0x4bb   : > { %v1830_v63 = vadd.f32 %v7584_v46, %v1829_v57  ;;  %v6093_v20 = vpop.eup %6092 }
 0x4bc   : > { %v4381_v55 = vsel %vm4380_vm3, %v6091_v36, %v4377_v54  ;;  %v4389_v0 = vmul.f32 %v6093_v20, %v2930_v19  ;;  %vm4394_vm6 = vweird.f32 %v6093_v20 }
 0x4bd   : > { %v1977_v61 = vmax.f32 %v1830_v63, 0.0  ;;  %v4386_v37 = vsel %vm4383_vm5, %v4385_v56, %v4381_v55  ;;  %vm4395_vm8 = vmor %vm4393_vm7, %vm4394_vm6 }
 0x4be   : > { %4978 = vst.msk [vmem:[%s6508_s13 + $0x2f0] sm:$0xff] %vm4883_vm4, %v4386_v37  ;;  %v4390_v11 = vsub.f32 1.0, %v4389_v0 }
 0x4bf   : > { %2380 = vmatmul.bf16.gmra.mxu3 %v7591_v8  ;;  %v7681_v1 = vpack.c.bf16 %v1977_v61, %v1976_v59 }
 0x4c0   : > { %v4391_v40 = vmul.f32 %v6093_v20, %v4390_v11 }
 0x4c2   : > { %v1832_v58 = vpop.f32.mrf.mxu3  ;;  %v4392_v50 = vadd.f32 %v6093_v20, %v4391_v40 }
 0x4c3   : > { %v1833_v8 = vadd.f32 %v7584_v46, %v1832_v58 }
 0x4c4   : > { %v4396_v6 = vsel %vm4395_vm8, %v6093_v20, %v4392_v50 }
 0x4c5   : > { %v4401_v10 = vsel %vm4398_vm9, %v4400_v60, %v4396_v6  ;;  %v1978_v14 = vmax.f32 %v1833_v8, 0.0 }
 0x4c6   : > { %4979 = vst.msk [vmem:[%s6508_s13 + $0x2f8] sm:$0xff] %vm4883_vm4, %v4401_v10 }
 0x4ca   : > { %v1834_v12 = vpop.f32.mrf.mxu3 }
 0x4cb   : > { %v1835_v2 = vadd.f32 %v7584_v46, %v1834_v12 }
 0x4cd   : > { %v1979_v44 = vmax.f32 %v1835_v2, 0.0 }
 0x4cf   : > { %2385 = vmatmul.bf16.gmra.mxu3 %v7610_v48  ;;  %v7690_v15 = vpack.c.bf16 %v1979_v44, %v1978_v14 }
 0x4d2   : > { %v1837_v18 = vpop.f32.mrf.mxu3 }
 0x4d3   : > { %v1838_v34 = vadd.f32 %v7584_v46, %v1837_v18 }
 0x4d5   : > { %v1980_v32 = vmax.f32 %v1838_v34, 0.0 }
 0x4da   : > { %v1839_v5 = vpop.f32.mrf.mxu3 }
 0x4db   : > { %v1840_v17 = vadd.f32 %v7584_v46, %v1839_v5 }
 0x4dd   : > { %v1981_v23 = vmax.f32 %v1840_v17, 0.0 }
 0x4df   : > { %2390 = vmatmul.bf16.gmra.mxu3 %v7624_v16  ;;  %v7695_v25 = vpack.c.bf16 %v1981_v23, %v1980_v32 }
 0x4e2   : > { %v1842_v3 = vpop.f32.mrf.mxu3 }
 0x4e3   : > { %v1843_v28 = vadd.f32 %v7584_v46, %v1842_v3 }
 0x4e5   : > { %v1982_v9 = vmax.f32 %v1843_v28, 0.0 }
 0x4ea   : > { %v1844_v21 = vpop.f32.mrf.mxu3 }
 0x4eb   : > { %v1845_v48 = vadd.f32 %v7584_v46, %v1844_v21 }
 0x4ed   : > { %v1983_v22 = vmax.f32 %v1845_v48, 0.0 }
 0x4ef   : > { %2395 = vmatmul.bf16.gmra.mxu3 %v7638_v52  ;;  %v7700_v29 = vpack.c.bf16 %v1983_v22, %v1982_v9 }
 0x4f2   : > { %v1847_v30 = vpop.f32.mrf.mxu3 }
 0x4f3   : > { %v1848_v31 = vadd.f32 %v7584_v46, %v1847_v30 }
 0x4f5   : > { %v1984_v33 = vmax.f32 %v1848_v31, 0.0 }
 0x4fa   : > { %v1849_v26 = vpop.f32.mrf.mxu3 }
 0x4fb   : > { %v1850_v16 = vadd.f32 %v7584_v46, %v1849_v26 }
 0x4fd   : > { %v1985_v43 = vmax.f32 %v1850_v16, 0.0 }
 0x4ff   : > { %2400 = vmatmul.bf16.gmra.mxu3 %v7652_v13  ;;  %v7705_v24 = vpack.c.bf16 %v1985_v43, %v1984_v33 }
 0x502   : > { %v1852_v36 = vpop.f32.mrf.mxu3 }
 0x503   : > { %v1853_v39 = vadd.f32 %v7584_v46, %v1852_v36 }
 0x505   : > { %v1986_v53 = vmax.f32 %v1853_v39, 0.0 }
 0x50a   : > { %v1854_v19 = vpop.f32.mrf.mxu3 }
 0x50b   : > { %v1855_v52 = vadd.f32 %v7584_v46, %v1854_v19 }
 0x50d   : > { %v1987_v47 = vmax.f32 %v1855_v52, 0.0 }
 0x50f   : > { %2405 = vmatmul.bf16.gmra.mxu3 %v7663_v49  ;;  %v7710_v38 = vpack.c.bf16 %v1987_v47, %v1986_v53 }
 0x512   : > { %v1857_v45 = vpop.f32.mrf.mxu3 }
 0x513   : > { %v1858_v41 = vadd.f32 %v7584_v46, %v1857_v45 }
 0x515   : > { %v1988_v42 = vmax.f32 %v1858_v41, 0.0 }
 0x51a   : > { %v1859_v51 = vpop.f32.mrf.mxu3 }
 0x51b   : > { %v1860_v13 = vadd.f32 %v7584_v46, %v1859_v51 }
 0x51d   : > { %v1989_v62 = vmax.f32 %v1860_v13, 0.0 }
 0x51f   : > { %2410 = vmatmul.bf16.gmra.mxu3 %v7674_v4  ;;  %v7715_v57 = vpack.c.bf16 %v1989_v62, %v1988_v42 }
 0x522   : > { %v2371_v63 = vpop.f32.mrf.mxu3 }
 0x523   : > { %v2372_v54 = vadd.f32 %v7604_v35, %v2371_v63 }
 0x525   : > { %v5565_v20 = vmul.f32 -1.442695, %v2372_v54 }
 0x527   : > { %6094 = vpow2.f32 %v5565_v20 }
 0x52a   : > { %v2373_v49 = vpop.f32.mrf.mxu3 }
 0x52b   : > { %v2374_v56 = vadd.f32 %v7604_v35, %v2373_v49 }
 0x52d   : > { %v6095_v59 = vpop.eup %6094  ;;  %v5566_v61 = vmul.f32 -1.442695, %v2374_v56 }
 0x52e   : > { %v2931_v55 = vadd.f32 1.0, %v6095_v59 }
 0x52f   : > { %6096 = vpow2.f32 %v5566_v61  ;;  %2415 = vmatmul.bf16.gmra.mxu3 %v7681_v1 }
 0x530   : > { %6098 = vrcp.f32 %v2931_v55  ;;  %v4414_v58 = vand.u32 2147483648, %v2931_v55  ;;  %v4412_v6 = vand.u32 2147483647, %v2931_v55  ;;  %vm4408_vm11 = vweird.f32 %v2931_v55 }
 0x532   : > { %v2376_v46 = vpop.f32.mrf.mxu3  ;;  %v4415_v14 = vor.u32 1.1754944e-38, %v4414_v58  ;;  %vm4413_vm13 = vcmp.eq.f32.partialorder %v4412_v6, 8.507059e+37 }
 0x533   : > { %v2377_v4 = vadd.f32 %v7604_v35, %v2376_v46 }
 0x535   : > { %v6097_v0 = vpop.eup %6096  ;;  %v5567_v37 = vmul.f32 -1.442695, %v2377_v4 }
 0x536   : > { %v6099_v11 = vpop.eup %6098  ;;  %v2932_v27 = vadd.f32 1.0, %v6097_v0 }
 0x537   : > { %v4404_v40 = vmul.f32 %v6099_v11, %v2931_v55  ;;  %6100 = vpow2.f32 %v5567_v37  ;;  %vm4409_vm10 = vweird.f32 %v6099_v11 }
 0x538   : > { %6102 = vrcp.f32 %v2932_v27  ;;  %vm4410_vm12 = vmor %vm4408_vm11, %vm4409_vm10  ;;  %v4429_v32 = vand.u32 2147483648, %v2932_v27  ;;  %v4427_v28 = vand.u32 2147483647, %v2932_v27  ;;  %vm4423_vm15 = vweird.f32 %v2932_v27 }
 0x539   : > { %v4405_v7 = vsub.f32 1.0, %v4404_v40 }
 0x53a   : > { %v2378_v50 = vpop.f32.mrf.mxu3  ;;  %vm4428_vm2 = vcmp.eq.f32.partialorder %v4427_v28, 8.507059e+37 }
 0x53b   : > { %v4406_v60 = vmul.f32 %v6099_v11, %v4405_v7  ;;  %v2379_v10 = vadd.f32 %v7604_v35, %v2378_v50 }
 0x53d   : > { %v6101_v1 = vpop.eup %6100  ;;  %v4407_v8 = vadd.f32 %v6099_v11, %v4406_v60  ;;  %v5568_v12 = vmul.f32 -1.442695, %v2379_v10  ;;  %v7738_v10 = vld [vmem:[%s7836_s6] ss:$0 sm:$0xff] }
 0x53e   : > { %v6103_v2 = vpop.eup %6102  ;;  %v2933_v44 = vadd.f32 1.0, %v6101_v1 }
 0x53f   : > { %v4411_v18 = vsel %vm4410_vm12, %v6099_v11, %v4407_v8  ;;  %v4419_v34 = vmul.f32 %v6103_v2, %v2932_v27  ;;  %6104 = vpow2.f32 %v5568_v12  ;;  %2420 = vmatmul.bf16.gmra.mxu3 %v7690_v15  ;;  %vm4424_vm14 = vweird.f32 %v6103_v2 }
 0x540   : > { %v4416_v5 = vsel %vm4413_vm13, %v4415_v14, %v4411_v18  ;;  %6106 = vrcp.f32 %v2933_v44  ;;  %vm4425_vm1 = vmor %vm4423_vm15, %vm4424_vm14  ;;  %v4430_v15 = vor.u32 1.1754944e-38, %v4429_v32  ;;  %v4444_v36 = vand.u32 2147483648, %v2933_v44 }
 0x541   : > { %4980 = vst.msk [vmem:[%s6508_s13 + $0x300] sm:$0xff] %vm4883_vm4, %v4416_v5  ;;  %v4420_v17 = vsub.f32 1.0, %v4419_v34  ;;  %v4442_v52 = vand.u32 2147483647, %v2933_v44  ;;  %vm4438_vm3 = vweird.f32 %v2933_v44 }
 0x542   : > { %v2381_v23 = vpop.f32.mrf.mxu3  ;;  %v4445_v13 = vor.u32 1.1754944e-38, %v4444_v36 }
 0x543   : > { %v4421_v3 = vmul.f32 %v6103_v2, %v4420_v17  ;;  %v2382_v21 = vadd.f32 %v7604_v35, %v2381_v23  ;;  %vm4443_vm6 = vcmp.eq.f32.partialorder %v4442_v52, 8.507059e+37 }
 0x545   : > { %v6105_v48 = vpop.eup %6104  ;;  %v4422_v9 = vadd.f32 %v6103_v2, %v4421_v3  ;;  %v5569_v22 = vmul.f32 -1.442695, %v2382_v21 }
 0x546   : > { %v6107_v30 = vpop.eup %6106  ;;  %v2934_v31 = vadd.f32 1.0, %v6105_v48 }
 0x547   : > { %v4426_v26 = vsel %vm4425_vm1, %v6103_v2, %v4422_v9  ;;  %v4434_v16 = vmul.f32 %v6107_v30, %v2933_v44  ;;  %6108 = vpow2.f32 %v5569_v22  ;;  %vm4439_vm0 = vweird.f32 %v6107_v30 }
 0x548   : > { %v4431_v33 = vsel %vm4428_vm2, %v4430_v15, %v4426_v26  ;;  %6110 = vrcp.f32 %v2934_v31  ;;  %vm4440_vm5 = vmor %vm4438_vm3, %vm4439_vm0  ;;  %v4459_v49 = vand.u32 2147483648, %v2934_v31  ;;  %v4457_v61 = vand.u32 2147483647, %v2934_v31 }
 0x549   : > { %4981 = vst.msk [vmem:[%s6508_s13 + $0x308] sm:$0xff] %vm4883_vm4, %v4431_v33  ;;  %v4435_v43 = vsub.f32 1.0, %v4434_v16  ;;  %vm4453_vm8 = vweird.f32 %v2934_v31 }
 0x54a   : > { %v2383_v39 = vpop.f32.mrf.mxu3  ;;  %vm4458_vm10 = vcmp.eq.f32.partialorder %v4457_v61, 8.507059e+37 }
 0x54b   : > { %v4436_v19 = vmul.f32 %v6107_v30, %v4435_v43  ;;  %v2384_v53 = vadd.f32 %v7604_v35, %v2383_v39 }
 0x54d   : > { %v6109_v47 = vpop.eup %6108  ;;  %v4437_v45 = vadd.f32 %v6107_v30, %v4436_v19  ;;  %v5570_v41 = vmul.f32 -1.442695, %v2384_v53 }
 0x54e   : > { %v6111_v51 = vpop.eup %6110  ;;  %v2935_v42 = vadd.f32 1.0, %v6109_v47 }
 0x54f   : > { %v4441_v62 = vsel %vm4440_vm5, %v6107_v30, %v4437_v45  ;;  %v4449_v63 = vmul.f32 %v6111_v51, %v2934_v31  ;;  %6112 = vpow2.f32 %v5570_v41  ;;  %2425 = vmatmul.bf16.gmra.mxu3 %v7695_v25  ;;  %vm4454_vm7 = vweird.f32 %v6111_v51 }
 0x550   : > { %v4446_v54 = vsel %vm4443_vm6, %v4445_v13, %v4441_v62  ;;  %6114 = vrcp.f32 %v2935_v42  ;;  %vm4455_vm9 = vmor %vm4453_vm8, %vm4454_vm7  ;;  %v4460_v25 = vor.u32 1.1754944e-38, %v4459_v49  ;;  %v4474_v50 = vand.u32 2147483648, %v2935_v42 }
 0x551   : > { %4982 = vst.msk [vmem:[%s6508_s13 + $0x310] sm:$0xff] %vm4883_vm4, %v4446_v54  ;;  %v4450_v20 = vsub.f32 1.0, %v4449_v63  ;;  %v4472_v6 = vand.u32 2147483647, %v2935_v42  ;;  %vm4468_vm12 = vweird.f32 %v2935_v42 }
 0x552   : > { %v2386_v56 = vpop.f32.mrf.mxu3  ;;  %v4475_v44 = vor.u32 1.1754944e-38, %v4474_v50 }
 0x553   : > { %v4451_v59 = vmul.f32 %v6111_v51, %v4450_v20  ;;  %v2387_v55 = vadd.f32 %v7604_v35, %v2386_v56  ;;  %vm4473_vm14 = vcmp.eq.f32.partialorder %v4472_v6, 8.507059e+37 }
 0x555   : > { %v6113_v46 = vpop.eup %6112  ;;  %v4452_v4 = vadd.f32 %v6111_v51, %v4451_v59  ;;  %v5571_v0 = vmul.f32 -1.442695, %v2387_v55 }
 0x556   : > { %v6115_v37 = vpop.eup %6114  ;;  %v2936_v11 = vadd.f32 1.0, %v6113_v46 }
 0x557   : > { %v4456_v27 = vsel %vm4455_vm9, %v6111_v51, %v4452_v4  ;;  %v4464_v40 = vmul.f32 %v6115_v37, %v2935_v42  ;;  %6116 = vpow2.f32 %v5571_v0  ;;  %vm4469_vm11 = vweird.f32 %v6115_v37 }
 0x558   : > { %v4461_v7 = vsel %vm4458_vm10, %v4460_v25, %v4456_v27  ;;  %6118 = vrcp.f32 %v2936_v11  ;;  %vm4470_vm13 = vmor %vm4468_vm12, %vm4469_vm11  ;;  %v4489_v23 = vand.u32 2147483648, %v2936_v11  ;;  %v4487_v21 = vand.u32 2147483647, %v2936_v11 }
 0x559   : > { %4983 = vst.msk [vmem:[%s6508_s13 + $0x318] sm:$0xff] %vm4883_vm4, %v4461_v7  ;;  %v4465_v58 = vsub.f32 1.0, %v4464_v40  ;;  %vm4483_vm1 = vweird.f32 %v2936_v11 }
 0x55a   : > { %v2388_v60 = vpop.f32.mrf.mxu3  ;;  %vm4488_vm0 = vcmp.eq.f32.partialorder %v4487_v21, 8.507059e+37 }
 0x55b   : > { %v4466_v35 = vmul.f32 %v6115_v37, %v4465_v58  ;;  %v2389_v1 = vadd.f32 %v7738_v10, %v2388_v60 }
 0x55d   : > { %v6117_v8 = vpop.eup %6116  ;;  %v4467_v12 = vadd.f32 %v6115_v37, %v4466_v35  ;;  %v5572_v2 = vmul.f32 -1.442695, %v2389_v1 }
 0x55e   : > { %v6119_v14 = vpop.eup %6118  ;;  %v2937_v18 = vadd.f32 1.0, %v6117_v8 }
 0x55f   : > { %v4471_v34 = vsel %vm4470_vm13, %v6115_v37, %v4467_v12  ;;  %v4479_v5 = vmul.f32 %v6119_v14, %v2936_v11  ;;  %6120 = vpow2.f32 %v5572_v2  ;;  %2430 = vmatmul.bf16.gmra.mxu3 %v7700_v29  ;;  %vm4484_vm15 = vweird.f32 %v6119_v14 }
 0x560   : > { %v4476_v17 = vsel %vm4473_vm14, %v4475_v44, %v4471_v34  ;;  %6122 = vrcp.f32 %v2937_v18  ;;  %vm4485_vm2 = vmor %vm4483_vm1, %vm4484_vm15  ;;  %v4490_v29 = vor.u32 1.1754944e-38, %v4489_v23  ;;  %v4504_v36 = vand.u32 2147483648, %v2937_v18 }
 0x561   : > { %4984 = vst.msk [vmem:[%s6508_s13 + $0x320] sm:$0xff] %vm4883_vm4, %v4476_v17  ;;  %v4480_v32 = vsub.f32 1.0, %v4479_v5  ;;  %v4502_v52 = vand.u32 2147483647, %v2937_v18  ;;  %vm4498_vm5 = vweird.f32 %v2937_v18 }
 0x562   : > { %v2391_v3 = vpop.f32.mrf.mxu3  ;;  %v4505_v13 = vor.u32 1.1754944e-38, %v4504_v36 }
 0x563   : > { %v4481_v28 = vmul.f32 %v6119_v14, %v4480_v32  ;;  %v2392_v48 = vadd.f32 %v7738_v10, %v2391_v3  ;;  %vm4503_vm7 = vcmp.eq.f32.partialorder %v4502_v52, 8.507059e+37 }
 0x565   : > { %v6121_v9 = vpop.eup %6120  ;;  %v4482_v22 = vadd.f32 %v6119_v14, %v4481_v28  ;;  %v5573_v30 = vmul.f32 -1.442695, %v2392_v48 }
 0x566   : > { %v6123_v15 = vpop.eup %6122  ;;  %v2938_v31 = vadd.f32 1.0, %v6121_v9 }
 0x567   : > { %v4486_v26 = vsel %vm4485_vm2, %v6119_v14, %v4482_v22  ;;  %v4494_v16 = vmul.f32 %v6123_v15, %v2937_v18  ;;  %6124 = vpow2.f32 %v5573_v30  ;;  %vm4499_vm3 = vweird.f32 %v6123_v15 }
 0x568   : > { %v4491_v33 = vsel %vm4488_vm0, %v4490_v29, %v4486_v26  ;;  %6126 = vrcp.f32 %v2938_v31  ;;  %vm4500_vm6 = vmor %vm4498_vm5, %vm4499_vm3  ;;  %v4519_v49 = vand.u32 2147483648, %v2938_v31  ;;  %v4517_v61 = vand.u32 2147483647, %v2938_v31 }
 0x569   : > { %4985 = vst.msk [vmem:[%s6508_s13 + $0x328] sm:$0xff] %vm4883_vm4, %v4491_v33  ;;  %v4495_v43 = vsub.f32 1.0, %v4494_v16  ;;  %vm4513_vm9 = vweird.f32 %v2938_v31 }
 0x56a   : > { %v2393_v39 = vpop.f32.mrf.mxu3  ;;  %vm4518_vm11 = vcmp.eq.f32.partialorder %v4517_v61, 8.507059e+37 }
 0x56b   : > { %v4496_v19 = vmul.f32 %v6123_v15, %v4495_v43  ;;  %v2394_v53 = vadd.f32 %v7738_v10, %v2393_v39 }
 0x56d   : > { %v6125_v47 = vpop.eup %6124  ;;  %v4497_v45 = vadd.f32 %v6123_v15, %v4496_v19  ;;  %v5574_v41 = vmul.f32 -1.442695, %v2394_v53 }
 0x56e   : > { %v6127_v51 = vpop.eup %6126  ;;  %v2939_v42 = vadd.f32 1.0, %v6125_v47 }
 0x56f   : > { %v4501_v62 = vsel %vm4500_vm6, %v6123_v15, %v4497_v45  ;;  %v4509_v63 = vmul.f32 %v6127_v51, %v2938_v31  ;;  %6128 = vpow2.f32 %v5574_v41  ;;  %2435 = vmatmul.bf16.gmra.mxu3 %v7705_v24  ;;  %vm4514_vm8 = vweird.f32 %v6127_v51 }
 0x570   : > { %v4506_v54 = vsel %vm4503_vm7, %v4505_v13, %v4501_v62  ;;  %6130 = vrcp.f32 %v2939_v42  ;;  %vm4515_vm10 = vmor %vm4513_vm9, %vm4514_vm8  ;;  %v4520_v24 = vor.u32 1.1754944e-38, %v4519_v49  ;;  %v4534_v58 = vand.u32 2147483648, %v2939_v42 }
 0x571   : > { %4986 = vst.msk [vmem:[%s6508_s13 + $0x330] sm:$0xff] %vm4883_vm4, %v4506_v54  ;;  %v4510_v20 = vsub.f32 1.0, %v4509_v63  ;;  %v4532_v35 = vand.u32 2147483647, %v2939_v42  ;;  %vm4528_vm13 = vweird.f32 %v2939_v42 }
 0x572   : > { %v2396_v56 = vpop.f32.mrf.mxu3  ;;  %v4535_v14 = vor.u32 1.1754944e-38, %v4534_v58 }
 0x573   : > { %v4511_v59 = vmul.f32 %v6127_v51, %v4510_v20  ;;  %v2397_v55 = vadd.f32 %v7738_v10, %v2396_v56  ;;  %vm4533_vm15 = vcmp.eq.f32.partialorder %v4532_v35, 8.507059e+37 }
 0x575   : > { %v6129_v46 = vpop.eup %6128  ;;  %v4512_v4 = vadd.f32 %v6127_v51, %v4511_v59  ;;  %v5575_v0 = vmul.f32 -1.442695, %v2397_v55 }
 0x576   : > { %v6131_v37 = vpop.eup %6130  ;;  %v2940_v25 = vadd.f32 1.0, %v6129_v46 }
 0x577   : > { %v4516_v11 = vsel %vm4515_vm10, %v6127_v51, %v4512_v4  ;;  %v4524_v27 = vmul.f32 %v6131_v37, %v2939_v42  ;;  %6132 = vpow2.f32 %v5575_v0  ;;  %vm4529_vm12 = vweird.f32 %v6131_v37 }
 0x578   : > { %v4521_v40 = vsel %vm4518_vm11, %v4520_v24, %v4516_v11  ;;  %6134 = vrcp.f32 %v2940_v25  ;;  %vm4530_vm14 = vmor %vm4528_vm13, %vm4529_vm12  ;;  %v4549_v32 = vand.u32 2147483648, %v2940_v25  ;;  %v4547_v28 = vand.u32 2147483647, %v2940_v25 }
 0x579   : > { %4987 = vst.msk [vmem:[%s6508_s13 + $0x338] sm:$0xff] %vm4883_vm4, %v4521_v40  ;;  %v4525_v7 = vsub.f32 1.0, %v4524_v27  ;;  %vm4543_vm2 = vweird.f32 %v2940_v25 }
 0x57a   : > { %v2398_v50 = vpop.f32.mrf.mxu3  ;;  %vm4548_vm3 = vcmp.eq.f32.partialorder %v4547_v28, 8.507059e+37 }
 0x57b   : > { %v4526_v60 = vmul.f32 %v6131_v37, %v4525_v7  ;;  %v2399_v6 = vadd.f32 %v7738_v10, %v2398_v50 }
 0x57d   : > { %v6133_v1 = vpop.eup %6132  ;;  %v4527_v8 = vadd.f32 %v6131_v37, %v4526_v60  ;;  %v5576_v12 = vmul.f32 -1.442695, %v2399_v6 }
 0x57e   : > { %v6135_v2 = vpop.eup %6134  ;;  %v2941_v44 = vadd.f32 1.0, %v6133_v1 }
 0x57f   : > { %v4531_v18 = vsel %vm4530_vm14, %v6131_v37, %v4527_v8  ;;  %v4539_v34 = vmul.f32 %v6135_v2, %v2940_v25  ;;  %6136 = vpow2.f32 %v5576_v12  ;;  %2440 = vmatmul.bf16.gmra.mxu3 %v7710_v38  ;;  %vm4544_vm1 = vweird.f32 %v6135_v2 }
 0x580   : > { %v4536_v5 = vsel %vm4533_vm15, %v4535_v14, %v4531_v18  ;;  %6138 = vrcp.f32 %v2941_v44  ;;  %vm4545_vm0 = vmor %vm4543_vm2, %vm4544_vm1  ;;  %v4550_v38 = vor.u32 1.1754944e-38, %v4549_v32  ;;  %v4564_v33 = vand.u32 2147483648, %v2941_v44 }
 0x581   : > { %4988 = vst.msk [vmem:[%s6508_s13 + $0x340] sm:$0xff] %vm4883_vm4, %v4536_v5  ;;  %v4540_v17 = vsub.f32 1.0, %v4539_v34  ;;  %v4562_v39 = vand.u32 2147483647, %v2941_v44  ;;  %vm4558_vm6 = vweird.f32 %v2941_v44 }
 0x582   : > { %v2401_v23 = vpop.f32.mrf.mxu3  ;;  %v4565_v41 = vor.u32 1.1754944e-38, %v4564_v33 }
 0x583   : > { %v4541_v3 = vmul.f32 %v6135_v2, %v4540_v17  ;;  %v2402_v21 = vadd.f32 %v7738_v10, %v2401_v23  ;;  %vm4563_vm8 = vcmp.eq.f32.partialorder %v4562_v39, 8.507059e+37 }
 0x585   : > { %v6137_v48 = vpop.eup %6136  ;;  %v4542_v9 = vadd.f32 %v6135_v2, %v4541_v3  ;;  %v5577_v22 = vmul.f32 -1.442695, %v2402_v21 }
 0x586   : > { %v6139_v30 = vpop.eup %6138  ;;  %v2942_v15 = vadd.f32 1.0, %v6137_v48 }
 0x587   : > { %v4546_v29 = vsel %vm4545_vm0, %v6135_v2, %v4542_v9  ;;  %v4554_v31 = vmul.f32 %v6139_v30, %v2941_v44  ;;  %6140 = vpow2.f32 %v5577_v22  ;;  %vm4559_vm5 = vweird.f32 %v6139_v30 }
 0x588   : > { %v4551_v26 = vsel %vm4548_vm3, %v4550_v38, %v4546_v29  ;;  %6142 = vrcp.f32 %v2942_v15  ;;  %vm4560_vm7 = vmor %vm4558_vm6, %vm4559_vm5  ;;  %v4579_v54 = vand.u32 2147483648, %v2942_v15  ;;  %v4577_v56 = vand.u32 2147483647, %v2942_v15 }
 0x589   : > { %4989 = vst.msk [vmem:[%s6508_s13 + $0x348] sm:$0xff] %vm4883_vm4, %v4551_v26  ;;  %v4555_v16 = vsub.f32 1.0, %v4554_v31  ;;  %vm4573_vm10 = vweird.f32 %v2942_v15 }
 0x58a   : > { %v2403_v43 = vpop.f32.mrf.mxu3  ;;  %vm4578_vm12 = vcmp.eq.f32.partialorder %v4577_v56, 8.507059e+37 }
 0x58b   : > { %v4556_v36 = vmul.f32 %v6139_v30, %v4555_v16  ;;  %v2404_v19 = vadd.f32 %v7738_v10, %v2403_v43 }
 0x58d   : > { %v6141_v52 = vpop.eup %6140  ;;  %v4557_v53 = vadd.f32 %v6139_v30, %v4556_v36  ;;  %v5578_v47 = vmul.f32 -1.442695, %v2404_v19 }
 0x58e   : > { %v6143_v45 = vpop.eup %6142  ;;  %v2943_v51 = vadd.f32 1.0, %v6141_v52 }
 0x58f   : > { %v4561_v13 = vsel %vm4560_vm7, %v6139_v30, %v4557_v53  ;;  %v4569_v42 = vmul.f32 %v6143_v45, %v2942_v15  ;;  %6144 = vpow2.f32 %v5578_v47  ;;  %2445 = vmatmul.bf16.gmra.mxu3 %v7715_v57  ;;  %vm4574_vm9 = vweird.f32 %v6143_v45 }
 0x590   : > { %v4566_v62 = vsel %vm4563_vm8, %v4565_v41, %v4561_v13  ;;  %6146 = vrcp.f32 %v2943_v51  ;;  %vm4575_vm11 = vmor %vm4573_vm10, %vm4574_vm9  ;;  %v4580_v57 = vor.u32 1.1754944e-38, %v4579_v54  ;;  %v4594_v27 = vand.u32 2147483648, %v2943_v51 }
 0x591   : > { %4990 = vst.msk [vmem:[%s6508_s13 + $0x350] sm:$0xff] %vm4883_vm4, %v4566_v62  ;;  %v4570_v63 = vsub.f32 1.0, %v4569_v42  ;;  %v4592_v58 = vand.u32 2147483647, %v2943_v51  ;;  %vm4588_vm14 = vweird.f32 %v2943_v51 }
 0x592   : > { %v2406_v20 = vpop.f32.mrf.mxu3  ;;  %v4595_v8 = vor.u32 1.1754944e-38, %v4594_v27 }
 0x593   : > { %v4571_v49 = vmul.f32 %v6143_v45, %v4570_v63  ;;  %v2407_v59 = vadd.f32 %v7738_v10, %v2406_v20  ;;  %vm4593_vm1 = vcmp.eq.f32.partialorder %v4592_v58, 8.507059e+37 }
 0x595   : > { %v6145_v61 = vpop.eup %6144  ;;  %v4572_v55 = vadd.f32 %v6143_v45, %v4571_v49  ;;  %v5579_v46 = vmul.f32 -1.442695, %v2407_v59 }
 0x596   : > { %v6147_v4 = vpop.eup %6146  ;;  %v2944_v0 = vadd.f32 1.0, %v6145_v61 }
 0x597   : > { %v4576_v37 = vsel %vm4575_vm11, %v6143_v45, %v4572_v55  ;;  %v4584_v24 = vmul.f32 %v6147_v4, %v2943_v51  ;;  %6148 = vpow2.f32 %v5579_v46  ;;  %vm4589_vm13 = vweird.f32 %v6147_v4 }
 0x598   : > { %v4581_v25 = vsel %vm4578_vm12, %v4580_v57, %v4576_v37  ;;  %6150 = vrcp.f32 %v2944_v0  ;;  %vm4590_vm15 = vmor %vm4588_vm14, %vm4589_vm13  ;;  %v4609_v34 = vand.u32 2147483648, %v2944_v0  ;;  %v4607_v32 = vand.u32 2147483647, %v2944_v0 }
 0x599   : > { %4991 = vst.msk [vmem:[%s6508_s13 + $0x358] sm:$0xff] %vm4883_vm4, %v4581_v25  ;;  %v4585_v11 = vsub.f32 1.0, %v4584_v24  ;;  %vm4603_vm0 = vweird.f32 %v2944_v0 }
 0x59a   : > { %v2408_v40 = vpop.f32.mrf.mxu3  ;;  %v4610_v9 = vor.u32 1.1754944e-38, %v4609_v34  ;;  %vm4608_vm5 = vcmp.eq.f32.partialorder %v4607_v32, 8.507059e+37 }
 0x59b   : > { %v4586_v7 = vmul.f32 %v6147_v4, %v4585_v11  ;;  %v2409_v50 = vadd.f32 %v7738_v10, %v2408_v40 }
 0x59d   : > { %v6149_v60 = vpop.eup %6148  ;;  %v4587_v35 = vadd.f32 %v6147_v4, %v4586_v7  ;;  %v5580_v6 = vmul.f32 -1.442695, %v2409_v50 }
 0x59e   : > { %v6151_v1 = vpop.eup %6150  ;;  %v2945_v12 = vadd.f32 1.0, %v6149_v60 }
 0x59f   : > { %v4591_v2 = vsel %vm4590_vm15, %v6147_v4, %v4587_v35  ;;  %v4599_v14 = vmul.f32 %v6151_v1, %v2944_v0  ;;  %6152 = vpow2.f32 %v5580_v6  ;;  %vm4604_vm2 = vweird.f32 %v6151_v1 }
 0x5a0   : > { %v4596_v44 = vsel %vm4593_vm1, %v4595_v8, %v4591_v2  ;;  %6154 = vrcp.f32 %v2945_v12  ;;  %vm4605_vm3 = vmor %vm4603_vm0, %vm4604_vm2  ;;  %v4624_v31 = vand.u32 2147483648, %v2945_v12  ;;  %v4622_v33 = vand.u32 2147483647, %v2945_v12 }
 0x5a1   : > { %4992 = vst.msk [vmem:[%s6508_s13 + $0x360] sm:$0xff] %vm4883_vm4, %v4596_v44  ;;  %v4600_v18 = vsub.f32 1.0, %v4599_v14  ;;  %vm4618_vm7 = vweird.f32 %v2945_v12 }
 0x5a2   : > { %v2411_v5 = vpop.f32.mrf.mxu3  ;;  %v4625_v53 = vor.u32 1.1754944e-38, %v4624_v31  ;;  %vm4623_vm9 = vcmp.eq.f32.partialorder %v4622_v33, 8.507059e+37 }
 0x5a3   : > { %v4601_v17 = vmul.f32 %v6151_v1, %v4600_v18  ;;  %v2412_v23 = vadd.f32 %v7738_v10, %v2411_v5 }
 0x5a5   : > { %v6153_v3 = vpop.eup %6152  ;;  %v4602_v28 = vadd.f32 %v6151_v1, %v4601_v17  ;;  %v5581_v21 = vmul.f32 -1.442695, %v2412_v23 }
 0x5a6   : > { %v6155_v48 = vpop.eup %6154  ;;  %v2946_v22 = vadd.f32 1.0, %v6153_v3 }
 0x5a7   : > { %v4606_v30 = vsel %vm4605_vm3, %v6151_v1, %v4602_v28  ;;  %v4614_v38 = vmul.f32 %v6155_v48, %v2945_v12  ;;  %6156 = vpow2.f32 %v5581_v21  ;;  %vm4619_vm6 = vweird.f32 %v6155_v48 }
 0x5a8   : > { %v4611_v15 = vsel %vm4608_vm5, %v4610_v9, %v4606_v30  ;;  %6158 = vrcp.f32 %v2946_v22  ;;  %vm4620_vm8 = vmor %vm4618_vm7, %vm4619_vm6  ;;  %v4639_v42 = vand.u32 2147483648, %v2946_v22  ;;  %v4637_v54 = vand.u32 2147483647, %v2946_v22 }
 0x5a9   : > { %4993 = vst.msk [vmem:[%s6508_s13 + $0x368] sm:$0xff] %vm4883_vm4, %v4611_v15  ;;  %v4615_v29 = vsub.f32 1.0, %v4614_v38  ;;  %vm4633_vm11 = vweird.f32 %v2946_v22 }
 0x5aa   : > { %v2413_v26 = vpop.f32.mrf.mxu3  ;;  %v4640_v55 = vor.u32 1.1754944e-38, %v4639_v42  ;;  %vm4638_vm13 = vcmp.eq.f32.partialorder %v4637_v54, 8.507059e+37 }
 0x5ab   : > { %v4616_v16 = vmul.f32 %v6155_v48, %v4615_v29  ;;  %v2414_v43 = vadd.f32 %v7738_v10, %v2413_v26 }
 0x5ad   : > { %v6157_v36 = vpop.eup %6156  ;;  %v4617_v39 = vadd.f32 %v6155_v48, %v4616_v16  ;;  %v5582_v19 = vmul.f32 -1.442695, %v2414_v43 }
 0x5ae   : > { %v6159_v52 = vpop.eup %6158  ;;  %v2947_v47 = vadd.f32 1.0, %v6157_v36 }
 0x5af   : > { %v4621_v45 = vsel %vm4620_vm8, %v6155_v48, %v4617_v39  ;;  %v4629_v41 = vmul.f32 %v6159_v52, %v2946_v22  ;;  %6160 = vpow2.f32 %v5582_v19  ;;  %vm4634_vm10 = vweird.f32 %v6159_v52 }
 0x5b0   : > { %v4626_v51 = vsel %vm4623_vm9, %v4625_v53, %v4621_v45  ;;  %6162 = vrcp.f32 %v2947_v47  ;;  %vm4635_vm12 = vmor %vm4633_vm11, %vm4634_vm10  ;;  %v4654_v24 = vand.u32 2147483648, %v2947_v47  ;;  %v4652_v27 = vand.u32 2147483647, %v2947_v47 }
 0x5b1   : > { %4994 = vst.msk [vmem:[%s6508_s13 + $0x370] sm:$0xff] %vm4883_vm4, %v4626_v51  ;;  %v4630_v13 = vsub.f32 1.0, %v4629_v41  ;;  %vm4648_vm15 = vweird.f32 %v2947_v47 }
 0x5b2   : > { %v2416_v62 = vpop.f32.mrf.mxu3  ;;  %v4655_v35 = vor.u32 1.1754944e-38, %v4654_v24  ;;  %vm4653_vm2 = vcmp.eq.f32.partialorder %v4652_v27, 8.507059e+37 }
 0x5b3   : > { %v4631_v63 = vmul.f32 %v6159_v52, %v4630_v13  ;;  %v2417_v20 = vadd.f32 %v7738_v10, %v2416_v62 }
 0x5b5   : > { %v6161_v49 = vpop.eup %6160  ;;  %v4632_v56 = vadd.f32 %v6159_v52, %v4631_v63  ;;  %v5583_v59 = vmul.f32 -1.442695, %v2417_v20 }
 0x5b6   : > { %v6163_v61 = vpop.eup %6162  ;;  %v2948_v46 = vadd.f32 1.0, %v6161_v49 }
 0x5b7   : > { %v4636_v4 = vsel %vm4635_vm12, %v6159_v52, %v4632_v56  ;;  %v4644_v57 = vmul.f32 %v6163_v61, %v2947_v47  ;;  %6164 = vpow2.f32 %v5583_v59  ;;  %vm4649_vm14 = vweird.f32 %v6163_v61 }
 0x5b8   : > { %v4641_v0 = vsel %vm4638_vm13, %v4640_v55, %v4636_v4  ;;  %6166 = vrcp.f32 %v2948_v46  ;;  %vm4650_vm1 = vmor %vm4648_vm15, %vm4649_vm14  ;;  %v4669_v14 = vand.u32 2147483648, %v2948_v46  ;;  %v4667_v34 = vand.u32 2147483647, %v2948_v46 }
 0x5b9   : > { %4995 = vst.msk [vmem:[%s6508_s13 + $0x378] sm:$0xff] %vm4883_vm4, %v4641_v0  ;;  %v4645_v37 = vsub.f32 1.0, %v4644_v57  ;;  %vm4663_vm3 = vweird.f32 %v2948_v46 }
 0x5ba   : > { %v2418_v25 = vpop.f32.mrf.mxu3  ;;  %v4670_v28 = vor.u32 1.1754944e-38, %v4669_v14  ;;  %vm4668_vm6 = vcmp.eq.f32.partialorder %v4667_v34, 8.507059e+37 }
 0x5bb   : > { %v4646_v11 = vmul.f32 %v6163_v61, %v4645_v37  ;;  %v2419_v40 = vadd.f32 %v7738_v10, %v2418_v25 }
 0x5bd   : > { %v6165_v7 = vpop.eup %6164  ;;  %v4647_v58 = vadd.f32 %v6163_v61, %v4646_v11  ;;  %v5584_v50 = vmul.f32 -1.442695, %v2419_v40 }
 0x5be   : > { %v6167_v60 = vpop.eup %6166  ;;  %v2949_v6 = vadd.f32 1.0, %v6165_v7 }
 0x5bf   : > { %v4651_v1 = vsel %vm4650_vm1, %v6163_v61, %v4647_v58  ;;  %v4659_v8 = vmul.f32 %v6167_v60, %v2948_v46  ;;  %6168 = vpow2.f32 %v5584_v50  ;;  %vm4664_vm0 = vweird.f32 %v6167_v60 }
 0x5c0   : > { %v4656_v12 = vsel %vm4653_vm2, %v4655_v35, %v4651_v1  ;;  %6170 = vrcp.f32 %v2949_v6  ;;  %vm4665_vm5 = vmor %vm4663_vm3, %vm4664_vm0  ;;  %v4684_v38 = vand.u32 2147483648, %v2949_v6  ;;  %v4682_v31 = vand.u32 2147483647, %v2949_v6 }
 0x5c1   : > { %4996 = vst.msk [vmem:[%s6508_s13 + $0x380] sm:$0xff] %vm4883_vm4, %v4656_v12  ;;  %v4660_v2 = vsub.f32 1.0, %v4659_v8  ;;  %vm4678_vm8 = vweird.f32 %v2949_v6 }
 0x5c2   : > { %v2421_v44 = vpop.f32.mrf.mxu3  ;;  %v4685_v39 = vor.u32 1.1754944e-38, %v4684_v38  ;;  %vm4683_vm10 = vcmp.eq.f32.partialorder %v4682_v31, 8.507059e+37 }
 0x5c3   : > { %v4661_v18 = vmul.f32 %v6167_v60, %v4660_v2  ;;  %v2422_v5 = vadd.f32 %v7738_v10, %v2421_v44 }
 0x5c5   : > { %v6169_v17 = vpop.eup %6168  ;;  %v4662_v32 = vadd.f32 %v6167_v60, %v4661_v18  ;;  %v5585_v23 = vmul.f32 -1.442695, %v2422_v5 }
 0x5c6   : > { %v6171_v3 = vpop.eup %6170  ;;  %v2950_v21 = vadd.f32 1.0, %v6169_v17 }
 0x5c7   : > { %v4666_v48 = vsel %vm4665_vm5, %v6167_v60, %v4662_v32  ;;  %v4674_v9 = vmul.f32 %v6171_v3, %v2949_v6  ;;  %6172 = vpow2.f32 %v5585_v23  ;;  %vm4679_vm7 = vweird.f32 %v6171_v3 }
 0x5c8   : > { %v4671_v22 = vsel %vm4668_vm6, %v4670_v28, %v4666_v48  ;;  %6174 = vrcp.f32 %v2950_v21  ;;  %vm4680_vm9 = vmor %vm4678_vm8, %vm4679_vm7  ;;  %v4699_v41 = vand.u32 2147483648, %v2950_v21  ;;  %v4697_v42 = vand.u32 2147483647, %v2950_v21 }
 0x5c9   : > { %4997 = vst.msk [vmem:[%s6508_s13 + $0x388] sm:$0xff] %vm4883_vm4, %v4671_v22  ;;  %v4675_v30 = vsub.f32 1.0, %v4674_v9  ;;  %vm4693_vm12 = vweird.f32 %v2950_v21 }
 0x5ca   : > { %v2423_v15 = vpop.f32.mrf.mxu3  ;;  %v4700_v56 = vor.u32 1.1754944e-38, %v4699_v41  ;;  %vm4698_vm14 = vcmp.eq.f32.partialorder %v4697_v42, 8.507059e+37 }
 0x5cb   : > { %v4676_v29 = vmul.f32 %v6171_v3, %v4675_v30  ;;  %v2424_v26 = vadd.f32 %v7738_v10, %v2423_v15 }
 0x5cd   : > { %v6173_v16 = vpop.eup %6172  ;;  %v4677_v33 = vadd.f32 %v6171_v3, %v4676_v29  ;;  %v5586_v43 = vmul.f32 -1.442695, %v2424_v26 }
 0x5ce   : > { %v6175_v36 = vpop.eup %6174  ;;  %v2951_v19 = vadd.f32 1.0, %v6173_v16 }
 0x5cf   : > { %v4681_v52 = vsel %vm4680_vm9, %v6171_v3, %v4677_v33  ;;  %v4689_v53 = vmul.f32 %v6175_v36, %v2950_v21  ;;  %6176 = vpow2.f32 %v5586_v43  ;;  %vm4694_vm11 = vweird.f32 %v6175_v36 }
 0x5d0   : > { %v4686_v47 = vsel %vm4683_vm10, %v4685_v39, %v4681_v52  ;;  %6178 = vrcp.f32 %v2951_v19  ;;  %vm4695_vm13 = vmor %vm4693_vm12, %vm4694_vm11  ;;  %v4714_v57 = vand.u32 2147483648, %v2951_v19  ;;  %v4712_v24 = vand.u32 2147483647, %v2951_v19 }
 0x5d1   : > { %4998 = vst.msk [vmem:[%s6508_s13 + $0x390] sm:$0xff] %vm4883_vm4, %v4686_v47  ;;  %v4690_v45 = vsub.f32 1.0, %v4689_v53  ;;  %vm4708_vm1 = vweird.f32 %v2951_v19 }
 0x5d2   : > { %v2426_v51 = vpop.f32.mrf.mxu3  ;;  %v4715_v58 = vor.u32 1.1754944e-38, %v4714_v57  ;;  %vm4713_vm0 = vcmp.eq.f32.partialorder %v4712_v24, 8.507059e+37 }
 0x5d3   : > { %v4691_v13 = vmul.f32 %v6175_v36, %v4690_v45  ;;  %v2427_v62 = vadd.f32 %v7738_v10, %v2426_v51 }
 0x5d5   : > { %v6177_v63 = vpop.eup %6176  ;;  %v4692_v54 = vadd.f32 %v6175_v36, %v4691_v13  ;;  %v5587_v20 = vmul.f32 -1.442695, %v2427_v62 }
 0x5d6   : > { %v6179_v49 = vpop.eup %6178  ;;  %v2952_v59 = vadd.f32 1.0, %v6177_v63 }
 0x5d7   : > { %v4696_v61 = vsel %vm4695_vm13, %v6175_v36, %v4692_v54  ;;  %v4704_v55 = vmul.f32 %v6179_v49, %v2951_v19  ;;  %6180 = vpow2.f32 %v5587_v20  ;;  %vm4709_vm15 = vweird.f32 %v6179_v49 }
 0x5d8   : > { %v4701_v46 = vsel %vm4698_vm14, %v4700_v56, %v4696_v61  ;;  %6182 = vrcp.f32 %v2952_v59  ;;  %vm4710_vm2 = vmor %vm4708_vm1, %vm4709_vm15  ;;  %v4729_v8 = vand.u32 2147483648, %v2952_v59  ;;  %v4727_v14 = vand.u32 2147483647, %v2952_v59 }
 0x5d9   : > { %4999 = vst.msk [vmem:[%s6508_s13 + $0x398] sm:$0xff] %vm4883_vm4, %v4701_v46  ;;  %v4705_v4 = vsub.f32 1.0, %v4704_v55  ;;  %vm4723_vm5 = vweird.f32 %v2952_v59 }
 0x5da   : > { %v2428_v0 = vpop.f32.mrf.mxu3  ;;  %v4730_v32 = vor.u32 1.1754944e-38, %v4729_v8  ;;  %vm4728_vm7 = vcmp.eq.f32.partialorder %v4727_v14, 8.507059e+37 }
 0x5db   : > { %v4706_v37 = vmul.f32 %v6179_v49, %v4705_v4  ;;  %v2429_v25 = vadd.f32 %v7738_v10, %v2428_v0 }
 0x5dd   : > { %v6181_v11 = vpop.eup %6180  ;;  %v4707_v27 = vadd.f32 %v6179_v49, %v4706_v37  ;;  %v5588_v40 = vmul.f32 -1.442695, %v2429_v25 }
 0x5de   : > { %v6183_v7 = vpop.eup %6182  ;;  %v2953_v50 = vadd.f32 1.0, %v6181_v11 }
 0x5df   : > { %v4711_v60 = vsel %vm4710_vm2, %v6179_v49, %v4707_v27  ;;  %v4719_v35 = vmul.f32 %v6183_v7, %v2952_v59  ;;  %6184 = vpow2.f32 %v5588_v40  ;;  %vm4724_vm3 = vweird.f32 %v6183_v7 }
 0x5e0   : > { %v4716_v6 = vsel %vm4713_vm0, %v4715_v58, %v4711_v60  ;;  %6186 = vrcp.f32 %v2953_v50  ;;  %vm4725_vm6 = vmor %vm4723_vm5, %vm4724_vm3  ;;  %v4744_v9 = vand.u32 2147483648, %v2953_v50  ;;  %v4742_v38 = vand.u32 2147483647, %v2953_v50 }
 0x5e1   : > { %5000 = vst.msk [vmem:[%s6508_s13 + $0x3a0] sm:$0xff] %vm4883_vm4, %v4716_v6  ;;  %v4720_v1 = vsub.f32 1.0, %v4719_v35  ;;  %vm4738_vm9 = vweird.f32 %v2953_v50 }
 0x5e2   : > { %v2431_v12 = vpop.f32.mrf.mxu3  ;;  %v4745_v33 = vor.u32 1.1754944e-38, %v4744_v9  ;;  %vm4743_vm11 = vcmp.eq.f32.partialorder %v4742_v38, 8.507059e+37 }
 0x5e3   : > { %v4721_v2 = vmul.f32 %v6183_v7, %v4720_v1  ;;  %v2432_v44 = vadd.f32 %v7738_v10, %v2431_v12 }
 0x5e5   : > { %v6185_v18 = vpop.eup %6184  ;;  %v4722_v34 = vadd.f32 %v6183_v7, %v4721_v2  ;;  %v5589_v5 = vmul.f32 -1.442695, %v2432_v44 }
 0x5e6   : > { %v6187_v17 = vpop.eup %6186  ;;  %v2954_v23 = vadd.f32 1.0, %v6185_v18 }
 0x5e7   : > { %v4726_v3 = vsel %vm4725_vm6, %v6183_v7, %v4722_v34  ;;  %v4734_v28 = vmul.f32 %v6187_v17, %v2953_v50  ;;  %6188 = vpow2.f32 %v5589_v5  ;;  %vm4739_vm8 = vweird.f32 %v6187_v17 }
 0x5e8   : > { %v4731_v21 = vsel %vm4728_vm7, %v4730_v32, %v4726_v3  ;;  %6190 = vrcp.f32 %v2954_v23  ;;  %vm4740_vm10 = vmor %vm4738_vm9, %vm4739_vm8  ;;  %v4759_v53 = vand.u32 2147483648, %v2954_v23  ;;  %v4757_v41 = vand.u32 2147483647, %v2954_v23 }
 0x5e9   : > { %5001 = vst.msk [vmem:[%s6508_s13 + $0x3a8] sm:$0xff] %vm4883_vm4, %v4731_v21  ;;  %v4735_v48 = vsub.f32 1.0, %v4734_v28  ;;  %vm4753_vm13 = vweird.f32 %v2954_v23 }
 0x5ea   : > { %v2433_v22 = vpop.f32.mrf.mxu3  ;;  %v4760_v54 = vor.u32 1.1754944e-38, %v4759_v53  ;;  %vm4758_vm15 = vcmp.eq.f32.partialorder %v4757_v41, 8.507059e+37 }
 0x5eb   : > { %v4736_v30 = vmul.f32 %v6187_v17, %v4735_v48  ;;  %v2434_v15 = vadd.f32 %v7738_v10, %v2433_v22 }
 0x5ed   : > { %v6189_v29 = vpop.eup %6188  ;;  %v4737_v31 = vadd.f32 %v6187_v17, %v4736_v30  ;;  %v5590_v26 = vmul.f32 -1.442695, %v2434_v15 }
 0x5ee   : > { %v6191_v16 = vpop.eup %6190  ;;  %v2955_v43 = vadd.f32 1.0, %v6189_v29 }
 0x5ef   : > { %v4741_v36 = vsel %vm4740_vm10, %v6187_v17, %v4737_v31  ;;  %v4749_v39 = vmul.f32 %v6191_v16, %v2954_v23  ;;  %6192 = vpow2.f32 %v5590_v26  ;;  %vm4754_vm12 = vweird.f32 %v6191_v16 }
 0x5f0   : > { %v4746_v19 = vsel %vm4743_vm11, %v4745_v33, %v4741_v36  ;;  %6194 = vrcp.f32 %v2955_v43  ;;  %vm4755_vm14 = vmor %vm4753_vm13, %vm4754_vm12  ;;  %v4774_v55 = vand.u32 2147483648, %v2955_v43  ;;  %v4772_v57 = vand.u32 2147483647, %v2955_v43 }
 0x5f1   : > { %5002 = vst.msk [vmem:[%s6508_s13 + $0x3b0] sm:$0xff] %vm4883_vm4, %v4746_v19  ;;  %v4750_v52 = vsub.f32 1.0, %v4749_v39  ;;  %vm4768_vm2 = vweird.f32 %v2955_v43 }
 0x5f2   : > { %v2436_v47 = vpop.f32.mrf.mxu3  ;;  %v4775_v27 = vor.u32 1.1754944e-38, %v4774_v55  ;;  %vm4773_vm3 = vcmp.eq.f32.partialorder %v4772_v57, 8.507059e+37  ;;  %v6246_v55 = vld [vmem:[%s7836_s6] ss:$0 sm:$0xff] }
 0x5f3   : > { %v4751_v45 = vmul.f32 %v6191_v16, %v4750_v52  ;;  %v2437_v51 = vadd.f32 %v7738_v10, %v2436_v47 }
 0x5f5   : > { %v6193_v13 = vpop.eup %6192  ;;  %v4752_v42 = vadd.f32 %v6191_v16, %v4751_v45  ;;  %v5591_v62 = vmul.f32 -1.442695, %v2437_v51 }
 0x5f6   : > { %v6195_v63 = vpop.eup %6194  ;;  %v2956_v20 = vadd.f32 1.0, %v6193_v13 }
 0x5f7   : > { %v4756_v49 = vsel %vm4755_vm14, %v6191_v16, %v4752_v42  ;;  %v4764_v56 = vmul.f32 %v6195_v63, %v2955_v43  ;;  %6196 = vpow2.f32 %v5591_v62  ;;  %vm4769_vm1 = vweird.f32 %v6195_v63 }
 0x5f8   : > { %v4761_v59 = vsel %vm4758_vm15, %v4760_v54, %v4756_v49  ;;  %6198 = vrcp.f32 %v2956_v20  ;;  %vm4770_vm0 = vmor %vm4768_vm2, %vm4769_vm1  ;;  %v4789_v35 = vand.u32 2147483648, %v2956_v20  ;;  %v4787_v8 = vand.u32 2147483647, %v2956_v20 }
 0x5f9   : > { %5003 = vst.msk [vmem:[%s6508_s13 + $0x3b8] sm:$0xff] %vm4883_vm4, %v4761_v59  ;;  %v4765_v61 = vsub.f32 1.0, %v4764_v56  ;;  %vm4783_vm6 = vweird.f32 %v2956_v20 }
 0x5fa   : > { %v2438_v46 = vpop.f32.mrf.mxu3  ;;  %v4790_v34 = vor.u32 1.1754944e-38, %v4789_v35  ;;  %vm4788_vm8 = vcmp.eq.f32.partialorder %v4787_v8, 8.507059e+37 }
 0x5fb   : > { %v4766_v4 = vmul.f32 %v6195_v63, %v4765_v61  ;;  %v2439_v0 = vadd.f32 %v7738_v10, %v2438_v46 }
 0x5fd   : > { %v6197_v37 = vpop.eup %6196  ;;  %v4767_v24 = vadd.f32 %v6195_v63, %v4766_v4  ;;  %v5592_v25 = vmul.f32 -1.442695, %v2439_v0 }
 0x5fe   : > { %v6199_v11 = vpop.eup %6198  ;;  %v2957_v40 = vadd.f32 1.0, %v6197_v37 }
 0x5ff   : > { %v4771_v7 = vsel %vm4770_vm0, %v6195_v63, %v4767_v24  ;;  %v4779_v58 = vmul.f32 %v6199_v11, %v2956_v20  ;;  %6200 = vpow2.f32 %v5592_v25  ;;  %vm4784_vm5 = vweird.f32 %v6199_v11 }
 0x600   : > { %v4776_v50 = vsel %vm4773_vm3, %v4775_v27, %v4771_v7  ;;  %6202 = vrcp.f32 %v2957_v40  ;;  %vm4785_vm7 = vmor %vm4783_vm6, %vm4784_vm5  ;;  %v4804_v28 = vand.u32 2147483648, %v2957_v40  ;;  %v4802_v9 = vand.u32 2147483647, %v2957_v40 }
 0x601   : > { %5004 = vst.msk [vmem:[%s6508_s13 + $0x3c0] sm:$0xff] %vm4883_vm4, %v4776_v50  ;;  %v4780_v60 = vsub.f32 1.0, %v4779_v58  ;;  %vm4798_vm10 = vweird.f32 %v2957_v40 }
 0x602   : > { %v2441_v6 = vpop.f32.mrf.mxu3  ;;  %v4805_v31 = vor.u32 1.1754944e-38, %v4804_v28  ;;  %vm4803_vm12 = vcmp.eq.f32.partialorder %v4802_v9, 8.507059e+37 }
 0x603   : > { %v4781_v1 = vmul.f32 %v6199_v11, %v4780_v60  ;;  %v2442_v12 = vadd.f32 %v7738_v10, %v2441_v6 }
 0x605   : > { %v6201_v2 = vpop.eup %6200  ;;  %v4782_v14 = vadd.f32 %v6199_v11, %v4781_v1  ;;  %v5593_v44 = vmul.f32 -1.442695, %v2442_v12 }
 0x606   : > { %v6203_v18 = vpop.eup %6202  ;;  %v2958_v5 = vadd.f32 1.0, %v6201_v2 }
 0x607   : > { %v4786_v17 = vsel %vm4785_vm7, %v6199_v11, %v4782_v14  ;;  %v4794_v32 = vmul.f32 %v6203_v18, %v2957_v40  ;;  %6204 = vpow2.f32 %v5593_v44  ;;  %vm4799_vm9 = vweird.f32 %v6203_v18 }
 0x608   : > { %v4791_v23 = vsel %vm4788_vm8, %v4790_v34, %v4786_v17  ;;  %6206 = vrcp.f32 %v2958_v5  ;;  %vm4800_vm11 = vmor %vm4798_vm10, %vm4799_vm9  ;;  %v4819_v39 = vand.u32 2147483648, %v2958_v5  ;;  %v4817_v53 = vand.u32 2147483647, %v2958_v5 }
 0x609   : > { %5005 = vst.msk [vmem:[%s6508_s13 + $0x3c8] sm:$0xff] %vm4883_vm4, %v4791_v23  ;;  %v4795_v3 = vsub.f32 1.0, %v4794_v32  ;;  %vm4813_vm14 = vweird.f32 %v2958_v5 }
 0x60a   : > { %v2443_v21 = vpop.f32.mrf.mxu3  ;;  %v4820_v42 = vor.u32 1.1754944e-38, %v4819_v39  ;;  %vm4818_vm1 = vcmp.eq.f32.partialorder %v4817_v53, 8.507059e+37 }
 0x60b   : > { %v4796_v48 = vmul.f32 %v6203_v18, %v4795_v3  ;;  %v2444_v22 = vadd.f32 %v7738_v10, %v2443_v21 }
 0x60d   : > { %v6205_v30 = vpop.eup %6204  ;;  %v4797_v38 = vadd.f32 %v6203_v18, %v4796_v48  ;;  %v5594_v15 = vmul.f32 -1.442695, %v2444_v22 }
 0x60e   : > { %v6207_v29 = vpop.eup %6206  ;;  %v2959_v26 = vadd.f32 1.0, %v6205_v30 }
 0x60f   : > { %v4801_v16 = vsel %vm4800_vm11, %v6203_v18, %v4797_v38  ;;  %v4809_v33 = vmul.f32 %v6207_v29, %v2958_v5  ;;  %6208 = vpow2.f32 %v5594_v15  ;;  %vm4814_vm13 = vweird.f32 %v6207_v29 }
 0x610   : > { %v4806_v43 = vsel %vm4803_vm12, %v4805_v31, %v4801_v16  ;;  %6210 = vrcp.f32 %v2959_v26  ;;  %vm4815_vm15 = vmor %vm4813_vm14, %vm4814_vm13  ;;  %v4834_v56 = vand.u32 2147483648, %v2959_v26  ;;  %v4832_v61 = vand.u32 2147483647, %v2959_v26 }
 0x611   : > { %5006 = vst.msk [vmem:[%s6508_s13 + $0x3d0] sm:$0xff] %vm4883_vm4, %v4806_v43  ;;  %v4810_v36 = vsub.f32 1.0, %v4809_v33  ;;  %vm4828_vm0 = vweird.f32 %v2959_v26 }
 0x612   : > { %v2446_v19 = vpop.f32.mrf.mxu3  ;;  %v4835_v24 = vor.u32 1.1754944e-38, %v4834_v56  ;;  %vm4833_vm5 = vcmp.eq.f32.partialorder %v4832_v61, 8.507059e+37 }
 0x613   : > { %v4811_v52 = vmul.f32 %v6207_v29, %v4810_v36  ;;  %v2447_v47 = vadd.f32 %v7738_v10, %v2446_v19 }
 0x615   : > { %v6209_v45 = vpop.eup %6208  ;;  %v4812_v41 = vadd.f32 %v6207_v29, %v4811_v52  ;;  %v5595_v51 = vmul.f32 -1.442695, %v2447_v47 }
 0x616   : > { %v6211_v13 = vpop.eup %6210  ;;  %v2960_v62 = vadd.f32 1.0, %v6209_v45 }
 0x617   : > { %v4816_v63 = vsel %vm4815_vm15, %v6207_v29, %v4812_v41  ;;  %v4824_v54 = vmul.f32 %v6211_v13, %v2959_v26  ;;  %6212 = vpow2.f32 %v5595_v51  ;;  %vm4829_vm2 = vweird.f32 %v6211_v13 }
 0x618   : > { %v4821_v20 = vsel %vm4818_vm1, %v4820_v42, %v4816_v63  ;;  %6214 = vrcp.f32 %v2960_v62  ;;  %vm4830_vm3 = vmor %vm4828_vm0, %vm4829_vm2  ;;  %v4849_v58 = vand.u32 2147483648, %v2960_v62  ;;  %v4847_v60 = vand.u32 2147483647, %v2960_v62 }
 0x619   : > { %5007 = vst.msk [vmem:[%s6508_s13 + $0x3d8] sm:$0xff] %vm4883_vm4, %v4821_v20  ;;  %v4825_v49 = vsub.f32 1.0, %v4824_v54  ;;  %vm4843_vm7 = vweird.f32 %v2960_v62 }
 0x61a   : > { %v2448_v59 = vpop.f32.mrf.mxu3  ;;  %v4850_v8 = vor.u32 1.1754944e-38, %v4849_v58  ;;  %vm4848_vm9 = vcmp.eq.f32.partialorder %v4847_v60, 8.507059e+37 }
 0x61b   : > { %v4826_v10 = vmul.f32 %v6211_v13, %v4825_v49  ;;  %v2449_v46 = vadd.f32 %v6246_v55, %v2448_v59 }
 0x61d   : > { %v6213_v4 = vpop.eup %6212  ;;  %v4827_v57 = vadd.f32 %v6211_v13, %v4826_v10  ;;  %v5596_v0 = vmul.f32 -1.442695, %v2449_v46 }
 0x61e   : > { %v6215_v37 = vpop.eup %6214  ;;  %v2961_v25 = vadd.f32 1.0, %v6213_v4 }
 0x61f   : > { %v4831_v11 = vsel %vm4830_vm3, %v6211_v13, %v4827_v57  ;;  %v4839_v27 = vmul.f32 %v6215_v37, %v2960_v62  ;;  %6216 = vpow2.f32 %v5596_v0  ;;  %vm4844_vm6 = vweird.f32 %v6215_v37 }
 0x620   : > { %v4836_v40 = vsel %vm4833_vm5, %v4835_v24, %v4831_v11  ;;  %6218 = vrcp.f32 %v2961_v25  ;;  %vm4845_vm8 = vmor %vm4843_vm7, %vm4844_vm6  ;;  %v4864_v34 = vand.u32 2147483648, %v2961_v25  ;;  %v4862_v17 = vand.u32 2147483647, %v2961_v25 }
 0x621   : > { %5008 = vst.msk [vmem:[%s6508_s13 + $0x3e0] sm:$0xff] %vm4883_vm4, %v4836_v40  ;;  %v4840_v7 = vsub.f32 1.0, %v4839_v27  ;;  %vm4858_vm11 = vweird.f32 %v2961_v25 }
 0x622   : > { %v4865_v3 = vor.u32 1.1754944e-38, %v4864_v34  ;;  %vm4863_vm13 = vcmp.eq.f32.partialorder %v4862_v17, 8.507059e+37 }
 0x623   : > { %v4841_v50 = vmul.f32 %v6215_v37, %v4840_v7 }
 0x625   : > { %v6217_v35 = vpop.eup %6216  ;;  %v4842_v6 = vadd.f32 %v6215_v37, %v4841_v50 }
 0x626   : > { %v6219_v1 = vpop.eup %6218  ;;  %v2962_v12 = vadd.f32 1.0, %v6217_v35 }
 0x627   : > { %v4846_v2 = vsel %vm4845_vm8, %v6215_v37, %v4842_v6  ;;  %v4854_v14 = vmul.f32 %v6219_v1, %v2961_v25  ;;  %vm4859_vm10 = vweird.f32 %v6219_v1 }
 0x628   : > { %v4851_v44 = vsel %vm4848_vm9, %v4850_v8, %v4846_v2  ;;  %6220 = vrcp.f32 %v2962_v12  ;;  %vm4860_vm12 = vmor %vm4858_vm11, %vm4859_vm10  ;;  %v4879_v22 = vand.u32 2147483648, %v2962_v12  ;;  %v4877_v38 = vand.u32 2147483647, %v2962_v12 }
 0x629   : > { %5009 = vst.msk [vmem:[%s6508_s13 + $0x3e8] sm:$0xff] %vm4883_vm4, %v4851_v44  ;;  %v4855_v18 = vsub.f32 1.0, %v4854_v14  ;;  %vm4873_vm15 = vweird.f32 %v2962_v12 }
 0x62a   : > { %v4880_v29 = vor.u32 1.1754944e-38, %v4879_v22  ;;  %vm4878_vm2 = vcmp.eq.f32.partialorder %v4877_v38, 8.507059e+37 }
 0x62b   : > { %v4856_v5 = vmul.f32 %v6219_v1, %v4855_v18 }
 0x62d   : > { %v4857_v32 = vadd.f32 %v6219_v1, %v4856_v5 }
 0x62e   : > { %v6221_v23 = vpop.eup %6220 }
 0x62f   : > { %v4861_v28 = vsel %vm4860_vm12, %v6219_v1, %v4857_v32  ;;  %v4869_v21 = vmul.f32 %v6221_v23, %v2962_v12  ;;  %vm4874_vm14 = vweird.f32 %v6221_v23 }
 0x630   : > { %v4866_v48 = vsel %vm4863_vm13, %v4865_v3, %v4861_v28  ;;  %vm4875_vm1 = vmor %vm4873_vm15, %vm4874_vm14 }
 0x631   : > { %5010 = vst.msk [vmem:[%s6508_s13 + $0x3f0] sm:$0xff] %vm4883_vm4, %v4866_v48  ;;  %v4870_v9 = vsub.f32 1.0, %v4869_v21 }
 0x633   : > { %v4871_v30 = vmul.f32 %v6221_v23, %v4870_v9 }
 0x635   : > { %v4872_v15 = vadd.f32 %v6221_v23, %v4871_v30 }
 0x637   : > { %v4876_v31 = vsel %vm4875_vm1, %v6221_v23, %v4872_v15 }
 0x638   : > { %v4881_v26 = vsel %vm4878_vm2, %v4880_v29, %v4876_v31 }
 0x639   : > { %5011 = vst.msk [vmem:[%s6508_s13 + $0x3f8] sm:$0xff] %vm4883_vm4, %v4881_v26 }
 0x63a PF: > { %s17_s24 = sadd.s32 1, %s6253_s24  }
 0x63b   : > { %p14_p4 = scmp.ge.s32.totalorder %s17_s24, 4  }
 0x63d   :  { %16 = sbr.rel (!%p14_p4) target bundleno = 1 (0x1), region = 78 }

</bundles_post_ra>
